<compile_context>
chip_gen: v5e
topology: v5e:2x2
jax: 0.10.0
libtpu: 0.0.40
codegen_flags: <defaults>
</compile_context>

<pallas_src>
import functools

import jax
import jax.numpy as jnp
from jax.experimental import pallas as pl
from jax.experimental.pallas import tpu as pltpu


def recon_kernel(xc_ref, xdm_ref, xdp_ref, ws_ref, wc_ref, b_ref, o_ref, tap_ref):
    # xc_ref : (TD, H, W, C)    center slab of x
    # xdm_ref: (H, W, C)        D-halo slice at d0-1 (clamped; masked via pl.when)
    # xdp_ref: (H, W, C)        D-halo slice at d0+TD (clamped; masked via pl.when)
    # ws_ref : (6C, 3C)         block-structured shifted-tap weight, BN scale folded
    # wc_ref : (C, 3C)          center-tap weight (shared by all 3 branches), BN folded
    # b_ref  : (1, 3C)          folded BN bias (beta - mean*scale), branch-major
    # o_ref  : (TD*H*W, C)      output rows
    # tap_ref: (TD, H, W, 6C)   VMEM scratch holding the packed shifted taps
    td, H, W, C = xc_ref.shape
    R = td * H * W

    xc = xc_ref[...].astype(jnp.float32)

    # ------------------------------------------------------------------
    # Pack the six shifted taps.  Column layout:
    #   [0:C]  = x[d-1]   [C:2C] = x[d+1]
    #   [2C:3C]= x[h-1]   [3C:4C]= x[h+1]
    #   [4C:5C]= x[w-1]   [5C:6C]= x[w+1]
    # The scratch persists across grid steps, so every element read by the
    # matmul is rewritten each step: either slab data, a D halo, or an edge
    # zero (the SubMConv3d zero padding).
    # ------------------------------------------------------------------

    # ---- D-axis taps (kernel (3,1,1)); block edges come from the halo slices.
    if td > 1:
        tap_ref[1:td, :, :, 0 * C:1 * C] = xc[0:td - 1]          # x[d-1]
        tap_ref[0:td - 1, :, :, 1 * C:2 * C] = xc[1:td]          # x[d+1]
    zero_d = jnp.zeros((1, H, W, C), jnp.float32)
    tap_ref[0:1, :, :, 0 * C:1 * C] = zero_d
    tap_ref[td - 1:td, :, :, 1 * C:2 * C] = zero_d

    db = pl.program_id(1)

    @pl.when(db > 0)
    def _d_minus_halo():
        tap_ref[0:1, :, :, 0 * C:1 * C] = xdm_ref[...].astype(jnp.float32)[None]

    @pl.when(db < pl.num_programs(1) - 1)
    def _d_plus_halo():
        tap_ref[td - 1:td, :, :, 1 * C:2 * C] = xdp_ref[...].astype(jnp.float32)[None]

    # ---- H-axis taps (kernel (1,3,1)); fully inside the block, zero at edges.
    if H > 1:
        tap_ref[:, 1:H, :, 2 * C:3 * C] = xc[:, 0:H - 1]          # x[h-1]
        tap_ref[:, 0:H - 1, :, 3 * C:4 * C] = xc[:, 1:H]          # x[h+1]
    zero_h = jnp.zeros((td, 1, W, C), jnp.float32)
    tap_ref[:, 0:1, :, 2 * C:3 * C] = zero_h
    tap_ref[:, H - 1:H, :, 3 * C:4 * C] = zero_h

    # ---- W-axis taps (kernel (1,1,3)).
    if W > 1:
        tap_ref[:, :, 1:W, 4 * C:5 * C] = xc[:, :, 0:W - 1]       # x[w-1]
        tap_ref[:, :, 0:W - 1, 5 * C:6 * C] = xc[:, :, 1:W]       # x[w+1]
    zero_w = jnp.zeros((td, H, 1, C), jnp.float32)
    tap_ref[:, :, 0:1, 4 * C:5 * C] = zero_w
    tap_ref[:, :, W - 1:W, 5 * C:6 * C] = zero_w

    # ------------------------------------------------------------------
    # Fused matmuls over all taps / branches (BN scale folded into weights):
    # shifted taps go through one (R, 6C) x (6C, 3C) MXU matmul, the shared
    # center tap feeds all three branches via a second small (R, C) x (C, 3C)
    # matmul directly from the already-loaded slab (no scratch round-trip).
    # ------------------------------------------------------------------
    xcf = xc.reshape(R, C)
    taps = tap_ref[...].reshape(R, 6 * C)
    z = (jnp.dot(taps, ws_ref[...], preferred_element_type=jnp.float32)
         + jnp.dot(xcf, wc_ref[...], preferred_element_type=jnp.float32)
         + b_ref[...])
    s = jax.nn.sigmoid(z)                                        # (R, 3C)
    total = s[:, 0:C] + s[:, C:2 * C] + s[:, 2 * C:3 * C]        # sum of branches
    o_ref[...] = (total * xcf).astype(o_ref.dtype)               # residual multiply


def _pick_td(D, H, W, max_rows):
    """Largest divisor of D such that td*H*W <= max_rows (keeps VMEM small)."""
    td = 1
    for cand in range(1, D + 1):
        if D % cand == 0 and cand * H * W <= max_rows:
            td = cand
    return td


def recon_block(x, weights, gamma, beta, mean, var, *, eps=1e-5, td=None,
                max_rows=2048):
    """x: (N, D, H, W, C) dense voxels; weights: (3 branches, 3 taps, C_in, C_out).

    Branch order matches the PyTorch module: 0 = conv3x1x1 (D), 1 = conv1x3x1 (H),
    2 = conv1x1x3 (W).  C_in == C_out (required by the residual multiply).
    """
    N, D, H, W, C = x.shape
    assert weights.shape == (3, 3, C, C), weights.shape

    if td is None:
        # Budget the per-step working set well inside the 16-32 MiB scoped-VMEM
        # defaults so the same tile also fits v7x's smaller 64 MiB VMEM.
        td = _pick_td(D, H, W, max_rows)
    assert D % td == 0, (D, td)
    nb = D // td
    rows = td * H * W

    f32 = jnp.float32
    w = weights.astype(f32)
    scale = gamma.astype(f32) / jnp.sqrt(var.astype(f32) + eps)          # (3, C)
    bias = (beta.astype(f32) - mean.astype(f32) * scale).reshape(1, 3 * C)

    def ws(b, k):                       # conv weight with BN scale folded in
        return w[b, k] * scale[b][None, :]

    zc = jnp.zeros((C, C), f32)
    wf_shift = jnp.concatenate([
        jnp.concatenate([ws(0, 0), zc, zc], axis=1),              # tap x[d-1]
        jnp.concatenate([ws(0, 2), zc, zc], axis=1),              # tap x[d+1]
        jnp.concatenate([zc, ws(1, 0), zc], axis=1),              # tap x[h-1]
        jnp.concatenate([zc, ws(1, 2), zc], axis=1),              # tap x[h+1]
        jnp.concatenate([zc, zc, ws(2, 0)], axis=1),              # tap x[w-1]
        jnp.concatenate([zc, zc, ws(2, 2)], axis=1),              # tap x[w+1]
    ], axis=0)                                                    # (6C, 3C)
    wf_center = jnp.concatenate([ws(0, 1), ws(1, 1), ws(2, 1)], axis=1)  # (C, 3C)

    out = pl.pallas_call(
        recon_kernel,
        out_shape=jax.ShapeDtypeStruct((N, nb, rows, C), x.dtype),
        grid_spec=pltpu.PrefetchScalarGridSpec(
            num_scalar_prefetch=0,
            grid=(N, nb),
            in_specs=[
                # center slab of x: (td, H, W, C)
                pl.BlockSpec((None, td, H, W, C),
                             lambda n, db: (n, db, 0, 0, 0)),
                # one-slice D halos (block size 1 along D => element index),
                # clamped at the volume edges and masked in-kernel via pl.when
                pl.BlockSpec((None, None, H, W, C),
                             lambda n, db: (n, jnp.maximum(db * td - 1, 0),
                                            0, 0, 0)),
                pl.BlockSpec((None, None, H, W, C),
                             lambda n, db: (n, jnp.minimum(db * td + td, D - 1),
                                            0, 0, 0)),
                # fused weights / bias: constant index maps => stay resident
                pl.BlockSpec((6 * C, 3 * C), lambda n, db: (0, 0)),
                pl.BlockSpec((C, 3 * C), lambda n, db: (0, 0)),
                pl.BlockSpec((1, 3 * C), lambda n, db: (0, 0)),
            ],
            out_specs=pl.BlockSpec((None, None, rows, C),
                                   lambda n, db: (n, db, 0, 0)),
            scratch_shapes=[pltpu.VMEM((td, H, W, 6 * C), jnp.float32)],
        ),
        compiler_params=pltpu.CompilerParams(
            dimension_semantics=("parallel", "parallel")),
    )(x, x, x, wf_shift, wf_center, bias)
    return out.reshape(N, D, H, W, C)


# ----------------------------------------------------------------------------
# Pure-JAX reference (dense equivalent of the PyTorch forward, eval-mode BN).
# ----------------------------------------------------------------------------
def _shift_along(x, axis, offset):
    """out[..., i, ...] = x[..., i + offset, ...], zero padded at the edges."""
    if offset == 0:
        return x
    n = x.shape[axis]
    pad = [(0, 0)] * x.ndim
    sl = [slice(None)] * x.ndim
    if offset > 0:
        pad[axis] = (0, offset)
        sl[axis] = slice(offset, offset + n)
    else:
        pad[axis] = (-offset, 0)
        sl[axis] = slice(0, n)
    return jnp.pad(x, pad)[tuple(sl)]


def recon_block_ref(x, weights, gamma, beta, mean, var, eps=1e-5):
    out = jnp.zeros_like(x)
    for b, axis in enumerate((1, 2, 3)):
        acc = jnp.zeros_like(x)
        for k in range(3):
            acc = acc + jnp.einsum(
                'ndhwc,cf->ndhwf', _shift_along(x, axis, k - 1), weights[b, k],
                precision=jax.lax.Precision.HIGHEST)
        acc = (acc - mean[b]) / jnp.sqrt(var[b] + eps) * gamma[b] + beta[b]
        out = out + jax.nn.sigmoid(acc)
    return out * x


if __name__ == "__main__":
    key = jax.random.PRNGKey(0)
    k0, k1, k2, k3, k4, k5 = jax.random.split(key, 6)

    # Small shapes consistent with the module: the ReconNet stage of
    # Asymm_3d_spconv runs at 2 * init_size = 32 channels (C_in == C_out).
    N, D, H, W, C = 2, 8, 8, 8, 32

    x = jax.random.normal(k0, (N, D, H, W, C), jnp.float32)
    weights = 0.1 * jax.random.normal(k1, (3, 3, C, C), jnp.float32)  # (branch, tap, cin, cout)
    gamma = 1.0 + 0.1 * jax.random.normal(k2, (3, C), jnp.float32)
    beta = 0.1 * jax.random.normal(k3, (3, C), jnp.float32)
    mean = 0.1 * jax.random.normal(k4, (3, C), jnp.float32)
    var = jnp.abs(jax.random.normal(k5, (3, C), jnp.float32)) + 0.5

    # td=4 -> grid (2, 2): both the interior D-block halo path and the volume
    # edges are exercised, and the parallel grid has >= 2 steps for megacore.
    run = jax.jit(functools.partial(recon_block, td=4))
    out = run(x, weights, gamma, beta, mean, var)
    out = jax.block_until_ready(out)

    ref = recon_block_ref(x, weights, gamma, beta, mean, var)
    assert out.shape == ref.shape == (N, D, H, W, C)
    max_err = float(jnp.max(jnp.abs(out - ref)))
    assert jnp.allclose(out, ref, rtol=5e-4, atol=5e-4), max_err

    print("KERNEL_OK")
</pallas_src>

<mosaic_0001>
module attributes {stable_mosaic.version = 11 : i64} {
  func.func @recon_kernel(%arg0: i32, %arg1: i32, %arg2: memref<1x4x8x8x32xf32, #tpu.memory_space<vmem>>, %arg3: memref<1x1x8x8x32xf32, #tpu.memory_space<vmem>>, %arg4: memref<1x1x8x8x32xf32, #tpu.memory_space<vmem>>, %arg5: memref<192x96xf32, #tpu.memory_space<vmem>>, %arg6: memref<32x96xf32, #tpu.memory_space<vmem>>, %arg7: memref<1x96xf32, #tpu.memory_space<vmem>>, %arg8: memref<1x1x256x32xf32, #tpu.memory_space<vmem>>, %arg9: memref<4x8x8x192xf32, #tpu.memory_space<vmem>>) attributes {dimension_semantics = [#tpu.dimension_semantics<parallel>, #tpu.dimension_semantics<parallel>], iteration_bounds = array<i64: 2, 2>, scalar_prefetch = 0 : i64, scratch_operands = 1 : i64, tpu.core_type = #tpu.core_type<tc>, window_params = [{transform_indices = @transform_0, window_bounds = array<i64: 1, 4, 8, 8, 32>}, {transform_indices = @transform_1, window_bounds = array<i64: 1, 1, 8, 8, 32>}, {transform_indices = @transform_2, window_bounds = array<i64: 1, 1, 8, 8, 32>}, {pipeline_mode = #tpu.pipeline_mode<synchronous>, transform_indices = @transform_3, window_bounds = array<i64: 192, 96>}, {pipeline_mode = #tpu.pipeline_mode<synchronous>, transform_indices = @transform_4, window_bounds = array<i64: 32, 96>}, {pipeline_mode = #tpu.pipeline_mode<synchronous>, transform_indices = @transform_5, window_bounds = array<i64: 1, 96>}, {transform_indices = @transform_6, window_bounds = array<i64: 1, 1, 256, 32>}]} {
    %c0 = arith.constant 0 : index
    %c0_0 = arith.constant 0 : index
    %c0_1 = arith.constant 0 : index
    %c0_2 = arith.constant 0 : index
    %c0_3 = arith.constant 0 : index
    %0 = vector.load %arg2[%c0, %c0_0, %c0_1, %c0_2, %c0_3] : memref<1x4x8x8x32xf32, #tpu.memory_space<vmem>>, vector<1x4x8x8x32xf32>
    %1 = vector.shape_cast %0 : vector<1x4x8x8x32xf32> to vector<4x8x8x32xf32>
    %2 = vector.extract_strided_slice %1 {offsets = [0, 0, 0, 0], sizes = [3, 8, 8, 32], strides = [1, 1, 1, 1]} : vector<4x8x8x32xf32> to vector<3x8x8x32xf32>
    %c1 = arith.constant 1 : index
    %c0_4 = arith.constant 0 : index
    %c0_5 = arith.constant 0 : index
    %c0_6 = arith.constant 0 : index
    %3 = vector.load %arg9[%c1, %c0_4, %c0_5, %c0_6] : memref<4x8x8x192xf32, #tpu.memory_space<vmem>>, vector<3x8x8x32xf32>
    tpu.vector_store %arg9[%c1, %c0_4, %c0_5, %c0_6], %2 {strides = array<i32>} : memref<4x8x8x192xf32, #tpu.memory_space<vmem>>, vector<3x8x8x32xf32>,
    %4 = vector.extract_strided_slice %1 {offsets = [1, 0, 0, 0], sizes = [3, 8, 8, 32], strides = [1, 1, 1, 1]} : vector<4x8x8x32xf32> to vector<3x8x8x32xf32>
    %c0_7 = arith.constant 0 : index
    %c0_8 = arith.constant 0 : index
    %c0_9 = arith.constant 0 : index
    %c32 = arith.constant 32 : index
    %5 = vector.load %arg9[%c0_7, %c0_8, %c0_9, %c32] : memref<4x8x8x192xf32, #tpu.memory_space<vmem>>, vector<3x8x8x32xf32>
    tpu.vector_store %arg9[%c0_7, %c0_8, %c0_9, %c32], %4 {strides = array<i32>} : memref<4x8x8x192xf32, #tpu.memory_space<vmem>>, vector<3x8x8x32xf32>,
    %cst = arith.constant 0.000000e+00 : f32
    %6 = vector.broadcast %cst : f32 to vector<1x8x8x32xf32>
    %c0_10 = arith.constant 0 : index
    %c0_11 = arith.constant 0 : index
    %c0_12 = arith.constant 0 : index
    %c0_13 = arith.constant 0 : index
    %7 = vector.load %arg9[%c0_10, %c0_11, %c0_12, %c0_13] : memref<4x8x8x192xf32, #tpu.memory_space<vmem>>, vector<1x8x8x32xf32>
    tpu.vector_store %arg9[%c0_10, %c0_11, %c0_12, %c0_13], %6 {strides = array<i32>} : memref<4x8x8x192xf32, #tpu.memory_space<vmem>>, vector<1x8x8x32xf32>,
    %c3 = arith.constant 3 : index
    %c0_14 = arith.constant 0 : index
    %c0_15 = arith.constant 0 : index
    %c32_16 = arith.constant 32 : index
    %8 = vector.load %arg9[%c3, %c0_14, %c0_15, %c32_16] : memref<4x8x8x192xf32, #tpu.memory_space<vmem>>, vector<1x8x8x32xf32>
    tpu.vector_store %arg9[%c3, %c0_14, %c0_15, %c32_16], %6 {strides = array<i32>} : memref<4x8x8x192xf32, #tpu.memory_space<vmem>>, vector<1x8x8x32xf32>,
    %c0_i32 = arith.constant 0 : i32
    %9 = arith.cmpi sgt, %arg1, %c0_i32 : i32
    %10 = arith.extui %9 : i1 to i32
    %c0_i32_17 = arith.constant 0 : i32
    %11 = arith.cmpi ne, %10, %c0_i32_17 : i32
    scf.if %11 {
      %c0_65 = arith.constant 0 : index
      %c0_66 = arith.constant 0 : index
      %c0_67 = arith.constant 0 : index
      %c0_68 = arith.constant 0 : index
      %c0_69 = arith.constant 0 : index
      %54 = vector.load %arg3[%c0_65, %c0_66, %c0_67, %c0_68, %c0_69] : memref<1x1x8x8x32xf32, #tpu.memory_space<vmem>>, vector<1x1x8x8x32xf32>
      %55 = vector.shape_cast %54 : vector<1x1x8x8x32xf32> to vector<8x8x32xf32>
      %56 = vector.shape_cast %55 : vector<8x8x32xf32> to vector<1x8x8x32xf32>
      %c0_70 = arith.constant 0 : index
      %c0_71 = arith.constant 0 : index
      %c0_72 = arith.constant 0 : index
      %c0_73 = arith.constant 0 : index
      %57 = vector.load %arg9[%c0_70, %c0_71, %c0_72, %c0_73] : memref<4x8x8x192xf32, #tpu.memory_space<vmem>>, vector<1x8x8x32xf32>
      tpu.vector_store %arg9[%c0_70, %c0_71, %c0_72, %c0_73], %56 {strides = array<i32>} : memref<4x8x8x192xf32, #tpu.memory_space<vmem>>, vector<1x8x8x32xf32>,
    } else {
    }
    %c1_i32 = arith.constant 1 : i32
    %12 = arith.cmpi slt, %arg1, %c1_i32 : i32
    %13 = arith.extui %12 : i1 to i32
    %c0_i32_18 = arith.constant 0 : i32
    %14 = arith.cmpi ne, %13, %c0_i32_18 : i32
    scf.if %14 {
      %c0_65 = arith.constant 0 : index
      %c0_66 = arith.constant 0 : index
      %c0_67 = arith.constant 0 : index
      %c0_68 = arith.constant 0 : index
      %c0_69 = arith.constant 0 : index
      %54 = vector.load %arg4[%c0_65, %c0_66, %c0_67, %c0_68, %c0_69] : memref<1x1x8x8x32xf32, #tpu.memory_space<vmem>>, vector<1x1x8x8x32xf32>
      %55 = vector.shape_cast %54 : vector<1x1x8x8x32xf32> to vector<8x8x32xf32>
      %56 = vector.shape_cast %55 : vector<8x8x32xf32> to vector<1x8x8x32xf32>
      %c3_70 = arith.constant 3 : index
      %c0_71 = arith.constant 0 : index
      %c0_72 = arith.constant 0 : index
      %c32_73 = arith.constant 32 : index
      %57 = vector.load %arg9[%c3_70, %c0_71, %c0_72, %c32_73] : memref<4x8x8x192xf32, #tpu.memory_space<vmem>>, vector<1x8x8x32xf32>
      tpu.vector_store %arg9[%c3_70, %c0_71, %c0_72, %c32_73], %56 {strides = array<i32>} : memref<4x8x8x192xf32, #tpu.memory_space<vmem>>, vector<1x8x8x32xf32>,
    } else {
    }
    %15 = vector.extract_strided_slice %1 {offsets = [0, 0, 0, 0], sizes = [4, 7, 8, 32], strides = [1, 1, 1, 1]} : vector<4x8x8x32xf32> to vector<4x7x8x32xf32>
    %c0_19 = arith.constant 0 : index
    %c1_20 = arith.constant 1 : index
    %c0_21 = arith.constant 0 : index
    %c64 = arith.constant 64 : index
    %16 = vector.load %arg9[%c0_19, %c1_20, %c0_21, %c64] : memref<4x8x8x192xf32, #tpu.memory_space<vmem>>, vector<4x7x8x32xf32>
    tpu.vector_store %arg9[%c0_19, %c1_20, %c0_21, %c64], %15 {strides = array<i32>} : memref<4x8x8x192xf32, #tpu.memory_space<vmem>>, vector<4x7x8x32xf32>,
    %17 = vector.extract_strided_slice %1 {offsets = [0, 1, 0, 0], sizes = [4, 7, 8, 32], strides = [1, 1, 1, 1]} : vector<4x8x8x32xf32> to vector<4x7x8x32xf32>
    %c0_22 = arith.constant 0 : index
    %c0_23 = arith.constant 0 : index
    %c0_24 = arith.constant 0 : index
    %c96 = arith.constant 96 : index
    %18 = vector.load %arg9[%c0_22, %c0_23, %c0_24, %c96] : memref<4x8x8x192xf32, #tpu.memory_space<vmem>>, vector<4x7x8x32xf32>
    tpu.vector_store %arg9[%c0_22, %c0_23, %c0_24, %c96], %17 {strides = array<i32>} : memref<4x8x8x192xf32, #tpu.memory_space<vmem>>, vector<4x7x8x32xf32>,
    %cst_25 = arith.constant 0.000000e+00 : f32
    %19 = vector.broadcast %cst_25 : f32 to vector<4x1x8x32xf32>
    %c0_26 = arith.constant 0 : index
    %c0_27 = arith.constant 0 : index
    %c0_28 = arith.constant 0 : index
    %c64_29 = arith.constant 64 : index
    %20 = vector.load %arg9[%c0_26, %c0_27, %c0_28, %c64_29] : memref<4x8x8x192xf32, #tpu.memory_space<vmem>>, vector<4x1x8x32xf32>
    tpu.vector_store %arg9[%c0_26, %c0_27, %c0_28, %c64_29], %19 {strides = array<i32>} : memref<4x8x8x192xf32, #tpu.memory_space<vmem>>, vector<4x1x8x32xf32>,
    %c0_30 = arith.constant 0 : index
    %c7 = arith.constant 7 : index
    %c0_31 = arith.constant 0 : index
    %c96_32 = arith.constant 96 : index
    %21 = vector.load %arg9[%c0_30, %c7, %c0_31, %c96_32] : memref<4x8x8x192xf32, #tpu.memory_space<vmem>>, vector<4x1x8x32xf32>
    tpu.vector_store %arg9[%c0_30, %c7, %c0_31, %c96_32], %19 {strides = array<i32>} : memref<4x8x8x192xf32, #tpu.memory_space<vmem>>, vector<4x1x8x32xf32>,
    %22 = vector.extract_strided_slice %1 {offsets = [0, 0, 0, 0], sizes = [4, 8, 7, 32], strides = [1, 1, 1, 1]} : vector<4x8x8x32xf32> to vector<4x8x7x32xf32>
    %c0_33 = arith.constant 0 : index
    %c0_34 = arith.constant 0 : index
    %c1_35 = arith.constant 1 : index
    %c128 = arith.constant 128 : index
    %23 = vector.load %arg9[%c0_33, %c0_34, %c1_35, %c128] : memref<4x8x8x192xf32, #tpu.memory_space<vmem>>, vector<4x8x7x32xf32>
    tpu.vector_store %arg9[%c0_33, %c0_34, %c1_35, %c128], %22 {strides = array<i32>} : memref<4x8x8x192xf32, #tpu.memory_space<vmem>>, vector<4x8x7x32xf32>,
    %24 = vector.extract_strided_slice %1 {offsets = [0, 0, 1, 0], sizes = [4, 8, 7, 32], strides = [1, 1, 1, 1]} : vector<4x8x8x32xf32> to vector<4x8x7x32xf32>
    %c0_36 = arith.constant 0 : index
    %c0_37 = arith.constant 0 : index
    %c0_38 = arith.constant 0 : index
    %c160 = arith.constant 160 : index
    %25 = vector.load %arg9[%c0_36, %c0_37, %c0_38, %c160] : memref<4x8x8x192xf32, #tpu.memory_space<vmem>>, vector<4x8x7x32xf32>
    tpu.vector_store %arg9[%c0_36, %c0_37, %c0_38, %c160], %24 {strides = array<i32>} : memref<4x8x8x192xf32, #tpu.memory_space<vmem>>, vector<4x8x7x32xf32>,
    %cst_39 = arith.constant 0.000000e+00 : f32
    %26 = vector.broadcast %cst_39 : f32 to vector<4x8x1x32xf32>
    %c0_40 = arith.constant 0 : index
    %c0_41 = arith.constant 0 : index
    %c0_42 = arith.constant 0 : index
    %c128_43 = arith.constant 128 : index
    %27 = vector.load %arg9[%c0_40, %c0_41, %c0_42, %c128_43] : memref<4x8x8x192xf32, #tpu.memory_space<vmem>>, vector<4x8x1x32xf32>
    tpu.vector_store %arg9[%c0_40, %c0_41, %c0_42, %c128_43], %26 {strides = array<i32>} : memref<4x8x8x192xf32, #tpu.memory_space<vmem>>, vector<4x8x1x32xf32>,
    %c0_44 = arith.constant 0 : index
    %c0_45 = arith.constant 0 : index
    %c7_46 = arith.constant 7 : index
    %c160_47 = arith.constant 160 : index
    %28 = vector.load %arg9[%c0_44, %c0_45, %c7_46, %c160_47] : memref<4x8x8x192xf32, #tpu.memory_space<vmem>>, vector<4x8x1x32xf32>
    tpu.vector_store %arg9[%c0_44, %c0_45, %c7_46, %c160_47], %26 {strides = array<i32>} : memref<4x8x8x192xf32, #tpu.memory_space<vmem>>, vector<4x8x1x32xf32>,
    %29 = vector.shape_cast %1 : vector<4x8x8x32xf32> to vector<256x32xf32>
    %c0_48 = arith.constant 0 : index
    %c0_49 = arith.constant 0 : index
    %c0_50 = arith.constant 0 : index
    %c0_51 = arith.constant 0 : index
    %30 = vector.load %arg9[%c0_48, %c0_49, %c0_50, %c0_51] : memref<4x8x8x192xf32, #tpu.memory_space<vmem>>, vector<4x8x8x192xf32>
    %31 = vector.shape_cast %30 : vector<4x8x8x192xf32> to vector<256x192xf32>
    %c0_52 = arith.constant 0 : index
    %c0_53 = arith.constant 0 : index
    %32 = vector.load %arg5[%c0_52, %c0_53] : memref<192x96xf32, #tpu.memory_space<vmem>>, vector<192x96xf32>
    %cst_54 = arith.constant dense<0.000000e+00> : vector<256x96xf32>
    %33 = tpu.matmul %31, %32, %cst_54 {dimension_numbers = #tpu.dot_dimension_numbers<[1], [0], [0], [1], [0, 0, 1, 1], [], []>} : vector<256x192xf32>, vector<192x96xf32>, vector<256x96xf32> -> vector<256x96xf32>
    %c0_55 = arith.constant 0 : index
    %c0_56 = arith.constant 0 : index
    %34 = vector.load %arg6[%c0_55, %c0_56] : memref<32x96xf32, #tpu.memory_space<vmem>>, vector<32x96xf32>
    %cst_57 = arith.constant dense<0.000000e+00> : vector<256x96xf32>
    %35 = tpu.matmul %29, %34, %cst_57 {dimension_numbers = #tpu.dot_dimension_numbers<[1], [0], [0], [1], [0, 0, 1, 1], [], []>} : vector<256x32xf32>, vector<32x96xf32>, vector<256x96xf32> -> vector<256x96xf32>
    %36 = arith.addf %33, %35 : vector<256x96xf32>
    %c0_58 = arith.constant 0 : index
    %c0_59 = arith.constant 0 : index
    %37 = vector.load %arg7[%c0_58, %c0_59] : memref<1x96xf32, #tpu.memory_space<vmem>>, vector<1x96xf32>
    %38 = vector.broadcast %37 : vector<1x96xf32> to vector<256x96xf32>
    %39 = arith.addf %36, %38 : vector<256x96xf32>
    %40 = arith.negf %39 : vector<256x96xf32>
    %41 = math.exp %40 : vector<256x96xf32>
    %cst_60 = arith.constant 1.000000e+00 : f32
    %42 = vector.broadcast %cst_60 : f32 to vector<256x96xf32>
    %43 = arith.addf %42, %41 : vector<256x96xf32>
    %44 = arith.divf %42, %43 : vector<256x96xf32>
    %45 = vector.extract_strided_slice %44 {offsets = [0, 0], sizes = [256, 32], strides = [1, 1]} : vector<256x96xf32> to vector<256x32xf32>
    %46 = vector.extract_strided_slice %44 {offsets = [0, 32], sizes = [256, 32], strides = [1, 1]} : vector<256x96xf32> to vector<256x32xf32>
    %47 = arith.addf %45, %46 : vector<256x32xf32>
    %48 = vector.extract_strided_slice %44 {offsets = [0, 64], sizes = [256, 32], strides = [1, 1]} : vector<256x96xf32> to vector<256x32xf32>
    %49 = arith.addf %47, %48 : vector<256x32xf32>
    %50 = arith.mulf %49, %29 : vector<256x32xf32>
    %c0_61 = arith.constant 0 : index
    %c0_62 = arith.constant 0 : index
    %c0_63 = arith.constant 0 : index
    %c0_64 = arith.constant 0 : index
    %51 = vector.load %arg8[%c0_61, %c0_62, %c0_63, %c0_64] : memref<1x1x256x32xf32, #tpu.memory_space<vmem>>, vector<1x1x256x32xf32>
    %52 = vector.shape_cast %51 : vector<1x1x256x32xf32> to vector<256x32xf32>
    %53 = vector.shape_cast %50 : vector<256x32xf32> to vector<1x1x256x32xf32>
    tpu.vector_store %arg8[%c0_61, %c0_62, %c0_63, %c0_64], %53 {strides = array<i32>} : memref<1x1x256x32xf32, #tpu.memory_space<vmem>>, vector<1x1x256x32xf32>,
    return
  }
  func.func @transform_0(%arg0: i32, %arg1: i32) -> (i32, i32, i32, i32, i32) {
    %c0_i32 = arith.constant 0 : i32
    %c0_i32_0 = arith.constant 0 : i32
    %c0_i32_1 = arith.constant 0 : i32
    %c0_i32_2 = arith.constant 0 : i32
    return %arg0, %arg1, %c0_i32, %c0_i32_0, %c0_i32_1 : i32, i32, i32, i32, i32
  }
  func.func @transform_1(%arg0: i32, %arg1: i32) -> (i32, i32, i32, i32, i32) {
    %c4_i32 = arith.constant 4 : i32
    %0 = arith.muli %arg1, %c4_i32 : i32
    %c1_i32 = arith.constant 1 : i32
    %1 = arith.subi %0, %c1_i32 : i32
    %c0_i32 = arith.constant 0 : i32
    %2 = arith.maxsi %1, %c0_i32 : i32
    %c0_i32_0 = arith.constant 0 : i32
    %c0_i32_1 = arith.constant 0 : i32
    %c0_i32_2 = arith.constant 0 : i32
    %c0_i32_3 = arith.constant 0 : i32
    return %arg0, %2, %c0_i32_0, %c0_i32_1, %c0_i32_2 : i32, i32, i32, i32, i32
  }
  func.func @transform_2(%arg0: i32, %arg1: i32) -> (i32, i32, i32, i32, i32) {
    %c4_i32 = arith.constant 4 : i32
    %0 = arith.muli %arg1, %c4_i32 : i32
    %c4_i32_0 = arith.constant 4 : i32
    %1 = arith.addi %0, %c4_i32_0 : i32
    %c7_i32 = arith.constant 7 : i32
    %2 = arith.minsi %1, %c7_i32 : i32
    %c0_i32 = arith.constant 0 : i32
    %c0_i32_1 = arith.constant 0 : i32
    %c0_i32_2 = arith.constant 0 : i32
    %c0_i32_3 = arith.constant 0 : i32
    return %arg0, %2, %c0_i32, %c0_i32_1, %c0_i32_2 : i32, i32, i32, i32, i32
  }
  func.func @transform_3(%arg0: i32, %arg1: i32) -> (i32, i32) {
    %c0_i32 = arith.constant 0 : i32
    %c0_i32_0 = arith.constant 0 : i32
    %c0_i32_1 = arith.constant 0 : i32
    return %c0_i32, %c0_i32_0 : i32, i32
  }
  func.func @transform_4(%arg0: i32, %arg1: i32) -> (i32, i32) {
    %c0_i32 = arith.constant 0 : i32
    %c0_i32_0 = arith.constant 0 : i32
    %c0_i32_1 = arith.constant 0 : i32
    return %c0_i32, %c0_i32_0 : i32, i32
  }
  func.func @transform_5(%arg0: i32, %arg1: i32) -> (i32, i32) {
    %c0_i32 = arith.constant 0 : i32
    %c0_i32_0 = arith.constant 0 : i32
    %c0_i32_1 = arith.constant 0 : i32
    return %c0_i32, %c0_i32_0 : i32, i32
  }
  func.func @transform_6(%arg0: i32, %arg1: i32) -> (i32, i32, i32, i32) {
    %c0_i32 = arith.constant 0 : i32
    %c0_i32_0 = arith.constant 0 : i32
    %c0_i32_1 = arith.constant 0 : i32
    return %arg0, %arg1, %c0_i32, %c0_i32_0 : i32, i32, i32, i32
  }
}

</mosaic_0001>

<bundles_post_ra>
// kernel: recon_block.1
= control target key start
LH: loop header
LB: loop body
LE: loop exit
PB: predicated region body
PF: predicated region fallthrough
CT: control target
= control target key end

     0   :  { %11 = vsyncpa [#allocation4], 0  ;;  %s5543_s0 = inlined_call_operand.vmem [shape: f32[2,8,8,8,32], index: 0, kind: input, shape index: {}, may-alias: {0,1,2}]   ;;  %s5544_s1 = inlined_call_operand.vmem [shape: f32[2,8,8,8,32], index: 1, kind: input, shape index: {}, may-alias: {0,1,2}]   ;;  %s5545_s2 = inlined_call_operand.vmem [shape: f32[2,8,8,8,32], index: 2, kind: input, shape index: {}, may-alias: {0,1,2}]   ;;  %s5546_s3 = inlined_call_operand.vmem [shape: f32[192,96], index: 3, kind: input, shape index: {}]   ;;  %s5547_s4 = inlined_call_operand.vmem [shape: f32[32,96], index: 4, kind: input, shape index: {}]   ;;  %s5548_s5 = inlined_call_operand.vmem [shape: f32[1,96], index: 5, kind: input, shape index: {}]   ;;  %s5549_s6 = inlined_call_operand.hbm [shape: f32[2,2,256,32], index: 6, kind: output, shape index: {}]  }
   0x1   :  { %13 = vsyncpa [#allocation4 + $0x1], 0  ;;  %s3489_s21 = smov 0   ;;  %s3491_s22 = smov 0  }
   0x2   :  { %s3493_s23 = smov 0   ;;  %s3495_s24 = smov 0  }
   0x3   :  { %s3497_s25 = smov 0   ;;  %s3499_s26 = smov 0  }
   0x4   :  { %s3501_s27 = smov 0   ;;  %s3503_s28 = smov 0  }
   0x5 LB: > { %s2976_s29 = sadd.s32 4294967295, %s3445_s28   ;;  %s2977_s30 = sadd.s32 4294967294, %s3445_s28   ;;  %s3445_s28 = sphi %s3503_s28, %s19_s28   ;;  %s3441_s27 = sphi %s3501_s27, %s5660_s27   ;;  %s3437_s26 = sphi %s3499_s26, %s5659_s26   ;;  %s3433_s25 = sphi %s3497_s25, %s5658_s25   ;;  %s3429_s24 = sphi %s3495_s24, %s5657_s24   ;;  %s3425_s23 = sphi %s3493_s23, %s5656_s23   ;;  %s3421_s22 = sphi %s3491_s22, %s5655_s22   ;;  %s3417_s21 = sphi %s3489_s21, %s5654_s21  }
   0x6   : > { %s28_s7 = sadd.s32 1, %s3437_s26  ;;  %s31_s8 = sadd.s32 1, %s3441_s27 }
   0x7   : > { %p29_p0 = scmp.ge.s32.totalorder %s28_s7, 2  ;;  %p213_p1 = scmp.ne.s32.totalorder %s3425_s23, %s3421_s22 }
   0x8   : > { %p214_p2 = scmp.eq.s32.totalorder %s2976_s29, 3  ;;  %p219_p5 = scmp.ne.s32.totalorder %s3421_s22, %s3417_s21 }
   0x9   : > { %s5662_s7 = smov (%p29_p0, %s28_s7), 0  ;;  %s5664_s8 = smov (!%p29_p0, %s31_s8), %s3441_s27 }
   0xa   : > { %5576 = sst [smem:[#allocation6_spill]] %s5662_s7  ;;  %s199_s9 = ssub.s32 %s3437_s26, %s5662_s7 }
   0xb   : > { %p3540_p3 = por %p214_p2, %p213_p1  ;;  %p33_p4 = scmp.ge.s32.totalorder %s5664_s8, 2 }
   0xc   : > { %p220_p6 = scmp.eq.s32.totalorder %s2977_s30, 3  ;;  %p2986_p7 = scmp.ge.s32.totalorder %s3445_s28, 1 }
   0xd   : > { %s5666_s8 = smov (%p33_p4, %s5664_s8), 0  ;;  %p301_p9 = scmp.lt.s32.totalorder %s3445_s28, 5 }
   0xe   : > { %5578 = sst [smem:[#allocation7_spill]] %s5666_s8  ;;  %p3549_p8 = por %p220_p6, %p219_p5 }
   0xf   : > { %s198_s12 = ssub.s32 %s3441_s27, %s5666_s8  ;;  %s203_s13 = sadd.s32 1, %s3425_s23 }
  0x10   : > { %s200_s14 = sor.u32 %s199_s9, %s198_s12  ;;  %p302_p10 = pnand %p2986_p7, %p301_p9 }
  0x11   : > { %p201_p11 = scmp.eq.s32.totalorder %s200_s14, 0 }
  0x12   : > { %305 = sbr.rel (%p302_p10) target bundleno = 1052 (0x41c), region = 44 }
  0x13   : > { %s3558_s15 = scalar_select %p201_p11, %s3425_s23, %s203_s13  }
  0x17   : > { %s2988_s16 = sshll.u32 %s3429_s24, 2  ;;  %p363_p12 = scmp.lt.s32.totalorder %s3433_s25, 1  ;;  %vm440_vm0 = vcmask 261120   ;;  %vm561_vm1 = vcmask 523520   ;;  %v5552_v9 = vmov 0.0  }
  0x18   : > { %p365_p13 = scmp.lt.s32.totalorder %s2988_s16, 7  ;;  %s2993_s17 = sadd.s32 4294967295, %s2988_s16 }
  0x19   : > { %s364_s18 = scalar_select %p363_p12, %s3433_s25, 1 }
  0x1a   : > { %s366_s19 = scalar_select %p365_p13, %s2988_s16, 7 }
  0x1b   : > { %s3563_s20 = sshll.u32 %s364_s18, 6  ;;  %p375_p0 = scmp.gt.s32.totalorder %s2993_s17, 0 }
  0x1c   : > { %s2989_s29 = sshll.u32 %s366_s19, 3  ;;  %p2994_p1 = scmp.lt.s32.totalorder %s2993_s17, 7 }
  0x1d   : > { %s369_s30 = sadd.s32 %s3563_s20, %s2989_s29  ;;  %s391_s9 = sadd.s32 4, %s2988_s16 }
  0x1e   : > { %s2991_s12 = sshll.u32 %s369_s30, 3  ;;  %p3566_p2 = scmp.lt.s32.totalorder %s391_s9, 7 }
  0x1f   : > { %s3573_s7 = scalar_lea.vmem %s5543_s0, %s2991_s12  ;;  %s3447_s8 = smov 32  }
  0x20   : > { %s376_s18 = scalar_select %p375_p0, %s2993_s17, 0  ;;  %v3576_v0 = vld [vmem:[%s3573_s7 + $0x50] sm:$0xff]  ;;  %v3579_v1 = vld [vmem:[%s3573_s7 + $0x40] sm:$0xff]  ;;  %v3593_v2 = vld [vmem:[%s3573_s7 + $0x58] sm:$0xff] }
  0x21   : > { %5581 = vst [vmem:[#allocation8_spill] sm:$0xff] %v3576_v0  ;;  %s5668_s9 = smov (!%p3566_p2, %s391_s9), 7  ;;  %493 = vrot.lane.b32.xlu1 %v3576_v0, %s3447_s8  ;;  %489 = vrot.lane.b32.xlu0 %v3579_v1, %s3447_s8  ;;  %v3596_v3 = vld [vmem:[%s3573_s7 + $0x60] sm:$0xff]  ;;  %v3603_v4 = vld [vmem:[%s3573_s7 + $0x48] sm:$0xff]  ;;  %p3009_p4 = scmp.le.s32.totalorder %s3429_s24, 0 }
  0x22   : > { %451 = vst.msk [vmem:[#allocation2 + $0x120] sm:$0xff] %vm440_vm0, %v3576_v0  ;;  %s5670_s18 = smov (!%p2994_p1, %s376_s18), 7  ;;  %s5672_s9 = smov (!%p3566_p2, %s5668_s9), 7  ;;  %497 = vrot.lane.b32.xlu2 %v3596_v3, %s3447_s8  ;;  %v3610_v5 = vld [vmem:[%s3573_s7 + $0x78] sm:$0xff]  ;;  %v3616_v6 = vld [vmem:[%s3573_s7 + $0x70] sm:$0xff]  ;;  %v3639_v8 = vld [vmem:[%s3573_s7 + $0x68] sm:$0xff] }
  0x23   : > { %449 = vst.msk [vmem:[#allocation2 + $0x100] sm:$0xff] %vm440_vm0, %v3579_v1  ;;  %s2999_s16 = sshll.u32 %s5670_s18, 3  ;;  %s3006_s19 = sshll.u32 %s5672_s9, 3  ;;  %v3629_v7 = vld [vmem:[%s3573_s7 + $0x90] sm:$0xff]  ;;  %v3648_v10 = vld [vmem:[%s3573_s7 + $0x88] sm:$0xff]  ;;  %v3666_v12 = vld [vmem:[%s3573_s7 + $0xa0] sm:$0xff] }
  0x24   : > { %5582 = vst [vmem:[#allocation9_spill] sm:$0xff] %v3593_v2  ;;  %s383_s17 = sadd.s32 %s2999_s16, %s3563_s20  ;;  %s400_s30 = sadd.s32 %s3006_s19, %s3563_s20  ;;  %v3659_v11 = vld [vmem:[%s3573_s7 + $0xa8] sm:$0xff]  ;;  %v3673_v13 = vld [vmem:[%s3573_s7 + $0x80] sm:$0xff]  ;;  %v3684_v14 = vld [vmem:[%s3573_s7 + $0xb8] sm:$0xff] }
  0x25   : > { %5583 = vst [vmem:[#allocation10_spill] sm:$0xff] %v3596_v3  ;;  %s3001_s29 = sshll.u32 %s383_s17, 3  ;;  %s3008_s18 = sshll.u32 %s400_s30, 3  ;;  %v3693_v15 = vld [vmem:[%s3573_s7 + $0x98] sm:$0xff]  ;;  %v3700_v16 = vld [vmem:[%s3573_s7 + $0xb0] sm:$0xff]  ;;  %v3719_v17 = vld [vmem:[%s3573_s7 + $0xc0] sm:$0xff] }
  0x26   : > { %452 = vst.msk [vmem:[#allocation2 + $0x130] sm:$0xff] %vm440_vm0, %v3593_v2  ;;  %s3624_s14 = scalar_lea.vmem %s5544_s1, %s3001_s29  ;;  %s3634_s17 = scalar_lea.vmem %s5545_s2, %s3008_s18  ;;  %v3722_v18 = vld [vmem:[%s3573_s7 + $0xc8] sm:$0xff]  ;;  %v3736_v19 = vld [vmem:[%s3573_s7 + $0xd8] sm:$0xff]  ;;  %v3739_v20 = vld [vmem:[%s3573_s7 + $0xd0] sm:$0xff] }
  0x27   : > { %5584 = vst [vmem:[#allocation11_spill] sm:$0xff] %v3603_v4  ;;  %s359_s20 = sand.u32 1, %s3421_s22   ;;  %v3742_v21 = vld [vmem:[%s3573_s7 + $0xe0] sm:$0xff]  ;;  %v3751_v22 = vld [vmem:[%s3573_s7 + $0xf0] sm:$0xff]  ;;  %v3754_v23 = vld [vmem:[%s3573_s7 + $0xe8] sm:$0xff] }
  0x28   : > { %450 = vst.msk [vmem:[#allocation2 + $0x110] sm:$0xff] %vm440_vm0, %v3603_v4  ;;  %s3733_s19 = sshll.u32 %s359_s20, 8  ;;  %v3757_v24 = vld [vmem:[%s3573_s7 + $0xf8] sm:$0xff]  ;;  %v3769_v26 = vld [vmem:[%s3573_s7] sm:$0xff]  ;;  %v3782_v29 = vld [vmem:[%s3573_s7 + $0x10] sm:$0xff] }
  0x29   : > { %5585 = vst [vmem:[#allocation12_spill] sm:$0xff] %v3610_v5  ;;  %495 = vrot.lane.b32.xlu1 %v3593_v2, %s3447_s8  ;;  %491 = vrot.lane.b32.xlu0 %v3603_v4, %s3447_s8  ;;  %v3777_v28 = vld [vmem:[%s3573_s7 + $0x18] sm:$0xff]  ;;  %v3787_v30 = vld [vmem:[%s3573_s7 + $0x8] sm:$0xff] }
  0x2a   : > { %456 = vst.msk [vmem:[#allocation2 + $0x170] sm:$0xff] %vm440_vm0, %v3610_v5  ;;  %499 = vrot.lane.b32.xlu2 %v3639_v8, %s3447_s8  ;;  %v3792_v32 = vld [vmem:[%s3573_s7 + $0x30] sm:$0xff]  ;;  %v3802_v36 = vld [vmem:[%s3573_s7 + $0x28] sm:$0xff]  ;;  %v3807_v37 = vld [vmem:[%s3573_s7 + $0x20] sm:$0xff] }
  0x2b   : > { %5586 = vst [vmem:[#allocation13_spill] sm:$0xff] %v3616_v6  ;;  %v3819_v41 = vld [vmem:[%s3573_s7 + $0x38] sm:$0xff]  ;;  %s3846_s7 = scalar_lea.vmem [#allocation3], %s3733_s19 }
  0x2c   : > { %455 = vst.msk [vmem:[#allocation2 + $0x160] sm:$0xff] %vm440_vm0, %v3616_v6 }
  0x2d   : > { %453 = vst.msk [vmem:[#allocation2 + $0x140] sm:$0xff] %vm440_vm0, %v3596_v3 }
  0x2e   : > { %5587 = vst [vmem:[#allocation14_spill] sm:$0xff] %v3629_v7 }
  0x2f   : > { %459 = vst.msk [vmem:[#allocation2 + $0x1a0] sm:$0xff] %vm440_vm0, %v3629_v7 }
  0x30   : > { %5588 = vst [vmem:[#allocation15_spill] sm:$0xff] %v3639_v8 }
  0x31   : > { %597 = vst.msk [vmem:[#allocation2 + $0x1a0] sm:$0xff] %vm561_vm1, %v5552_v9  ;;  %503 = vrot.lane.b32.xlu1 %v3610_v5, %s3447_s8  ;;  %501 = vrot.lane.b32.xlu0 %v3616_v6, %s3447_s8 }
  0x32   : > { %5589 = vst [vmem:[#allocation16_spill] sm:$0xff] %v3648_v10  ;;  %505 = vrot.lane.b32.xlu2 %v3673_v13, %s3447_s8 }
  0x33   : > { %458 = vst.msk [vmem:[#allocation2 + $0x190] sm:$0xff] %vm440_vm0, %v3648_v10 }
  0x34   : > { %596 = vst.msk [vmem:[#allocation2 + $0x190] sm:$0xff] %vm561_vm1, %v5552_v9 }
  0x35   : > { %454 = vst.msk [vmem:[#allocation2 + $0x150] sm:$0xff] %vm440_vm0, %v3639_v8 }
  0x36   : > { %5590 = vst [vmem:[#allocation17_spill] sm:$0xff] %v3659_v11 }
  0x37   : > { %462 = vst.msk [vmem:[#allocation2 + $0x1d0] sm:$0xff] %vm440_vm0, %v3659_v11 }
  0x38   : > { %600 = vst.msk [vmem:[#allocation2 + $0x1d0] sm:$0xff] %vm561_vm1, %v5552_v9 }
  0x39   : > { %5591 = vst [vmem:[#allocation18_spill] sm:$0xff] %v3666_v12  ;;  %509 = vrot.lane.b32.xlu1 %v3629_v7, %s3447_s8  ;;  %507 = vrot.lane.b32.xlu0 %v3648_v10, %s3447_s8 }
  0x3a   : > { %461 = vst.msk [vmem:[#allocation2 + $0x1c0] sm:$0xff] %vm440_vm0, %v3666_v12  ;;  %511 = vrot.lane.b32.xlu2 %v3693_v15, %s3447_s8 }
  0x3b   : > { %599 = vst.msk [vmem:[#allocation2 + $0x1c0] sm:$0xff] %vm561_vm1, %v5552_v9 }
  0x3c   : > { %5592 = vst [vmem:[#allocation19_spill] sm:$0xff] %v3673_v13 }
  0x3d   : > { %457 = vst.msk [vmem:[#allocation2 + $0x180] sm:$0xff] %vm440_vm0, %v3673_v13 }
  0x3e   : > { %595 = vst.msk [vmem:[#allocation2 + $0x180] sm:$0xff] %vm561_vm1, %v5552_v9 }
  0x3f   : > { %5593 = vst [vmem:[#allocation20_spill] sm:$0xff] %v3684_v14 }
  0x40   : > { %464 = vst.msk [vmem:[#allocation2 + $0x1f0] sm:$0xff] %vm440_vm0, %v3684_v14 }
  0x41   : > { %602 = vst.msk [vmem:[#allocation2 + $0x1f0] sm:$0xff] %vm561_vm1, %v5552_v9  ;;  %515 = vrot.lane.b32.xlu1 %v3659_v11, %s3447_s8  ;;  %513 = vrot.lane.b32.xlu0 %v3666_v12, %s3447_s8 }
  0x42   : > { %5594 = vst [vmem:[#allocation21_spill] sm:$0xff] %v3693_v15  ;;  %517 = vrot.lane.b32.xlu2 %v3700_v16, %s3447_s8 }
  0x43   : > { %460 = vst.msk [vmem:[#allocation2 + $0x1b0] sm:$0xff] %vm440_vm0, %v3693_v15 }
  0x44   : > { %598 = vst.msk [vmem:[#allocation2 + $0x1b0] sm:$0xff] %vm561_vm1, %v5552_v9 }
  0x45   : > { %5595 = vst [vmem:[#allocation22_spill] sm:$0xff] %v3700_v16 }
  0x46   : > { %463 = vst.msk [vmem:[#allocation2 + $0x1e0] sm:$0xff] %vm440_vm0, %v3700_v16 }
  0x47   : > { %601 = vst.msk [vmem:[#allocation2 + $0x1e0] sm:$0xff] %vm561_vm1, %v5552_v9 }
  0x48   : > { %5596 = vst [vmem:[#allocation23_spill] sm:$0xff] %v3719_v17 }
  0x49   : > { %521 = vrot.lane.b32.xlu1 %v3719_v17, %s3447_s8  ;;  %519 = vrot.lane.b32.xlu0 %v3684_v14, %s3447_s8  ;;  %5597 = vst [vmem:[#allocation24_spill] sm:$0xff] %v3736_v19 }
  0x4a   : > { %523 = vrot.lane.b32.xlu2 %v3722_v18, %s3447_s8  ;;  %5598 = vst [vmem:[#allocation25_spill] sm:$0xff] %v3739_v20 }
  0x4b   : > { %5599 = vst [vmem:[#allocation26_spill] sm:$0xff] %v3742_v21 }
  0x4c   : > { %5600 = vst [vmem:[#allocation27_spill] sm:$0xff] %v3751_v22 }
  0x4d   : > { %5601 = vst [vmem:[#allocation28_spill] sm:$0xff] %v3754_v23 }
  0x4e   : > { %5602 = vst [vmem:[#allocation29_spill] sm:$0xff] %v3757_v24 }
  0x4f   : > { %441 = vst.msk [vmem:[#allocation2 + $0x80] sm:$0xff] %vm440_vm0, %v3769_v26 }
  0x50   : > { %444 = vst.msk [vmem:[#allocation2 + $0xb0] sm:$0xff] %vm440_vm0, %v3777_v28 }
  0x51   : > { %527 = vrot.lane.b32.xlu1 %v3736_v19, %s3447_s8  ;;  %525 = vrot.lane.b32.xlu0 %v3739_v20, %s3447_s8  ;;  %443 = vst.msk [vmem:[#allocation2 + $0xa0] sm:$0xff] %vm440_vm0, %v3782_v29 }
  0x52   : > { %529 = vrot.lane.b32.xlu2 %v3742_v21, %s3447_s8  ;;  %442 = vst.msk [vmem:[#allocation2 + $0x90] sm:$0xff] %vm440_vm0, %v3787_v30 }
  0x53   : > { %447 = vst.msk [vmem:[#allocation2 + $0xe0] sm:$0xff] %vm440_vm0, %v3792_v32 }
  0x54   : > { %446 = vst.msk [vmem:[#allocation2 + $0xd0] sm:$0xff] %vm440_vm0, %v3802_v36 }
  0x55   : > { %445 = vst.msk [vmem:[#allocation2 + $0xc0] sm:$0xff] %vm440_vm0, %v3807_v37 }
  0x56   : > { %448 = vst.msk [vmem:[#allocation2 + $0xf0] sm:$0xff] %vm440_vm0, %v3819_v41 }
  0x59   : > { %533 = vrot.lane.b32.xlu1 %v3751_v22, %s3447_s8  ;;  %531 = vrot.lane.b32.xlu0 %v3754_v23, %s3447_s8 }
  0x5a   : > { %535 = vrot.lane.b32.xlu2 %v3757_v24, %s3447_s8 }
  0x7c   : > { %v498_v25 = vpop.permute.xlu2 %497 }
  0x7d   : > { %566 = vst.msk [vmem:[#allocation2 + $0x40] sm:$0xff] %vm561_vm1, %v498_v25 }
  0x7e   : > { %590 = vst.msk [vmem:[#allocation2 + $0x40] sm:$0xff] %vm440_vm0, %v5552_v9 }
  0x84   : > { %v500_v27 = vpop.permute.xlu2 %499 }
  0x85   : > { %567 = vst.msk [vmem:[#allocation2 + $0x50] sm:$0xff] %vm561_vm1, %v500_v27 }
  0x86   : > { %591 = vst.msk [vmem:[#allocation2 + $0x50] sm:$0xff] %vm440_vm0, %v5552_v9 }
  0x8c   : > { %v506_v31 = vpop.permute.xlu2 %505 }
  0x8d   : > { %570 = vst.msk [vmem:[#allocation2 + $0x80] sm:$0xff] %vm561_vm1, %v506_v31 }
  0x93   : > { %v494_v33 = vpop.permute.xlu1 %493  ;;  %v490_v34 = vpop.permute.xlu0 %489 }
  0x94   : > { %564 = vst.msk [vmem:[#allocation2 + $0x20] sm:$0xff] %vm561_vm1, %v494_v33  ;;  %v512_v35 = vpop.permute.xlu2 %511 }
  0x95   : > { %588 = vst.msk [vmem:[#allocation2 + $0x20] sm:$0xff] %vm440_vm0, %v5552_v9 }
  0x96   : > { %562 = vst.msk [vmem:[#allocation2] sm:$0xff] %vm561_vm1, %v490_v34 }
  0x97   : > { %586 = vst.msk [vmem:[#allocation2] sm:$0xff] %vm440_vm0, %v5552_v9 }
  0x98   : > { %573 = vst.msk [vmem:[#allocation2 + $0xb0] sm:$0xff] %vm561_vm1, %v512_v35 }
  0x9b   : > { %v496_v38 = vpop.permute.xlu1 %495  ;;  %v492_v39 = vpop.permute.xlu0 %491 }
  0x9c   : > { %565 = vst.msk [vmem:[#allocation2 + $0x30] sm:$0xff] %vm561_vm1, %v496_v38  ;;  %v518_v40 = vpop.permute.xlu2 %517 }
  0x9d   : > { %589 = vst.msk [vmem:[#allocation2 + $0x30] sm:$0xff] %vm440_vm0, %v5552_v9 }
  0x9e   : > { %563 = vst.msk [vmem:[#allocation2 + $0x10] sm:$0xff] %vm561_vm1, %v492_v39 }
  0x9f   : > { %587 = vst.msk [vmem:[#allocation2 + $0x10] sm:$0xff] %vm440_vm0, %v5552_v9 }
  0xa0   : > { %576 = vst.msk [vmem:[#allocation2 + $0xe0] sm:$0xff] %vm561_vm1, %v518_v40 }
  0xa3   : > { %v504_v42 = vpop.permute.xlu1 %503  ;;  %v502_v43 = vpop.permute.xlu0 %501 }
  0xa4   : > { %569 = vst.msk [vmem:[#allocation2 + $0x70] sm:$0xff] %vm561_vm1, %v504_v42  ;;  %v524_v44 = vpop.permute.xlu2 %523 }
  0xa5   : > { %593 = vst.msk [vmem:[#allocation2 + $0x70] sm:$0xff] %vm440_vm0, %v5552_v9 }
  0xa6   : > { %568 = vst.msk [vmem:[#allocation2 + $0x60] sm:$0xff] %vm561_vm1, %v502_v43 }
  0xa7   : > { %592 = vst.msk [vmem:[#allocation2 + $0x60] sm:$0xff] %vm440_vm0, %v5552_v9 }
  0xa8   : > { %579 = vst.msk [vmem:[#allocation2 + $0x110] sm:$0xff] %vm561_vm1, %v524_v44 }
  0xab   : > { %v510_v45 = vpop.permute.xlu1 %509  ;;  %v508_v46 = vpop.permute.xlu0 %507 }
  0xac   : > { %572 = vst.msk [vmem:[#allocation2 + $0xa0] sm:$0xff] %vm561_vm1, %v510_v45  ;;  %v530_v47 = vpop.permute.xlu2 %529 }
  0xad   : > { %571 = vst.msk [vmem:[#allocation2 + $0x90] sm:$0xff] %vm561_vm1, %v508_v46 }
  0xae   : > { %582 = vst.msk [vmem:[#allocation2 + $0x140] sm:$0xff] %vm561_vm1, %v530_v47 }
  0xb3   : > { %v516_v48 = vpop.permute.xlu1 %515  ;;  %v514_v49 = vpop.permute.xlu0 %513 }
  0xb4   : > { %575 = vst.msk [vmem:[#allocation2 + $0xd0] sm:$0xff] %vm561_vm1, %v516_v48  ;;  %v536_v50 = vpop.permute.xlu2 %535 }
  0xb5   : > { %574 = vst.msk [vmem:[#allocation2 + $0xc0] sm:$0xff] %vm561_vm1, %v514_v49 }
  0xb6   : > { %585 = vst.msk [vmem:[#allocation2 + $0x170] sm:$0xff] %vm561_vm1, %v536_v50 }
  0xbb   : > { %v522_v51 = vpop.permute.xlu1 %521  ;;  %v520_v52 = vpop.permute.xlu0 %519 }
  0xbc   : > { %578 = vst.msk [vmem:[#allocation2 + $0x100] sm:$0xff] %vm561_vm1, %v522_v51 }
  0xbd   : > { %577 = vst.msk [vmem:[#allocation2 + $0xf0] sm:$0xff] %vm561_vm1, %v520_v52 }
  0xc3   : > { %v528_v53 = vpop.permute.xlu1 %527  ;;  %v526_v54 = vpop.permute.xlu0 %525 }
  0xc4   : > { %581 = vst.msk [vmem:[#allocation2 + $0x130] sm:$0xff] %vm561_vm1, %v528_v53 }
  0xc5   : > { %580 = vst.msk [vmem:[#allocation2 + $0x120] sm:$0xff] %vm561_vm1, %v526_v54 }
  0xc9   : > { %606 = sbr.rel (%p3009_p4) target bundleno = 215 (0xd7), region = 48 }
  0xcb   : > { %v534_v55 = vpop.permute.xlu1 %533  ;;  %v532_v56 = vpop.permute.xlu0 %531 }
  0xcc   : > { %584 = vst.msk [vmem:[#allocation2 + $0x160] sm:$0xff] %vm561_vm1, %v534_v55 }
  0xcd   : > { %583 = vst.msk [vmem:[#allocation2 + $0x150] sm:$0xff] %vm561_vm1, %v532_v56 }
  0xce   : > { %v607_v57 = vld [vmem:[%s3624_s14] sm:$0xff]  ;;  %v608_v58 = vld [vmem:[%s3624_s14 + $0x8] sm:$0xff]  ;;  %v609_v59 = vld [vmem:[%s3624_s14 + $0x10] sm:$0xff] }
  0xcf   : > { %615 = vst.msk [vmem:[#allocation2] sm:$0xff] %vm440_vm0, %v607_v57  ;;  %v610_v60 = vld [vmem:[%s3624_s14 + $0x18] sm:$0xff]  ;;  %v611_v61 = vld [vmem:[%s3624_s14 + $0x20] sm:$0xff]  ;;  %v612_v62 = vld [vmem:[%s3624_s14 + $0x28] sm:$0xff] }
  0xd0   : > { %616 = vst.msk [vmem:[#allocation2 + $0x10] sm:$0xff] %vm440_vm0, %v608_v58  ;;  %v613_v63 = vld [vmem:[%s3624_s14 + $0x30] sm:$0xff]  ;;  %v614_v25 = vld [vmem:[%s3624_s14 + $0x38] sm:$0xff] }
  0xd1   : > { %617 = vst.msk [vmem:[#allocation2 + $0x20] sm:$0xff] %vm440_vm0, %v609_v59 }
  0xd2   : > { %618 = vst.msk [vmem:[#allocation2 + $0x30] sm:$0xff] %vm440_vm0, %v610_v60 }
  0xd3   : > { %619 = vst.msk [vmem:[#allocation2 + $0x40] sm:$0xff] %vm440_vm0, %v611_v61 }
  0xd4   : > { %620 = vst.msk [vmem:[#allocation2 + $0x50] sm:$0xff] %vm440_vm0, %v612_v62 }
  0xd5   : > { %621 = vst.msk [vmem:[#allocation2 + $0x60] sm:$0xff] %vm440_vm0, %v613_v63 }
  0xd6   : > { %622 = vst.msk [vmem:[#allocation2 + $0x70] sm:$0xff] %vm440_vm0, %v614_v25 }
  0xd7 PF: > { %p3010_p5 = scmp.ge.s32.totalorder %s3429_s24, 1 }
  0xd8   : > { %s3449_s29 = smov (!%p3010_p5), 32  }
  0xd9   : > { %626 = sbr.rel (%p3010_p5) target bundleno = 356 (0x164), region = 52 }
  0xde   : > { %v629_v27 = vld [vmem:[%s3634_s17 + $0x10] sm:$0xff]  ;;  %v627_v31 = vld [vmem:[%s3634_s17] sm:$0xff]  ;;  %v630_v34 = vld [vmem:[%s3634_s17 + $0x18] sm:$0xff] }
  0xdf   : > { %647 = vrot.lane.b32.xlu1 %v629_v27, %s3449_s29  ;;  %643 = vrot.lane.b32.xlu0 %v627_v31, %s3449_s29  ;;  %v631_v33 = vld [vmem:[%s3634_s17 + $0x20] sm:$0xff]  ;;  %v628_v35 = vld [vmem:[%s3634_s17 + $0x8] sm:$0xff] }
  0xe0   : > { %651 = vrot.lane.b32.xlu2 %v631_v33, %s3449_s29  ;;  %v632_v38 = vld [vmem:[%s3634_s17 + $0x28] sm:$0xff]  ;;  %v634_v39 = vld [vmem:[%s3634_s17 + $0x38] sm:$0xff]  ;;  %v633_v40 = vld [vmem:[%s3634_s17 + $0x30] sm:$0xff] }
  0xe7   : > { %649 = vrot.lane.b32.xlu1 %v630_v34, %s3449_s29  ;;  %645 = vrot.lane.b32.xlu0 %v628_v35, %s3449_s29 }
  0xe8   : > { %653 = vrot.lane.b32.xlu2 %v632_v38, %s3449_s29 }
  0xef   : > { %657 = vrot.lane.b32.xlu1 %v634_v39, %s3449_s29  ;;  %655 = vrot.lane.b32.xlu0 %v633_v40, %s3449_s29 }
 0x13a   : > { %v652_v42 = vpop.permute.xlu2 %651 }
 0x13b   : > { %671 = vst.msk [vmem:[#allocation2 + $0x1c0] sm:$0xff] %vm561_vm1, %v652_v42 }
 0x142   : > { %v654_v43 = vpop.permute.xlu2 %653 }
 0x143   : > { %672 = vst.msk [vmem:[#allocation2 + $0x1d0] sm:$0xff] %vm561_vm1, %v654_v43 }
 0x151   : > { %v648_v44 = vpop.permute.xlu1 %647  ;;  %v644_v45 = vpop.permute.xlu0 %643 }
 0x152   : > { %669 = vst.msk [vmem:[#allocation2 + $0x1a0] sm:$0xff] %vm561_vm1, %v648_v44 }
 0x153   : > { %667 = vst.msk [vmem:[#allocation2 + $0x180] sm:$0xff] %vm561_vm1, %v644_v45 }
 0x159   : > { %v650_v46 = vpop.permute.xlu1 %649  ;;  %v646_v47 = vpop.permute.xlu0 %645 }
 0x15a   : > { %670 = vst.msk [vmem:[#allocation2 + $0x1b0] sm:$0xff] %vm561_vm1, %v650_v46 }
 0x15b   : > { %668 = vst.msk [vmem:[#allocation2 + $0x190] sm:$0xff] %vm561_vm1, %v646_v47 }
 0x161   : > { %v658_v48 = vpop.permute.xlu1 %657  ;;  %v656_v49 = vpop.permute.xlu0 %655 }
 0x162   : > { %674 = vst.msk [vmem:[#allocation2 + $0x1f0] sm:$0xff] %vm561_vm1, %v658_v48 }
 0x163   : > { %673 = vst.msk [vmem:[#allocation2 + $0x1e0] sm:$0xff] %vm561_vm1, %v656_v49 }
 0x164 PF: > { %v1016_v50 = vrot.slane %v3769_v26, 1  ;;  %v1334_v51 = vld [vmem:[%s5547_s4 + $0x18] sm:$0xff]  ;;  %s3450_s13 = smov 64   ;;  %v1333_v52 = vld [vmem:[%s5547_s4 + $0x10] sm:$0xff]  ;;  %v1332_v53 = vld [vmem:[%s5547_s4 + $0x8] sm:$0xff]  ;;  %v1017_v54 = vrot.slane %v3787_v30, 1 }
 0x165   : > { %682 = vrot.lane.b32.xlu0 %v3769_v26, %s3450_s13  ;;  %688 = vrot.lane.b32.xlu2 %v3777_v28, %s3450_s13  ;;  %v1331_v55 = vld [vmem:[%s5547_s4] sm:$0xff]  ;;  %v1018_v56 = vrot.slane %v3782_v29, 1  ;;  %v1019_v57 = vrot.slane %v3777_v28, 1  ;;  %s3451_s29 = smov 96   ;;  %v1020_v58 = vrot.slane %v3807_v37, 1  ;;  %v1021_v59 = vrot.slane %v3802_v36, 1 }
 0x166   : > { %1048 = vrot.lane.b32.xlu1 %v1016_v50, %s3447_s8  ;;  %1411 = vmatpush.msra.mxu0 %v1334_v51  ;;  %v1022_v60 = vrot.slane %v3792_v32, 1  ;;  %v1023_v61 = vrot.slane %v3819_v41, 1  ;;  %v1024_v62 = vrot.slane %v3579_v1, 1  ;;  %v1025_v63 = vrot.slane %v3603_v4, 1  ;;  %v3989_v25 = vld [vmem:[%s5546_s3 + $0xb8] sm:$0xff]  ;;  %v3994_v27 = vld [vmem:[%s5546_s3 + $0xb0] sm:$0xff] }
 0x167   : > { %3115 = vmatpush.msra.mxu3 %v1334_v51  ;;  %1730 = vmatpush.msra.mxu2 %v3989_v25  ;;  %v1026_v31 = vrot.slane %v3576_v0, 1  ;;  %v4009_v33 = vld [vmem:[%s5546_s3 + $0xa8] sm:$0xff]  ;;  %v919_v34 = vrot.slane %v3769_v26, 7  ;;  %vm983_vm2 = vcmask 261121   ;;  %vm1210_vm3 = vcmask 516352   ;;  %v4017_v35 = vld [vmem:[%s5546_s3 + $0xa0] sm:$0xff] }
 0x168   : > { %1412 = vmatpush.msra.mxu0 %v1333_v52  ;;  %v1027_v38 = vrot.slane %v3593_v2, 1  ;;  %v1322_v39 = vld [vmem:[%s5546_s3 + $0x78] sm:$0xff]  ;;  %v1321_v42 = vld [vmem:[%s5546_s3 + $0x70] sm:$0xff]  ;;  %vm767_vm4 = vcmask 785920   ;;  %v1320_v44 = vld [vmem:[%s5546_s3 + $0x68] sm:$0xff]  ;;  %v920_v45 = vrot.slane %v3787_v30, 7 }
 0x169   : > { %3116 = vmatpush.msra.mxu3 %v1333_v52  ;;  %1731 = vmatpush.msra.mxu2 %v3994_v27  ;;  %984 = vst.msk [vmem:[#allocation2 + $0x8] sm:$0xfe] %vm983_vm2, %v919_v34  ;;  %v4029_v40 = vld [vmem:[%s5546_s3 + $0x98] sm:$0xff]  ;;  %v4038_v43 = vld [vmem:[%s5546_s3 + $0x90] sm:$0xff]  ;;  %v4054_v46 = vld [vmem:[%s5546_s3 + $0x88] sm:$0xff]  ;;  %v1028_v51 = vrot.slane %v3596_v3, 1 }
 0x16a   : > { %1413 = vmatpush.msra.mxu0 %v1332_v53  ;;  %1211 = vst.msk [vmem:[#allocation2 + $0xf] sm:$0x1] %vm1210_vm3, %v5552_v9  ;;  %1609 = vmatpush.msra.mxu1 %v1322_v39  ;;  %v1319_v48 = vld [vmem:[%s5546_s3 + $0x60] sm:$0xff]  ;;  %v1318_v50 = vld [vmem:[%s5546_s3 + $0x58] sm:$0xff]  ;;  %v1317_v52 = vld [vmem:[%s5546_s3 + $0x50] sm:$0xff]  ;;  %vm1144_vm5 = vcmask 522496  }
 0x16b   : > { %3117 = vmatpush.msra.mxu3 %v1332_v53  ;;  %1732 = vmatpush.msra.mxu2 %v4009_v33  ;;  %985 = vst.msk [vmem:[#allocation2 + $0x18] sm:$0xfe] %vm983_vm2, %v920_v45  ;;  %v4065_v49 = vld [vmem:[%s5546_s3 + $0x80] sm:$0xff]  ;;  %v921_v53 = vrot.slane %v3782_v29, 7  ;;  %vm1177_vm6 = vcmask 253952   ;;  %v923_v45 = vrot.slane %v3807_v37, 7 }
 0x16c   : > { %1414 = vmatpush.msra.mxu0 %v1331_v55  ;;  %1610 = vmatpush.msra.mxu1 %v1321_v42  ;;  %1212 = vst.msk [vmem:[#allocation2 + $0x1f] sm:$0x1] %vm1210_vm3, %v5552_v9  ;;  %vm881_vm7 = vcmask 1048320   ;;  %vm1512_vm8 = vcmask 523264   ;;  %s2846_s17 = sshll.u32 %s3846_s7, 4  ;;  %s2847_s17 = int_to_ptr.vmem [resolvable:$true] %s2846_s17 }
 0x16d   : > { %684 = vrot.lane.b32.xlu0 %v3787_v30, %s3450_s13  ;;  %1050 = vrot.lane.b32.xlu2 %v1017_v54, %s3447_s8  ;;  %v1316_v54 = vld [vmem:[%s5546_s3 + $0x48] sm:$0xff]  ;;  %986 = vst.msk [vmem:[#allocation2 + $0x28] sm:$0xfe] %vm983_vm2, %v921_v53 }
 0x16e   : > { %686 = vrot.lane.b32.xlu1 %v3782_v29, %s3450_s13  ;;  %3011 = vmatmul.msk.f32.vlgmr.msra.gmra.mxu0 %vm440_vm0, %v3769_v26  ;;  %1213 = vst.msk [vmem:[#allocation2 + $0x2f] sm:$0x1] %vm1210_vm3, %v5552_v9 }
 0x16f   : > { %3118 = vmatpush.msra.mxu3 %v1331_v55  ;;  %1733 = vmatpush.msra.mxu2 %v4017_v35  ;;  %988 = vst.msk [vmem:[#allocation2 + $0x48] sm:$0xfe] %vm983_vm2, %v923_v45 }
 0x170   : > { %3036 = vmatmul.msk.f32.vlgmr.msra.gmra.mxu3 %vm440_vm0, %v3722_v18  ;;  %1611 = vmatpush.msra.mxu1 %v1320_v44  ;;  %1215 = vst.msk [vmem:[#allocation2 + $0x4f] sm:$0x1] %vm1210_vm3, %v5552_v9 }
 0x171   : > { %3119 = vmatpush.msrb.mxu3 %v1322_v39  ;;  %1734 = vmatpush.msra.mxu2 %v4029_v40 }
 0x172   : > { %1612 = vmatpush.msra.mxu1 %v1319_v48 }
 0x173   : > { %3120 = vmatpush.msrb.mxu3 %v1321_v42  ;;  %1735 = vmatpush.msra.mxu2 %v4038_v43  ;;  %v1309_v42 = vld [vmem:[%s5546_s3 + $0x10] sm:$0xff] }
 0x174   : > { %1613 = vmatpush.msra.mxu1 %v1318_v50 }
 0x175   : > { %690 = vrot.lane.b32.xlu0 %v3807_v37, %s3450_s13  ;;  %1052 = vrot.lane.b32.xlu2 %v1018_v56, %s3447_s8  ;;  %v1315_v56 = vld [vmem:[%s5546_s3 + $0x40] sm:$0xff] }
 0x176   : > { %692 = vrot.lane.b32.xlu1 %v3802_v36, %s3450_s13  ;;  %3012 = vmatmul.msk.f32.gmra.mxu0 %vm440_vm0, %v3787_v30 }
 0x177   : > { %3121 = vmatpush.msrb.mxu3 %v1320_v44  ;;  %1736 = vmatpush.msra.mxu2 %v4054_v46  ;;  %v1030_v44 = vrot.slane %v3616_v6, 1 }
 0x178   : > { %3037 = vmatmul.msk.f32.gmra.mxu3 %vm440_vm0, %v3739_v20  ;;  %1614 = vmatpush.msra.mxu1 %v1317_v52 }
 0x179   : > { %3122 = vmatpush.msrb.mxu3 %v1319_v48  ;;  %1737 = vmatpush.msra.mxu2 %v4065_v49  ;;  %v1307_v48 = vld [vmem:[%s5546_s3] sm:$0xff] }
 0x17a   : > { %1615 = vmatpush.msra.mxu1 %v1316_v54 }
 0x17b   : > { %3123 = vmatpush.msrb.mxu3 %v1318_v50 }
 0x17c   : > { %1616 = vmatpush.msra.mxu1 %v1315_v56 }
 0x17d   : > { %797 = vrot.lane.b32.xlu0 %v3787_v30, %s3451_s29  ;;  %694 = vrot.lane.b32.xlu2 %v3792_v32, %s3450_s13 }
 0x17e   : > { %1054 = vrot.lane.b32.xlu1 %v1019_v57, %s3447_s8  ;;  %3013 = vmatmul.msk.f32.gmra.mxu0 %vm440_vm0, %v3782_v29  ;;  %v1029_v57 = vrot.slane %v3639_v8, 1 }
 0x17f   : > { %3124 = vmatpush.msrb.mxu3 %v1317_v52  ;;  %v924_v52 = vrot.slane %v3802_v36, 7 }
 0x180   : > { %3038 = vmatmul.msk.f32.gmra.mxu3 %vm440_vm0, %v3736_v19 }
 0x181   : > { %3125 = vmatpush.msrb.mxu3 %v1316_v54  ;;  %989 = vst.msk [vmem:[#allocation2 + $0x58] sm:$0xfe] %vm983_vm2, %v924_v52 }
 0x182   : > { %1216 = vst.msk [vmem:[#allocation2 + $0x5f] sm:$0x1] %vm1210_vm3, %v5552_v9 }
 0x183   : > { %3126 = vmatpush.msrb.mxu3 %v1315_v56 }
 0x185   : > { %799 = vrot.lane.b32.xlu0 %v3782_v29, %s3451_s29  ;;  %696 = vrot.lane.b32.xlu2 %v3579_v1, %s3450_s13 }
 0x186   : > { %1056 = vrot.lane.b32.xlu1 %v1020_v58, %s3447_s8  ;;  %3014 = vmatmul.msk.f32.gmra.mxu0 %vm440_vm0, %v3777_v28  ;;  %v1314_v58 = vld [vmem:[%s5546_s3 + $0x38] sm:$0xff] }
 0x187   : > { %1617 = vmatpush.msra.mxu1 %v1314_v58  ;;  %3127 = vmatpush.msrb.mxu3 %v1314_v58  ;;  %v925_v58 = vrot.slane %v3792_v32, 7 }
 0x188   : > { %3039 = vmatmul.msk.f32.gmra.mxu3 %vm440_vm0, %v3742_v21 }
 0x189   : > { %990 = vst.msk [vmem:[#allocation2 + $0x68] sm:$0xfe] %vm983_vm2, %v925_v58 }
 0x18a   : > { %1217 = vst.msk [vmem:[#allocation2 + $0x6f] sm:$0x1] %vm1210_vm3, %v5552_v9 }
 0x18d   : > { %801 = vrot.lane.b32.xlu0 %v3777_v28, %s3451_s29  ;;  %803 = vrot.lane.b32.xlu2 %v3807_v37, %s3451_s29 }
 0x18e   : > { %1058 = vrot.lane.b32.xlu1 %v1021_v59, %s3447_s8  ;;  %3015 = vmatmul.msk.f32.gmra.mxu0 %vm440_vm0, %v3807_v37  ;;  %v1313_v59 = vld [vmem:[%s5546_s3 + $0x30] sm:$0xff] }
 0x18f   : > { %1618 = vmatpush.msra.mxu1 %v1313_v59  ;;  %3128 = vmatpush.msrb.mxu3 %v1313_v59  ;;  %v1032_v59 = vrot.slane %v3673_v13, 1 }
 0x190   : > { %3040 = vmatmul.msk.f32.gmra.mxu3 %vm440_vm0, %v3754_v23 }
 0x195   : > { %1060 = vrot.lane.b32.xlu0 %v1022_v60, %s3447_s8  ;;  %805 = vrot.lane.b32.xlu2 %v3802_v36, %s3451_s29  ;;  %v922_v60 = vrot.slane %v3777_v28, 7 }
 0x196   : > { %698 = vrot.lane.b32.xlu1 %v3603_v4, %s3450_s13  ;;  %3016 = vmatmul.msk.f32.gmra.mxu0 %vm440_vm0, %v3802_v36 }
 0x197   : > { %987 = vst.msk [vmem:[#allocation2 + $0x38] sm:$0xfe] %vm983_vm2, %v922_v60  ;;  %v926_v60 = vrot.slane %v3819_v41, 7 }
 0x198   : > { %3041 = vmatmul.msk.f32.gmra.mxu3 %vm440_vm0, %v3751_v22  ;;  %1214 = vst.msk [vmem:[#allocation2 + $0x3f] sm:$0x1] %vm1210_vm3, %v5552_v9 }
 0x199   : > { %991 = vst.msk [vmem:[#allocation2 + $0x78] sm:$0xfe] %vm983_vm2, %v926_v60  ;;  %v1036_v60 = vrot.slane %v3666_v12, 1 }
 0x19a   : > { %1218 = vst.msk [vmem:[#allocation2 + $0x7f] sm:$0x1] %vm1210_vm3, %v5552_v9 }
 0x19d   : > { %1062 = vrot.lane.b32.xlu0 %v1023_v61, %s3447_s8  ;;  %807 = vrot.lane.b32.xlu2 %v3792_v32, %s3451_s29 }
 0x19e   : > { %700 = vrot.lane.b32.xlu1 %v3576_v0, %s3450_s13  ;;  %3017 = vmatmul.msk.f32.gmra.mxu0 %vm440_vm0, %v3792_v32 }
 0x1a0   : > { %3042 = vmatmul.msk.f32.gmra.mxu3 %vm440_vm0, %v3757_v24 }
 0x1a5   : > { %1064 = vrot.lane.b32.xlu0 %v1024_v62, %s3447_s8  ;;  %722 = vrot.lane.b32.xlu2 %v3700_v16, %s3450_s13  ;;  %v1312_v62 = vld [vmem:[%s5546_s3 + $0x28] sm:$0xff] }
 0x1a6   : > { %809 = vrot.lane.b32.xlu1 %v3819_v41, %s3451_s29  ;;  %3018 = vmatmul.msk.f32.gmra.mxu0 %vm440_vm0, %v3819_v41 }
 0x1a7   : > { %1619 = vmatpush.msra.mxu1 %v1312_v62  ;;  %3129 = vmatpush.msrb.mxu3 %v1312_v62 }
 0x1ad   : > { %1066 = vrot.lane.b32.xlu0 %v1025_v63, %s3447_s8  ;;  %839 = vrot.lane.b32.xlu2 %v3722_v18, %s3451_s29  ;;  %v1311_v63 = vld [vmem:[%s5546_s3 + $0x20] sm:$0xff] }
 0x1ae   : > { %702 = vrot.lane.b32.xlu1 %v3593_v2, %s3450_s13  ;;  %3019 = vmatmul.msk.f32.gmra.mxu0 %vm440_vm0, %v3579_v1 }
 0x1af   : > { %1620 = vmatpush.msra.mxu1 %v1311_v63  ;;  %3130 = vmatpush.msrb.mxu3 %v1311_v63  ;;  %v927_v63 = vrot.slane %v3579_v1, 7 }
 0x1b1   : > { %992 = vst.msk [vmem:[#allocation2 + $0x88] sm:$0xfe] %vm983_vm2, %v927_v63 }
 0x1b2   : > { %1219 = vst.msk [vmem:[#allocation2 + $0x8f] sm:$0x1] %vm1210_vm3, %v5552_v9 }
 0x1b5   : > { %1068 = vrot.lane.b32.xlu0 %v1026_v31, %s3447_s8  ;;  %724 = vrot.lane.b32.xlu2 %v3719_v17, %s3450_s13  ;;  %v1310_v31 = vld [vmem:[%s5546_s3 + $0x18] sm:$0xff] }
 0x1b6   : > { %811 = vrot.lane.b32.xlu1 %v3603_v4, %s3451_s29  ;;  %3020 = vmatmul.msk.f32.gmra.mxu0 %vm440_vm0, %v3603_v4 }
 0x1b7   : > { %1621 = vmatpush.msra.mxu1 %v1310_v31  ;;  %3131 = vmatpush.msrb.mxu3 %v1310_v31  ;;  %v1033_v31 = vrot.slane %v3648_v10, 1 }
 0x1b9   : > { %1622 = vmatpush.msra.mxu1 %v1309_v42  ;;  %3132 = vmatpush.msrb.mxu3 %v1309_v42 }
 0x1bd   : > { %1070 = vrot.lane.b32.xlu0 %v1027_v38, %s3447_s8  ;;  %813 = vrot.lane.b32.xlu2 %v3576_v0, %s3451_s29 }
 0x1be   : > { %841 = vrot.lane.b32.xlu1 %v3739_v20, %s3451_s29  ;;  %3021 = vmatmul.msk.f32.gmra.mxu0 %vm440_vm0, %v3576_v0 }
 0x1bf   : > { %v689_v47 = vpop.permute.xlu2 %688 }
 0x1c0   : > { %771 = vst.msk [vmem:[#allocation2 + $0x40] sm:$0xff] %vm767_vm4, %v689_v47  ;;  %v1308_v47 = vld [vmem:[%s5546_s3 + $0x8] sm:$0xff] }
 0x1c1   : > { %1623 = vmatpush.msra.mxu1 %v1308_v47  ;;  %3133 = vmatpush.msrb.mxu3 %v1308_v47  ;;  %v1041_v47 = vrot.slane %v3722_v18, 1 }
 0x1c3   : > { %1624 = vmatpush.msra.mxu1 %v1307_v48  ;;  %3134 = vmatpush.msrb.mxu3 %v1307_v48  ;;  %v928_v48 = vrot.slane %v3603_v4, 7 }
 0x1c5   : > { %726 = vrot.lane.b32.xlu0 %v3722_v18, %s3450_s13  ;;  %843 = vrot.lane.b32.xlu2 %v3736_v19, %s3451_s29  ;;  %993 = vst.msk [vmem:[#allocation2 + $0x98] sm:$0xfe] %vm983_vm2, %v928_v48 }
 0x1c6   : > { %1072 = vrot.lane.b32.xlu1 %v1028_v51, %s3447_s8  ;;  %3022 = vmatmul.msk.f32.gmra.mxu0 %vm440_vm0, %v3593_v2  ;;  %1220 = vst.msk [vmem:[#allocation2 + $0x9f] sm:$0x1] %vm1210_vm3, %v5552_v9 }
 0x1c7   : > { %v1051_v55 = vpop.permute.xlu2 %1050  ;;  %3135 = vmatpush.msra.mxu3 %v3989_v25 }
 0x1c8   : > { %1146 = vst.msk [vmem:[#allocation2 + $0x18] sm:$0x7f] %vm1144_vm5, %v1051_v55  ;;  %v1031_v55 = vrot.slane %v3610_v5, 1 }
 0x1c9   : > { %1179 = vst.msk [vmem:[#allocation2 + $0x18] sm:$0x1] %vm1177_vm6, %v5552_v9  ;;  %3136 = vmatpush.msra.mxu3 %v3994_v27 }
 0x1cb   : > { %3137 = vmatpush.msra.mxu3 %v4009_v33 }
 0x1cd   : > { %815 = vrot.lane.b32.xlu0 %v3593_v2, %s3451_s29  ;;  %1074 = vrot.lane.b32.xlu2 %v1029_v57, %s3447_s8 }
 0x1ce   : > { %728 = vrot.lane.b32.xlu1 %v3739_v20, %s3450_s13  ;;  %3023 = vmatmul.msk.f32.gmra.mxu0 %vm440_vm0, %v3596_v3 }
 0x1cf   : > { %v1053_v61 = vpop.permute.xlu2 %1052  ;;  %3138 = vmatpush.msra.mxu3 %v4017_v35 }
 0x1d0   : > { %1147 = vst.msk [vmem:[#allocation2 + $0x28] sm:$0x7f] %vm1144_vm5, %v1053_v61  ;;  %v1246_v57 = vld [vmem:[#allocation2 + $0x18] sm:$0xff] }
 0x1d1   : > { %1180 = vst.msk [vmem:[#allocation2 + $0x28] sm:$0x1] %vm1177_vm6, %v5552_v9  ;;  %3139 = vmatpush.msra.mxu3 %v4029_v40 }
 0x1d3   : > { %3140 = vmatpush.msra.mxu3 %v4038_v43 }
 0x1d5   : > { %845 = vrot.lane.b32.xlu0 %v3742_v21, %s3451_s29  ;;  %730 = vrot.lane.b32.xlu2 %v3736_v19, %s3450_s13 }
 0x1d6   : > { %817 = vrot.lane.b32.xlu1 %v3596_v3, %s3451_s29  ;;  %3024 = vmatmul.msk.f32.gmra.mxu0 %vm440_vm0, %v3639_v8 }
 0x1d7   : > { %v683_v34 = vpop.permute.xlu0 %682  ;;  %v695_v38 = vpop.permute.xlu2 %694  ;;  %3141 = vmatpush.msra.mxu3 %v4054_v46 }
 0x1d8   : > { %768 = vst.msk [vmem:[#allocation2 + $0x10] sm:$0xff] %vm767_vm4, %v683_v34  ;;  %v1049_v39 = vpop.permute.xlu1 %1048  ;;  %v1248_v35 = vld [vmem:[#allocation2 + $0x28] sm:$0xff] }
 0x1d9   : > { %1145 = vst.msk [vmem:[#allocation2 + $0x8] sm:$0x7f] %vm1144_vm5, %v1049_v39  ;;  %3142 = vmatpush.msra.mxu3 %v4065_v49 }
 0x1da   : > { %1178 = vst.msk [vmem:[#allocation2 + $0x8] sm:$0x1] %vm1177_vm6, %v5552_v9 }
 0x1db   : > { %774 = vst.msk [vmem:[#allocation2 + $0x70] sm:$0xff] %vm767_vm4, %v695_v38 }
 0x1dc   : > { %915 = vst.msk [vmem:[#allocation2 + $0x70] sm:$0xff] %vm881_vm7, %v5552_v9 }
 0x1dd   : > { %1076 = vrot.lane.b32.xlu0 %v1030_v44, %s3447_s8  ;;  %819 = vrot.lane.b32.xlu2 %v3639_v8, %s3451_s29 }
 0x1de   : > { %847 = vrot.lane.b32.xlu1 %v3754_v23, %s3451_s29  ;;  %3025 = vmatmul.msk.f32.gmra.mxu0 %vm440_vm0, %v3616_v6 }
 0x1df   : > { %v685_v50 = vpop.permute.xlu0 %684  ;;  %v697_v51 = vpop.permute.xlu2 %696 }
 0x1e0   : > { %769 = vst.msk [vmem:[#allocation2 + $0x20] sm:$0xff] %vm767_vm4, %v685_v50  ;;  %v687_v53 = vpop.permute.xlu1 %686  ;;  %v1034_v50 = vrot.slane %v3629_v7, 1 }
 0x1e1   : > { %770 = vst.msk [vmem:[#allocation2 + $0x30] sm:$0xff] %vm767_vm4, %v687_v53  ;;  %v1244_v54 = vld [vmem:[#allocation2 + $0x8] sm:$0xff] }
 0x1e2   : > { %3043 = vmatmul.msk.f32.vlgmr.msra.gmra.mxu2 %vm1512_vm8, %v1244_v54  ;;  %775 = vst.msk [vmem:[#allocation2 + $0x90] sm:$0xff] %vm767_vm4, %v697_v51 }
 0x1e5   : > { %732 = vrot.lane.b32.xlu0 %v3742_v21, %s3450_s13  ;;  %849 = vrot.lane.b32.xlu2 %v3751_v22, %s3451_s29 }
 0x1e6   : > { %1078 = vrot.lane.b32.xlu1 %v1031_v55, %s3447_s8  ;;  %3026 = vmatmul.msk.f32.gmra.mxu0 %vm440_vm0, %v3610_v5 }
 0x1e7   : > { %v691_v56 = vpop.permute.xlu0 %690  ;;  %v804_v25 = vpop.permute.xlu2 %803 }
 0x1e8   : > { %772 = vst.msk [vmem:[#allocation2 + $0x50] sm:$0xff] %vm767_vm4, %v691_v56  ;;  %v693_v27 = vpop.permute.xlu1 %692  ;;  %v1042_v56 = vrot.slane %v3739_v20, 1 }
 0x1e9   : > { %773 = vst.msk [vmem:[#allocation2 + $0x60] sm:$0xff] %vm767_vm4, %v693_v27 }
 0x1ea   : > { %3044 = vmatmul.msk.f32.gmra.mxu2 %vm1512_vm8, %v1246_v57  ;;  %885 = vst.msk [vmem:[#allocation2 + $0x30] sm:$0xff] %vm881_vm7, %v804_v25  ;;  %v929_v57 = vrot.slane %v3576_v0, 7  ;;  %v1035_v25 = vrot.slane %v3693_v15, 1 }
 0x1ec   : > { %994 = vst.msk [vmem:[#allocation2 + $0xa8] sm:$0xfe] %vm983_vm2, %v929_v57  ;;  %v1045_v57 = vrot.slane %v3754_v23, 1 }
 0x1ed   : > { %704 = vrot.lane.b32.xlu0 %v3596_v3, %s3450_s13  ;;  %734 = vrot.lane.b32.xlu2 %v3754_v23, %s3450_s13  ;;  %1221 = vst.msk [vmem:[#allocation2 + $0xaf] sm:$0x1] %vm1210_vm3, %v5552_v9 }
 0x1ee   : > { %821 = vrot.lane.b32.xlu1 %v3616_v6, %s3451_s29  ;;  %3027 = vmatmul.msk.f32.gmra.mxu0 %vm440_vm0, %v3673_v13 }
 0x1ef   : > { %v798_v33 = vpop.permute.xlu0 %797  ;;  %v806_v40 = vpop.permute.xlu2 %805 }
 0x1f0   : > { %882 = vst.msk [vmem:[#allocation2] sm:$0xff] %vm881_vm7, %v798_v33  ;;  %v1055_v43 = vpop.permute.xlu1 %1054 }
 0x1f1   : > { %910 = vst.msk [vmem:[#allocation2] sm:$0xff] %vm767_vm4, %v5552_v9 }
 0x1f2   : > { %1148 = vst.msk [vmem:[#allocation2 + $0x38] sm:$0x7f] %vm1144_vm5, %v1055_v43  ;;  %3045 = vmatmul.msk.f32.gmra.mxu2 %vm1512_vm8, %v1248_v35 }
 0x1f3   : > { %1181 = vst.msk [vmem:[#allocation2 + $0x38] sm:$0x1] %vm1177_vm6, %v5552_v9 }
 0x1f4   : > { %886 = vst.msk [vmem:[#allocation2 + $0x40] sm:$0xff] %vm881_vm7, %v806_v40  ;;  %v1249_v40 = vld [vmem:[#allocation2 + $0x30] sm:$0xff] }
 0x1f5   : > { %1080 = vrot.lane.b32.xlu0 %v1032_v59, %s3447_s8  ;;  %706 = vrot.lane.b32.xlu2 %v3639_v8, %s3450_s13  ;;  %v930_v59 = vrot.slane %v3593_v2, 7 }
 0x1f6   : > { %851 = vrot.lane.b32.xlu1 %v3757_v24, %s3451_s29  ;;  %3028 = vmatmul.msk.f32.gmra.mxu0 %vm440_vm0, %v3648_v10 }
 0x1f7   : > { %v800_v46 = vpop.permute.xlu0 %799  ;;  %v808_v49 = vpop.permute.xlu2 %807  ;;  %995 = vst.msk [vmem:[#allocation2 + $0xb8] sm:$0xfe] %vm983_vm2, %v930_v59 }
 0x1f8   : > { %883 = vst.msk [vmem:[#allocation2 + $0x10] sm:$0xff] %vm881_vm7, %v800_v46  ;;  %v1057_v61 = vpop.permute.xlu1 %1056  ;;  %v1243_v62 = vld [vmem:[#allocation2] sm:$0xff] }
 0x1f9   : > { %1149 = vst.msk [vmem:[#allocation2 + $0x48] sm:$0x7f] %vm1144_vm5, %v1057_v61  ;;  %1625 = vmatmul.f32.vlgmr.msra.gmra.mxu1 %v1243_v62 }
 0x1fa   : > { %1182 = vst.msk [vmem:[#allocation2 + $0x48] sm:$0x1] %vm1177_vm6, %v5552_v9  ;;  %v1250_v34 = vld [vmem:[#allocation2 + $0x38] sm:$0xff] }
 0x1fb   : > { %3046 = vmatmul.msk.f32.gmra.mxu2 %vm1512_vm8, %v1250_v34  ;;  %887 = vst.msk [vmem:[#allocation2 + $0x50] sm:$0xff] %vm881_vm7, %v808_v49  ;;  %v1251_v63 = vld [vmem:[#allocation2 + $0x40] sm:$0xff]  ;;  %v931_v34 = vrot.slane %v3596_v3, 7 }
 0x1fc   : > { %1222 = vst.msk [vmem:[#allocation2 + $0xbf] sm:$0x1] %vm1210_vm3, %v5552_v9 }
 0x1fd   : > { %823 = vrot.lane.b32.xlu0 %v3610_v5, %s3451_s29  ;;  %1082 = vrot.lane.b32.xlu2 %v1033_v31, %s3447_s8  ;;  %996 = vst.msk [vmem:[#allocation2 + $0xc8] sm:$0xfe] %vm983_vm2, %v931_v34  ;;  %v1046_v34 = vrot.slane %v3751_v22, 1 }
 0x1fe   : > { %736 = vrot.lane.b32.xlu1 %v3751_v22, %s3450_s13  ;;  %3029 = vmatmul.msk.f32.gmra.mxu0 %vm440_vm0, %v3629_v7  ;;  %1223 = vst.msk [vmem:[#allocation2 + $0xcf] sm:$0x1] %vm1210_vm3, %v5552_v9 }
 0x1ff   : > { %v802_v38 = vpop.permute.xlu0 %801  ;;  %v1245_v39 = vld [vmem:[#allocation2 + $0x10] sm:$0xff]  ;;  %v723_v42 = vpop.permute.xlu2 %722 }
 0x200   : > { %884 = vst.msk [vmem:[#allocation2 + $0x20] sm:$0xff] %vm881_vm7, %v802_v38  ;;  %v1059_v44 = vpop.permute.xlu1 %1058  ;;  %v1043_v38 = vrot.slane %v3736_v19, 1 }
 0x201   : > { %1150 = vst.msk [vmem:[#allocation2 + $0x58] sm:$0x7f] %vm1144_vm5, %v1059_v44  ;;  %1628 = vmatmul.f32.gmra.mxu1 %v1245_v39  ;;  %v1252_v45 = vld [vmem:[#allocation2 + $0x48] sm:$0xff]  ;;  %v932_v44 = vrot.slane %v3639_v8, 7 }
 0x202   : > { %1183 = vst.msk [vmem:[#allocation2 + $0x58] sm:$0x1] %vm1177_vm6, %v5552_v9 }
 0x203   : > { %3047 = vmatmul.msk.f32.gmra.mxu2 %vm1512_vm8, %v1252_v45  ;;  %788 = vst.msk [vmem:[#allocation2 + $0x170] sm:$0xff] %vm767_vm4, %v723_v42 }
 0x204   : > { %917 = vst.msk [vmem:[#allocation2 + $0x170] sm:$0xff] %vm881_vm7, %v5552_v9 }
 0x205   : > { %708 = vrot.lane.b32.xlu0 %v3616_v6, %s3450_s13  ;;  %1098 = vrot.lane.b32.xlu2 %v1041_v47, %s3447_s8  ;;  %v1253_v47 = vld [vmem:[#allocation2 + $0x50] sm:$0xff]  ;;  %997 = vst.msk [vmem:[#allocation2 + $0xd8] sm:$0xfe] %vm983_vm2, %v932_v44 }
 0x206   : > { %1084 = vrot.lane.b32.xlu1 %v1034_v50, %s3447_s8  ;;  %3030 = vmatmul.msk.f32.gmra.mxu0 %vm440_vm0, %v3693_v15  ;;  %v1037_v50 = vrot.slane %v3659_v11, 1  ;;  %1224 = vst.msk [vmem:[#allocation2 + $0xdf] sm:$0x1] %vm1210_vm3, %v5552_v9 }
 0x207   : > { %v1061_v51 = vpop.permute.xlu0 %1060  ;;  %v1247_v52 = vld [vmem:[#allocation2 + $0x20] sm:$0xff]  ;;  %v840_v53 = vpop.permute.xlu2 %839 }
 0x208   : > { %1151 = vst.msk [vmem:[#allocation2 + $0x68] sm:$0x7f] %vm1144_vm5, %v1061_v51  ;;  %v699_v54 = vpop.permute.xlu1 %698  ;;  %v1044_v51 = vrot.slane %v3742_v21, 1 }
 0x209   : > { %1184 = vst.msk [vmem:[#allocation2 + $0x68] sm:$0x1] %vm1177_vm6, %v5552_v9  ;;  %1631 = vmatmul.f32.gmra.mxu1 %v1247_v52  ;;  %v1254_v55 = vld [vmem:[#allocation2 + $0x58] sm:$0xff] }
 0x20a   : > { %776 = vst.msk [vmem:[#allocation2 + $0xa0] sm:$0xff] %vm767_vm4, %v699_v54 }
 0x20b   : > { %3048 = vmatmul.msk.f32.gmra.mxu2 %vm1512_vm8, %v1254_v55  ;;  %903 = vst.msk [vmem:[#allocation2 + $0x180] sm:$0xff] %vm881_vm7, %v840_v53  ;;  %v1289_v58 = vld [vmem:[#allocation2 + $0x170] sm:$0xff] }
 0x20c   : > { %913 = vst.msk [vmem:[#allocation2 + $0x180] sm:$0xff] %vm767_vm4, %v5552_v9  ;;  %1694 = vmatmul.f32.vlgmr.msrb.gmra.mxu3 %v1289_v58  ;;  %v933_v58 = vrot.slane %v3616_v6, 7 }
 0x20d   : > { %825 = vrot.lane.b32.xlu0 %v3648_v10, %s3451_s29  ;;  %1100 = vrot.lane.b32.xlu2 %v1042_v56, %s3447_s8 }
 0x20e   : > { %1086 = vrot.lane.b32.xlu1 %v1035_v25, %s3447_s8  ;;  %3031 = vmatmul.msk.f32.gmra.mxu0 %vm440_vm0, %v3666_v12  ;;  %v1038_v25 = vrot.slane %v3700_v16, 1  ;;  %998 = vst.msk [vmem:[#allocation2 + $0xe8] sm:$0xfe] %vm983_vm2, %v933_v58 }
 0x20f   : > { %v1063_v27 = vpop.permute.xlu0 %1062  ;;  %v725_v33 = vpop.permute.xlu2 %724  ;;  %1225 = vst.msk [vmem:[#allocation2 + $0xef] sm:$0x1] %vm1210_vm3, %v5552_v9 }
 0x210   : > { %1152 = vst.msk [vmem:[#allocation2 + $0x78] sm:$0x7f] %vm1144_vm5, %v1063_v27  ;;  %v701_v35 = vpop.permute.xlu1 %700  ;;  %v1256_v43 = vld [vmem:[#allocation2 + $0x68] sm:$0xff]  ;;  %v4353_v27 = vpop.f32.mrf.mxu0 }
 0x211   : > { %1185 = vst.msk [vmem:[#allocation2 + $0x78] sm:$0x1] %vm1177_vm6, %v5552_v9  ;;  %1634 = vmatmul.f32.gmra.mxu1 %v1249_v40 }
 0x212   : > { %777 = vst.msk [vmem:[#allocation2 + $0xb0] sm:$0xff] %vm767_vm4, %v701_v35 }
 0x213   : > { %3049 = vmatmul.msk.f32.gmra.mxu2 %vm1512_vm8, %v1256_v43  ;;  %789 = vst.msk [vmem:[#allocation2 + $0x190] sm:$0xff] %vm767_vm4, %v725_v33  ;;  %v1291_v46 = vld [vmem:[#allocation2 + $0x180] sm:$0xff]  ;;  %v1257_v33 = vld [vmem:[#allocation2 + $0x70] sm:$0xff] }
 0x214   : > { %1697 = vmatmul.f32.gmra.mxu3 %v1291_v46 }
 0x215   : > { %710 = vrot.lane.b32.xlu0 %v3673_v13, %s3450_s13  ;;  %1088 = vrot.lane.b32.xlu2 %v1036_v60, %s3447_s8  ;;  %v1039_v60 = vrot.slane %v3684_v14, 1 }
 0x216   : > { %827 = vrot.lane.b32.xlu1 %v3629_v7, %s3451_s29  ;;  %3032 = vmatmul.msk.f32.gmra.mxu0 %vm440_vm0, %v3659_v11 }
 0x217   : > { %v1065_v49 = vpop.permute.xlu0 %1064  ;;  %v814_v61 = vpop.permute.xlu2 %813 }
 0x218   : > { %1153 = vst.msk [vmem:[#allocation2 + $0x88] sm:$0x7f] %vm1144_vm5, %v1065_v49  ;;  %v810_v62 = vpop.permute.xlu1 %809  ;;  %v1258_v31 = vld [vmem:[#allocation2 + $0x78] sm:$0xff] }
 0x219   : > { %1186 = vst.msk [vmem:[#allocation2 + $0x88] sm:$0x1] %vm1177_vm6, %v5552_v9  ;;  %1637 = vmatmul.f32.gmra.mxu1 %v1251_v63 }
 0x21a   : > { %888 = vst.msk [vmem:[#allocation2 + $0x60] sm:$0xff] %vm881_vm7, %v810_v62 }
 0x21b   : > { %3050 = vmatmul.msk.f32.gmra.mxu2 %vm1512_vm8, %v1258_v31  ;;  %890 = vst.msk [vmem:[#allocation2 + $0x90] sm:$0xff] %vm881_vm7, %v814_v61 }
 0x21d   : > { %1102 = vrot.lane.b32.xlu0 %v1043_v38, %s3447_s8  ;;  %829 = vrot.lane.b32.xlu2 %v3693_v15, %s3451_s29  ;;  %v934_v38 = vrot.slane %v3610_v5, 7 }
 0x21e   : > { %712 = vrot.lane.b32.xlu1 %v3648_v10, %s3450_s13  ;;  %3033 = vmatmul.msk.f32.gmra.mxu0 %vm440_vm0, %v3700_v16 }
 0x21f   : > { %v1067_v39 = vpop.permute.xlu0 %1066  ;;  %v4316_v42 = vpop.permute.xlu2 %843  ;;  %999 = vst.msk [vmem:[#allocation2 + $0xf8] sm:$0xfe] %vm983_vm2, %v934_v38 }
 0x220   : > { %1154 = vst.msk [vmem:[#allocation2 + $0x98] sm:$0x7f] %vm1144_vm5, %v1067_v39  ;;  %v703_v45 = vpop.permute.xlu1 %702  ;;  %v1260_v48 = vld [vmem:[#allocation2 + $0x88] sm:$0xff] }
 0x221   : > { %1187 = vst.msk [vmem:[#allocation2 + $0x98] sm:$0x1] %vm1177_vm6, %v5552_v9  ;;  %1640 = vmatmul.f32.gmra.mxu1 %v1253_v47  ;;  %v1255_v55 = vld [vmem:[#allocation2 + $0x60] sm:$0xff] }
 0x222   : > { %778 = vst.msk [vmem:[#allocation2 + $0xc0] sm:$0xff] %vm767_vm4, %v703_v45  ;;  %v1261_v45 = vld [vmem:[#allocation2 + $0x90] sm:$0xff] }
 0x223   : > { %3051 = vmatmul.msk.f32.gmra.mxu2 %vm1512_vm8, %v1260_v48  ;;  %1226 = vst.msk [vmem:[#allocation2 + $0xff] sm:$0x1] %vm1210_vm3, %v5552_v9  ;;  %v1040_v48 = vrot.slane %v3719_v17, 1 }
 0x225   : > { %1090 = vrot.lane.b32.xlu0 %v1037_v50, %s3447_s8  ;;  %714 = vrot.lane.b32.xlu2 %v3629_v7, %s3450_s13 }
 0x226   : > { %1104 = vrot.lane.b32.xlu1 %v1044_v51, %s3447_s8  ;;  %3034 = vmatmul.msk.f32.gmra.mxu0 %vm440_vm0, %v3684_v14  ;;  %v1047_v51 = vrot.slane %v3757_v24, 1 }
 0x227   : > { %v1069_v52 = vpop.permute.xlu0 %1068  ;;  %v1075_v53 = vpop.permute.xlu2 %1074 }
 0x228   : > { %1155 = vst.msk [vmem:[#allocation2 + $0xa8] sm:$0x7f] %vm1144_vm5, %v1069_v52  ;;  %v812_v54 = vpop.permute.xlu1 %811  ;;  %v1262_v56 = vld [vmem:[#allocation2 + $0x98] sm:$0xff]  ;;  %v935_v52 = vrot.slane %v3673_v13, 7 }
 0x229   : > { %1188 = vst.msk [vmem:[#allocation2 + $0xa8] sm:$0x1] %vm1177_vm6, %v5552_v9  ;;  %1643 = vmatmul.f32.gmra.mxu1 %v1255_v55 }
 0x22a   : > { %889 = vst.msk [vmem:[#allocation2 + $0x80] sm:$0xff] %vm881_vm7, %v812_v54 }
 0x22b   : > { %911 = vst.msk [vmem:[#allocation2 + $0x80] sm:$0xff] %vm767_vm4, %v5552_v9  ;;  %3052 = vmatmul.msk.f32.gmra.mxu2 %vm1512_vm8, %v1262_v56 }
 0x22c   : > { %1158 = vst.msk [vmem:[#allocation2 + $0xd8] sm:$0x7f] %vm1144_vm5, %v1075_v53 }
 0x22d   : > { %831 = vrot.lane.b32.xlu0 %v3666_v12, %s3451_s29  ;;  %1191 = vst.msk [vmem:[#allocation2 + $0xd8] sm:$0x1] %vm1177_vm6, %v5552_v9  ;;  %1106 = vrot.lane.b32.xlu2 %v1045_v57, %s3447_s8 }
 0x22e   : > { %1092 = vrot.lane.b32.xlu1 %v1038_v25, %s3447_s8  ;;  %3035 = vmatmul.msk.f32.gmra.mxu0 %vm440_vm0, %v3719_v17  ;;  %1000 = vst.msk [vmem:[#allocation2 + $0x108] sm:$0xfe] %vm983_vm2, %v935_v52  ;;  %v936_v25 = vrot.slane %v3648_v10, 7 }
 0x22f   : > { %v1071_v35 = vpop.permute.xlu0 %1070  ;;  %v731_v40 = vpop.permute.xlu2 %730  ;;  %1227 = vst.msk [vmem:[#allocation2 + $0x10f] sm:$0x1] %vm1210_vm3, %v5552_v9 }
 0x230   : > { %1156 = vst.msk [vmem:[#allocation2 + $0xb8] sm:$0x7f] %vm1144_vm5, %v1071_v35  ;;  %v842_v43 = vpop.permute.xlu1 %841  ;;  %v1264_v59 = vld [vmem:[#allocation2 + $0xa8] sm:$0xff] }
 0x231   : > { %1189 = vst.msk [vmem:[#allocation2 + $0xb8] sm:$0x1] %vm1177_vm6, %v5552_v9  ;;  %1646 = vmatmul.f32.gmra.mxu1 %v1257_v33 }
 0x232   : > { %904 = vst.msk [vmem:[#allocation2 + $0x190] sm:$0xff] %vm881_vm7, %v842_v43  ;;  %v1259_v46 = vld [vmem:[#allocation2 + $0x80] sm:$0xff] }
 0x233   : > { %3053 = vmatmul.msk.f32.gmra.mxu2 %vm1512_vm8, %v1264_v59  ;;  %792 = vst.msk [vmem:[#allocation2 + $0x1c0] sm:$0xff] %vm767_vm4, %v731_v40 }
 0x234   : > { %v1270_v57 = vld [vmem:[#allocation2 + $0xd8] sm:$0xff]  ;;  %1001 = vst.msk [vmem:[#allocation2 + $0x118] sm:$0xfe] %vm983_vm2, %v936_v25  ;;  %v939_v25 = vrot.slane %v3666_v12, 7 }
 0x235   : > { %716 = vrot.lane.b32.xlu0 %v3693_v15, %s3450_s13  ;;  %1094 = vrot.lane.b32.xlu2 %v1039_v60, %s3447_s8  ;;  %1228 = vst.msk [vmem:[#allocation2 + $0x11f] sm:$0x1] %vm1210_vm3, %v5552_v9 }
 0x236   : > { %833 = vrot.lane.b32.xlu1 %v3659_v11, %s3451_s29  ;;  %1004 = vst.msk [vmem:[#allocation2 + $0x148] sm:$0xfe] %vm983_vm2, %v939_v25 }
 0x237   : > { %v727_v49 = vpop.permute.xlu0 %726  ;;  %v820_v61 = vpop.permute.xlu2 %819  ;;  %1231 = vst.msk [vmem:[#allocation2 + $0x14f] sm:$0x1] %vm1210_vm3, %v5552_v9 }
 0x238   : > { %790 = vst.msk [vmem:[#allocation2 + $0x1a0] sm:$0xff] %vm767_vm4, %v727_v49  ;;  %v1073_v62 = vpop.permute.xlu1 %1072  ;;  %v1266_v63 = vld [vmem:[#allocation2 + $0xb8] sm:$0xff] }
 0x239   : > { %905 = vst.msk [vmem:[#allocation2 + $0x1a0] sm:$0xff] %vm881_vm7, %v4316_v42  ;;  %1649 = vmatmul.f32.gmra.mxu1 %v1259_v46  ;;  %v1293_v31 = vld [vmem:[#allocation2 + $0x190] sm:$0xff] }
 0x23a   : > { %1157 = vst.msk [vmem:[#allocation2 + $0xc8] sm:$0x7f] %vm1144_vm5, %v1073_v62  ;;  %1700 = vmatmul.f32.gmra.mxu3 %v1293_v31 }
 0x23b   : > { %1190 = vst.msk [vmem:[#allocation2 + $0xc8] sm:$0x1] %vm1177_vm6, %v5552_v9  ;;  %3054 = vmatmul.msk.f32.gmra.mxu2 %vm1512_vm8, %v1266_v63  ;;  %v944_v63 = vrot.slane %v3722_v18, 7 }
 0x23c   : > { %893 = vst.msk [vmem:[#allocation2 + $0xc0] sm:$0xff] %vm881_vm7, %v820_v61 }
 0x23d   : > { %1108 = vrot.lane.b32.xlu0 %v1046_v34, %s3447_s8  ;;  %835 = vrot.lane.b32.xlu2 %v3700_v16, %s3451_s29  ;;  %1009 = vst.msk [vmem:[#allocation2 + $0x198] sm:$0xfe] %vm983_vm2, %v944_v63 }
 0x23e   : > { %718 = vrot.lane.b32.xlu1 %v3666_v12, %s3450_s13  ;;  %1236 = vst.msk [vmem:[#allocation2 + $0x19f] sm:$0x1] %vm1210_vm3, %v5552_v9 }
 0x23f   : > { %v816_v39 = vpop.permute.xlu0 %815  ;;  %v850_v42 = vpop.permute.xlu2 %849 }
 0x240   : > { %891 = vst.msk [vmem:[#allocation2 + $0xa0] sm:$0xff] %vm881_vm7, %v816_v39  ;;  %v729_v44 = vpop.permute.xlu1 %728  ;;  %v1295_v47 = vld [vmem:[#allocation2 + $0x1a0] sm:$0xff] }
 0x241   : > { %791 = vst.msk [vmem:[#allocation2 + $0x1b0] sm:$0xff] %vm767_vm4, %v729_v44  ;;  %1652 = vmatmul.f32.gmra.mxu1 %v1261_v45  ;;  %v945_v45 = vrot.slane %v3739_v20, 7 }
 0x242   : > { %1703 = vmatmul.f32.gmra.mxu3 %v1295_v47  ;;  %v1268_v50 = vld [vmem:[#allocation2 + $0xc8] sm:$0xff] }
 0x243   : > { %3055 = vmatmul.msk.f32.gmra.mxu2 %vm1512_vm8, %v1268_v50  ;;  %v1267_v59 = vld [vmem:[#allocation2 + $0xc0] sm:$0xff]  ;;  %1010 = vst.msk [vmem:[#allocation2 + $0x1a8] sm:$0xfe] %vm983_vm2, %v945_v45 }
 0x244   : > { %1237 = vst.msk [vmem:[#allocation2 + $0x1af] sm:$0x1] %vm1210_vm3, %v5552_v9 }
 0x245   : > { %1096 = vrot.lane.b32.xlu0 %v1040_v48, %s3447_s8  ;;  %720 = vrot.lane.b32.xlu2 %v3659_v11, %s3450_s13 }
 0x246   : > { %1110 = vrot.lane.b32.xlu1 %v1047_v51, %s3447_s8  ;;  %s2832_s8 = scalar_lea.sflag [#allocation4], %s359_s20 }
 0x247   : > { %v846_v53 = vpop.permute.xlu0 %845  ;;  %v1263_v54 = vld [vmem:[#allocation2 + $0xa0] sm:$0xff]  ;;  %v735_v55 = vpop.permute.xlu2 %734 }
 0x248   : > { %906 = vst.msk [vmem:[#allocation2 + $0x1b0] sm:$0xff] %vm881_vm7, %v846_v53  ;;  %v818_v56 = vpop.permute.xlu1 %817  ;;  %v938_v53 = vrot.slane %v3693_v15, 7 }
 0x249   : > { %892 = vst.msk [vmem:[#allocation2 + $0xb0] sm:$0xff] %vm881_vm7, %v818_v56  ;;  %1655 = vmatmul.f32.gmra.mxu1 %v1263_v54  ;;  %v1419_v54 = vpop.f32.mrf.mxu0 }
 0x24a   : > { %794 = vst.msk [vmem:[#allocation2 + $0x1e0] sm:$0xff] %vm767_vm4, %v735_v55  ;;  %v4452_v55 = vpop.f32.mrf.mxu3 }
 0x24b   : > { %3056 = vmatmul.msk.f32.gmra.mxu2 %vm1512_vm8, %v1270_v57  ;;  %1003 = vst.msk [vmem:[#allocation2 + $0x138] sm:$0xfe] %vm983_vm2, %v938_v53 }
 0x24c   : > { %1230 = vst.msk [vmem:[#allocation2 + $0x13f] sm:$0x1] %vm1210_vm3, %v5552_v9 }
 0x24d   : > { %837 = vrot.lane.b32.xlu0 %v3684_v14, %s3451_s29 }
 0x24f   : > { %v1077_v58 = vpop.permute.xlu0 %1076  ;;  %v1297_v33 = vld [vmem:[#allocation2 + $0x1b0] sm:$0xff]  ;;  %v707_v35 = vpop.permute.xlu2 %706 }
 0x250   : > { %1159 = vst.msk [vmem:[#allocation2 + $0xe8] sm:$0x7f] %vm1144_vm5, %v1077_v58  ;;  %v848_v40 = vpop.permute.xlu1 %847  ;;  %1706 = vmatmul.f32.gmra.mxu3 %v1297_v33  ;;  %v1265_v43 = vld [vmem:[#allocation2 + $0xb0] sm:$0xff] }
 0x251   : > { %1192 = vst.msk [vmem:[#allocation2 + $0xe8] sm:$0x1] %vm1177_vm6, %v5552_v9  ;;  %1658 = vmatmul.f32.gmra.mxu1 %v1265_v43  ;;  %v946_v43 = vrot.slane %v3736_v19, 7 }
 0x252   : > { %907 = vst.msk [vmem:[#allocation2 + $0x1c0] sm:$0xff] %vm881_vm7, %v848_v40 }
 0x253   : > { %780 = vst.msk [vmem:[#allocation2 + $0xe0] sm:$0xff] %vm767_vm4, %v707_v35 }
 0x254   : > { %1011 = vst.msk [vmem:[#allocation2 + $0x1b8] sm:$0xfe] %vm983_vm2, %v946_v43  ;;  %v948_v43 = vrot.slane %v3754_v23, 7 }
 0x255   : > { %1238 = vst.msk [vmem:[#allocation2 + $0x1bf] sm:$0x1] %vm1210_vm3, %v5552_v9 }
 0x256   : > { %1013 = vst.msk [vmem:[#allocation2 + $0x1d8] sm:$0xfe] %vm983_vm2, %v948_v43 }
 0x257   : > { %v733_v60 = vpop.permute.xlu0 %732  ;;  %v1083_v46 = vpop.permute.xlu2 %1082  ;;  %1240 = vst.msk [vmem:[#allocation2 + $0x1df] sm:$0x1] %vm1210_vm3, %v5552_v9 }
 0x258   : > { %793 = vst.msk [vmem:[#allocation2 + $0x1d0] sm:$0xff] %vm767_vm4, %v733_v60  ;;  %v1079_v49 = vpop.permute.xlu1 %1078  ;;  %v1272_v61 = vld [vmem:[#allocation2 + $0xe8] sm:$0xff] }
 0x259   : > { %908 = vst.msk [vmem:[#allocation2 + $0x1d0] sm:$0xff] %vm881_vm7, %v850_v42  ;;  %1661 = vmatmul.f32.gmra.mxu1 %v1267_v59  ;;  %v1299_v62 = vld [vmem:[#allocation2 + $0x1c0] sm:$0xff]  ;;  %3057 = vmatmul.msk.f32.gmra.mxu2 %vm1512_vm8, %v1272_v61  ;;  %v937_v42 = vrot.slane %v3629_v7, 7  ;;  %v1422_v59 = vpop.f32.mrf.mxu0 }
 0x25a   : > { %1160 = vst.msk [vmem:[#allocation2 + $0xf8] sm:$0x7f] %vm1144_vm5, %v1079_v49  ;;  %1709 = vmatmul.f32.gmra.mxu3 %v1299_v62  ;;  %v4470_v49 = vpop.f32.mrf.mxu3  ;;  %v4478_v62 = vld [vmem:[%s5548_s5] ss:$0 sm:$0xff] }
 0x25b   : > { %1193 = vst.msk [vmem:[#allocation2 + $0xf8] sm:$0x1] %vm1177_vm6, %v5552_v9 }
 0x25c   : > { %1162 = vst.msk [vmem:[#allocation2 + $0x118] sm:$0x7f] %vm1144_vm5, %v1083_v46 }
 0x25d   : > { %1195 = vst.msk [vmem:[#allocation2 + $0x118] sm:$0x1] %vm1177_vm6, %v5552_v9 }
 0x25e   : > { %1002 = vst.msk [vmem:[#allocation2 + $0x128] sm:$0xfe] %vm983_vm2, %v937_v42 }
 0x25f   : > { %v705_v31 = vpop.permute.xlu0 %704  ;;  %v1099_v34 = vpop.permute.xlu2 %1098  ;;  %1229 = vst.msk [vmem:[#allocation2 + $0x12f] sm:$0x1] %vm1210_vm3, %v5552_v9 }
 0x260   : > { %779 = vst.msk [vmem:[#allocation2 + $0xd0] sm:$0xff] %vm767_vm4, %v705_v31  ;;  %v822_v38 = vpop.permute.xlu1 %821  ;;  %v1301_v39 = vld [vmem:[#allocation2 + $0x1d0] sm:$0xff] }
 0x261   : > { %894 = vst.msk [vmem:[#allocation2 + $0xd0] sm:$0xff] %vm881_vm7, %v822_v38  ;;  %v1425_v25 = vpop.f32.mrf.mxu0 }
 0x262   : > { %1712 = vmatmul.f32.gmra.mxu3 %v1301_v39  ;;  %v1274_v44 = vld [vmem:[#allocation2 + $0xf8] sm:$0xff]  ;;  %1170 = vst.msk [vmem:[#allocation2 + $0x198] sm:$0x7f] %vm1144_vm5, %v1099_v34 }
 0x263   : > { %3058 = vmatmul.msk.f32.gmra.mxu2 %vm1512_vm8, %v1274_v44  ;;  %1203 = vst.msk [vmem:[#allocation2 + $0x198] sm:$0x1] %vm1177_vm6, %v5552_v9  ;;  %v940_v44 = vrot.slane %v3659_v11, 7 }
 0x264   : > { %v1278_v46 = vld [vmem:[#allocation2 + $0x118] sm:$0xff] }
 0x265   : > { %v1739_v47 = vpop.f32.mrf.mxu2  ;;  %1005 = vst.msk [vmem:[#allocation2 + $0x158] sm:$0xfe] %vm983_vm2, %v940_v44 }
 0x266   : > { %1232 = vst.msk [vmem:[#allocation2 + $0x15f] sm:$0x1] %vm1210_vm3, %v5552_v9 }
 0x267   : > { %v1081_v48 = vpop.permute.xlu0 %1080  ;;  %v1101_v50 = vpop.permute.xlu2 %1100 }
 0x268   : > { %1161 = vst.msk [vmem:[#allocation2 + $0x108] sm:$0x7f] %vm1144_vm5, %v1081_v48  ;;  %v852_v51 = vpop.permute.xlu1 %851  ;;  %v1269_v52 = vld [vmem:[#allocation2 + $0xd0] sm:$0xff]  ;;  %v947_v48 = vrot.slane %v3742_v21, 7 }
 0x269   : > { %1194 = vst.msk [vmem:[#allocation2 + $0x108] sm:$0x1] %vm1177_vm6, %v5552_v9  ;;  %1664 = vmatmul.f32.gmra.mxu1 %v1269_v52 }
 0x26a   : > { %909 = vst.msk [vmem:[#allocation2 + $0x1e0] sm:$0xff] %vm881_vm7, %v852_v51  ;;  %v1294_v53 = vld [vmem:[#allocation2 + $0x198] sm:$0xff] }
 0x26b   : > { %1171 = vst.msk [vmem:[#allocation2 + $0x1a8] sm:$0x7f] %vm1144_vm5, %v1101_v50 }
 0x26c   : > { %1204 = vst.msk [vmem:[#allocation2 + $0x1a8] sm:$0x1] %vm1177_vm6, %v5552_v9 }
 0x26d   : > { %v1742_v56 = vpop.f32.mrf.mxu2  ;;  %1012 = vst.msk [vmem:[#allocation2 + $0x1c8] sm:$0xfe] %vm983_vm2, %v947_v48 }
 0x26e   : > { %1239 = vst.msk [vmem:[#allocation2 + $0x1cf] sm:$0x1] %vm1210_vm3, %v5552_v9 }
 0x26f   : > { %v824_v57 = vpop.permute.xlu0 %823  ;;  %v1089_v58 = vpop.permute.xlu2 %1088 }
 0x270   : > { %895 = vst.msk [vmem:[#allocation2 + $0xe0] sm:$0xff] %vm881_vm7, %v824_v57  ;;  %v737_v33 = vpop.permute.xlu1 %736  ;;  %v1276_v35 = vld [vmem:[#allocation2 + $0x108] sm:$0xff] }
 0x271   : > { %795 = vst.msk [vmem:[#allocation2 + $0x1f0] sm:$0xff] %vm767_vm4, %v737_v33  ;;  %v1303_v40 = vld [vmem:[#allocation2 + $0x1e0] sm:$0xff]  ;;  %3059 = vmatmul.msk.f32.gmra.mxu2 %vm1512_vm8, %v1276_v35 }
 0x272   : > { %918 = vst.msk [vmem:[#allocation2 + $0x1f0] sm:$0xff] %vm881_vm7, %v5552_v9  ;;  %1715 = vmatmul.f32.gmra.mxu3 %v1303_v40  ;;  %v4502_v40 = vpop.f32.mrf.mxu3 }
 0x273   : > { %1165 = vst.msk [vmem:[#allocation2 + $0x148] sm:$0x7f] %vm1144_vm5, %v1089_v58 }
 0x274   : > { %1198 = vst.msk [vmem:[#allocation2 + $0x148] sm:$0x1] %vm1177_vm6, %v5552_v9 }
 0x275   : > { %v1745_v39 = vpop.f32.mrf.mxu2 }
 0x276   : > { %v1626_v60 = vpop.f32.mrf.mxu1 }
 0x277   : > { %v1627_v61 = vadd.f32 %v1626_v60, %v4353_v27  ;;  %v709_v63 = vpop.permute.xlu0 %708  ;;  %v1271_v31 = vld [vmem:[#allocation2 + $0xe0] sm:$0xff]  ;;  %v4481_v34 = vpop.permute.xlu2 %829 }
 0x278   : > { %781 = vst.msk [vmem:[#allocation2 + $0xf0] sm:$0xff] %vm767_vm4, %v709_v63  ;;  %v1085_v38 = vpop.permute.xlu1 %1084  ;;  %1667 = vmatmul.f32.gmra.mxu1 %v1271_v31 }
 0x279   : > { %v1740_v42 = vadd.f32 %v1739_v47, %v1627_v61  ;;  %916 = vst.msk [vmem:[#allocation2 + $0xf0] sm:$0xff] %vm881_vm7, %v5552_v9  ;;  %3060 = vmatmul.msk.f32.gmra.mxu2 %vm1512_vm8, %v1278_v46  ;;  %v1305_v27 = vld [vmem:[#allocation2 + $0x1f0] sm:$0xff] }
 0x27a   : > { %1163 = vst.msk [vmem:[#allocation2 + $0x128] sm:$0x7f] %vm1144_vm5, %v1085_v38  ;;  %1718 = vmatmul.f32.gmra.mxu3 %v1305_v27  ;;  %v1296_v27 = vld [vmem:[#allocation2 + $0x1a8] sm:$0xff] }
 0x27b   : > { %v1839_v45 = vadd.f32 %v4478_v62, %v1740_v42  ;;  %1196 = vst.msk [vmem:[#allocation2 + $0x128] sm:$0x1] %vm1177_vm6, %v5552_v9 }
 0x27d   : > { %v3075_v47 = vmul.f32 -1.442695, %v1839_v45 }
 0x27e   : > { %v1629_v50 = vpop.f32.mrf.mxu1  ;;  %v1748_v60 = vpop.f32.mrf.mxu2 }
 0x27f   : > { %3222 = vpow2.f32 %v3075_v47  ;;  %v1630_v51 = vadd.f32 %v1629_v50, %v1419_v54  ;;  %v826_v52 = vpop.permute.xlu0 %825  ;;  %v715_v57 = vpop.permute.xlu2 %714  ;;  %v941_v47 = vrot.slane %v3700_v16, 7 }
 0x280   : > { %896 = vst.msk [vmem:[#allocation2 + $0x100] sm:$0xff] %vm881_vm7, %v826_v52  ;;  %v1087_v58 = vpop.permute.xlu1 %1086  ;;  %v1273_v33 = vld [vmem:[#allocation2 + $0xf0] sm:$0xff]  ;;  %v942_v52 = vrot.slane %v3684_v14, 7 }
 0x281   : > { %v1743_v35 = vadd.f32 %v1742_v56, %v1630_v51  ;;  %912 = vst.msk [vmem:[#allocation2 + $0x100] sm:$0xff] %vm767_vm4, %v5552_v9  ;;  %1670 = vmatmul.f32.gmra.mxu1 %v1273_v33  ;;  %v1428_v51 = vpop.f32.mrf.mxu0 }
 0x282   : > { %1164 = vst.msk [vmem:[#allocation2 + $0x138] sm:$0x7f] %vm1144_vm5, %v1087_v58  ;;  %v1280_v54 = vld [vmem:[#allocation2 + $0x128] sm:$0xff]  ;;  %3068 = vmatmul.msk.f32.vlgmr.msra.gmra.mxu3 %vm1512_vm8, %v1294_v53 }
 0x283   : > { %v1840_v46 = vadd.f32 %v4478_v62, %v1743_v35  ;;  %1197 = vst.msk [vmem:[#allocation2 + $0x138] sm:$0x1] %vm1177_vm6, %v5552_v9  ;;  %3061 = vmatmul.msk.f32.gmra.mxu2 %vm1512_vm8, %v1280_v54 }
 0x284   : > { %784 = vst.msk [vmem:[#allocation2 + $0x130] sm:$0xff] %vm767_vm4, %v715_v57  ;;  %v4528_v57 = vpop.f32.mrf.mxu3 }
 0x285   : > { %v3223_v56 = vpop.eup %3222  ;;  %v3076_v61 = vmul.f32 -1.442695, %v1840_v46  ;;  %1006 = vst.msk [vmem:[#allocation2 + $0x168] sm:$0xfe] %vm983_vm2, %v941_v47  ;;  %v949_v47 = vrot.slane %v3751_v22, 7  ;;  %v5603_v22 = vmov 0.0  }
 0x286   : > { %v4514_v63 = vadd.f32 1.0, %v3223_v56  ;;  %v1632_v31 = vpop.f32.mrf.mxu1  ;;  %v1751_v58 = vpop.f32.mrf.mxu2  ;;  %1233 = vst.msk [vmem:[#allocation2 + $0x16f] sm:$0x1] %vm1210_vm3, %v5552_v9 }
 0x287   : > { %3224 = vpow2.f32 %v3076_v61  ;;  %v1633_v38 = vadd.f32 %v1632_v31, %v1422_v59  ;;  %v711_v42 = vpop.permute.xlu0 %710  ;;  %v1107_v44 = vpop.permute.xlu2 %1106  ;;  %1007 = vst.msk [vmem:[#allocation2 + $0x178] sm:$0xfe] %vm983_vm2, %v942_v52 }
 0x288   : > { %3226 = vrcp.f32 %v4514_v63  ;;  %782 = vst.msk [vmem:[#allocation2 + $0x110] sm:$0xff] %vm767_vm4, %v711_v42  ;;  %v828_v45 = vpop.permute.xlu1 %827  ;;  %v1275_v48 = vld [vmem:[#allocation2 + $0x100] sm:$0xff]  ;;  %vm2004_vm10 = vweird.f32 %v4514_v63 }
 0x289   : > { %v1746_v50 = vadd.f32 %v1745_v39, %v1633_v38  ;;  %897 = vst.msk [vmem:[#allocation2 + $0x110] sm:$0xff] %vm881_vm7, %v828_v45  ;;  %1673 = vmatmul.f32.gmra.mxu1 %v1275_v48  ;;  %v2008_v45 = vand.u32 2147483647, %v4514_v63  ;;  %v2010_v48 = vand.u32 2147483648, %v4514_v63 }
 0x28a   : > { %v1282_v59 = vld [vmem:[#allocation2 + $0x138] sm:$0xff]  ;;  %3069 = vmatmul.msk.f32.gmra.mxu3 %vm1512_vm8, %v1296_v27  ;;  %1174 = vst.msk [vmem:[#allocation2 + $0x1d8] sm:$0x7f] %vm1144_vm5, %v1107_v44  ;;  %v1284_v27 = vld [vmem:[#allocation2 + $0x148] sm:$0xff] }
 0x28b   : > { %v1841_v53 = vadd.f32 %v4478_v62, %v1746_v50  ;;  %3062 = vmatmul.msk.f32.gmra.mxu2 %vm1512_vm8, %v1282_v59  ;;  %1207 = vst.msk [vmem:[#allocation2 + $0x1d8] sm:$0x1] %vm1177_vm6, %v5552_v9  ;;  %vm2009_vm12 = vcmp.eq.f32.partialorder %v2008_v45, 8.507059e+37 }
 0x28c   : > { %1234 = vst.msk [vmem:[#allocation2 + $0x17f] sm:$0x1] %vm1210_vm3, %v5552_v9 }
 0x28d   : > { %v3225_v39 = vpop.eup %3224  ;;  %v3077_v33 = vmul.f32 -1.442695, %v1841_v53  ;;  %1014 = vst.msk [vmem:[#allocation2 + $0x1e8] sm:$0xfe] %vm983_vm2, %v949_v47 }
 0x28e   : > { %v3227_v35 = vpop.eup %3226  ;;  %v4535_v54 = vadd.f32 1.0, %v3225_v39  ;;  %v1635_v43 = vpop.f32.mrf.mxu1  ;;  %1241 = vst.msk [vmem:[#allocation2 + $0x1ef] sm:$0x1] %vm1210_vm3, %v5552_v9 }
 0x28f   : > { %3228 = vpow2.f32 %v3077_v33  ;;  %v1636_v46 = vadd.f32 %v1635_v43, %v1425_v25  ;;  %v1103_v56 = vpop.permute.xlu0 %1102  ;;  %v2000_v61 = vmul.f32 %v3227_v35, %v4514_v63  ;;  %v1095_v31 = vpop.permute.xlu2 %1094  ;;  %vm2005_vm9 = vweird.f32 %v3227_v35 }
 0x290   : > { %3230 = vrcp.f32 %v4535_v54  ;;  %1172 = vst.msk [vmem:[#allocation2 + $0x1b8] sm:$0x7f] %vm1144_vm5, %v1103_v56  ;;  %v713_v38 = vpop.permute.xlu1 %712  ;;  %v1277_v42 = vld [vmem:[#allocation2 + $0x110] sm:$0xff]  ;;  %v4554_v39 = vpop.f32.mrf.mxu3  ;;  %vm2006_vm11 = vmor %vm2004_vm10, %vm2005_vm9  ;;  %v2011_v56 = vor.u32 1.1754944e-38, %v2010_v48  ;;  %v2023_v47 = vand.u32 2147483647, %v4535_v54  ;;  %vm2019_vm14 = vweird.f32 %v4535_v54 }
 0x291   : > { %v1749_v44 = vadd.f32 %v1748_v60, %v1636_v46  ;;  %1205 = vst.msk [vmem:[#allocation2 + $0x1b8] sm:$0x1] %vm1177_vm6, %v5552_v9  ;;  %1676 = vmatmul.f32.gmra.mxu1 %v1277_v42  ;;  %v2001_v25 = vsub.f32 1.0, %v2000_v61  ;;  %v1431_v60 = vpop.f32.mrf.mxu0  ;;  %v1754_v61 = vpop.f32.mrf.mxu2 }
 0x292   : > { %783 = vst.msk [vmem:[#allocation2 + $0x120] sm:$0xff] %vm767_vm4, %v713_v38  ;;  %vm2024_vm1 = vcmp.eq.f32.partialorder %v2023_v47, 8.507059e+37 }
 0x293   : > { %v1842_v50 = vadd.f32 %v4478_v62, %v1749_v44  ;;  %898 = vst.msk [vmem:[#allocation2 + $0x120] sm:$0xff] %vm881_vm7, %v4481_v34  ;;  %v2002_v59 = vmul.f32 %v3227_v35, %v2001_v25  ;;  %3063 = vmatmul.msk.f32.gmra.mxu2 %vm1512_vm8, %v1284_v27 }
 0x294   : > { %1168 = vst.msk [vmem:[#allocation2 + $0x178] sm:$0x7f] %vm1144_vm5, %v1095_v31 }
 0x295   : > { %v3229_v52 = vpop.eup %3228  ;;  %v3078_v53 = vmul.f32 -1.442695, %v1842_v50  ;;  %v2003_v33 = vadd.f32 %v3227_v35, %v2002_v59  ;;  %1201 = vst.msk [vmem:[#allocation2 + $0x178] sm:$0x1] %vm1177_vm6, %v5552_v9  ;;  %v2025_v59 = vand.u32 2147483648, %v4535_v54 }
 0x296   : > { %v4559_v43 = vpop.eup %3230  ;;  %v4561_v34 = vadd.f32 1.0, %v3229_v52  ;;  %v1638_v46 = vpop.f32.mrf.mxu1 }
 0x297   : > { %3232 = vpow2.f32 %v3078_v53  ;;  %v1639_v31 = vadd.f32 %v1638_v46, %v1428_v51  ;;  %v1091_v38 = vpop.permute.xlu0 %1090  ;;  %v2007_v42 = vsel %vm2006_vm11, %v3227_v35, %v2003_v33  ;;  %v2015_v63 = vmul.f32 %v4559_v43, %v4535_v54  ;;  %v4572_v45 = vpop.permute.xlu2 %835 }
 0x298   : > { %3234 = vrcp.f32 %v4561_v34  ;;  %1166 = vst.msk [vmem:[#allocation2 + $0x158] sm:$0x7f] %vm1144_vm5, %v1091_v38  ;;  %v1105_v27 = vpop.permute.xlu1 %1104  ;;  %v4570_v44 = vsel %vm2009_vm12, %v2011_v56, %v2007_v42  ;;  %v1298_v25 = vld [vmem:[#allocation2 + $0x1b8] sm:$0xff]  ;;  %v943_v51 = vrot.slane %v3719_v17, 7  ;;  %vm2020_vm13 = vweird.f32 %v4559_v43 }
 0x299   : > { %v1752_v48 = vadd.f32 %v1751_v58, %v1639_v31  ;;  %1199 = vst.msk [vmem:[#allocation2 + $0x158] sm:$0x1] %vm1177_vm6, %v5552_v9  ;;  %2639 = vrot.lane.b32.xlu0 %v4570_v44, %s3450_s13  ;;  %2511 = vrot.lane.b32.xlu1 %v4570_v44, %s3451_s29  ;;  %v2016_v35 = vsub.f32 1.0, %v2015_v63  ;;  %v950_v58 = vrot.slane %v3757_v24, 7  ;;  %v1434_v38 = vpop.f32.mrf.mxu0  ;;  %vm2021_vm15 = vmor %vm2019_vm14, %vm2020_vm13 }
 0x29a   : > { %1173 = vst.msk [vmem:[#allocation2 + $0x1c8] sm:$0x7f] %vm1144_vm5, %v1105_v27  ;;  %3070 = vmatmul.msk.f32.gmra.mxu3 %vm1512_vm8, %v1298_v25  ;;  %v1279_v50 = vld [vmem:[#allocation2 + $0x120] sm:$0xff]  ;;  %v2026_v27 = vor.u32 1.1754944e-38, %v2025_v59  ;;  %v4599_v25 = vpop.f32.mrf.mxu3 }
 0x29b   : > { %v1843_v52 = vadd.f32 %v4478_v62, %v1752_v48  ;;  %1206 = vst.msk [vmem:[#allocation2 + $0x1c8] sm:$0x1] %vm1177_vm6, %v5552_v9  ;;  %1679 = vmatmul.f32.gmra.mxu1 %v1279_v50  ;;  %v2017_v53 = vmul.f32 %v4559_v43, %v2016_v35 }
 0x29c   : > { %1008 = vst.msk [vmem:[#allocation2 + $0x188] sm:$0xfe] %vm983_vm2, %v943_v51 }
 0x29d   : > { %v3233_v33 = vpop.eup %3232  ;;  %v3079_v46 = vmul.f32 -1.442695, %v1843_v52  ;;  %v2018_v56 = vadd.f32 %v4559_v43, %v2017_v53  ;;  %1235 = vst.msk [vmem:[#allocation2 + $0x18f] sm:$0x1] %vm1210_vm3, %v5552_v9 }
 0x29e   : > { %v3235_v31 = vpop.eup %3234  ;;  %v4596_v42 = vadd.f32 1.0, %v3233_v33  ;;  %v1641_v63 = vpop.f32.mrf.mxu1  ;;  %1015 = vst.msk [vmem:[#allocation2 + $0x1f8] sm:$0xfe] %vm983_vm2, %v950_v58  ;;  %v2038_v33 = vand.u32 2147483647, %v4561_v34 }
 0x29f   : > { %3236 = vpow2.f32 %v3079_v46  ;;  %v1642_v51 = vadd.f32 %v1641_v63, %v1431_v60  ;;  %v832_v48 = vpop.permute.xlu0 %831  ;;  %v2022_v54 = vsel %vm2021_vm15, %v4559_v43, %v2018_v56  ;;  %v2030_v35 = vmul.f32 %v3235_v31, %v4561_v34  ;;  %1242 = vst.msk [vmem:[#allocation2 + $0x1ff] sm:$0x1] %vm1210_vm3, %v5552_v9  ;;  %v721_v58 = vpop.permute.xlu2 %720 }
 0x2a0   : > { %3238 = vrcp.f32 %v4596_v42  ;;  %899 = vst.msk [vmem:[#allocation2 + $0x130] sm:$0xff] %vm881_vm7, %v832_v48  ;;  %v1093_v47 = vpop.permute.xlu1 %1092  ;;  %v4607_v50 = vsel %vm2024_vm1, %v2026_v27, %v2022_v54  ;;  %v1286_v59 = vld [vmem:[#allocation2 + $0x158] sm:$0xff]  ;;  %v1757_v43 = vpop.f32.mrf.mxu2  ;;  %vm2035_vm2 = vweird.f32 %v3235_v31  ;;  %vm2034_vm3 = vweird.f32 %v4561_v34 }
 0x2a1   : > { %v1755_v52 = vadd.f32 %v1754_v61, %v1642_v51  ;;  %1167 = vst.msk [vmem:[#allocation2 + $0x168] sm:$0x7f] %vm1144_vm5, %v1093_v47  ;;  %2641 = vrot.lane.b32.xlu1 %v4607_v50, %s3450_s13  ;;  %2513 = vrot.lane.b32.xlu2 %v4607_v50, %s3451_s29  ;;  %v2031_v60 = vsub.f32 1.0, %v2030_v35  ;;  %v2040_v61 = vand.u32 2147483648, %v4561_v34  ;;  %vm2036_vm9 = vmor %vm2034_vm3, %vm2035_vm2  ;;  %vm2039_vm10 = vcmp.eq.f32.partialorder %v2038_v33, 8.507059e+37 }
 0x2a2   : > { %1200 = vst.msk [vmem:[#allocation2 + $0x168] sm:$0x1] %vm1177_vm6, %v5552_v9  ;;  %3064 = vmatmul.msk.f32.gmra.mxu2 %vm1512_vm8, %v1286_v59  ;;  %v1300_v53 = vld [vmem:[#allocation2 + $0x1c8] sm:$0xff]  ;;  %vm2049_vm12 = vweird.f32 %v4596_v42 }
 0x2a3   : > { %v1844_v46 = vadd.f32 %v4478_v62, %v1755_v52  ;;  %3071 = vmatmul.msk.f32.gmra.mxu3 %vm1512_vm8, %v1300_v53  ;;  %v2032_v56 = vmul.f32 %v3235_v31, %v2031_v60  ;;  %787 = vst.msk [vmem:[#allocation2 + $0x160] sm:$0xff] %vm767_vm4, %v721_v58  ;;  %v2041_v47 = vor.u32 1.1754944e-38, %v2040_v61  ;;  %v1437_v61 = vpop.f32.mrf.mxu0 }
 0x2a5   : > { %v3237_v63 = vpop.eup %3236  ;;  %v3080_v27 = vmul.f32 -1.442695, %v1844_v46  ;;  %v2033_v51 = vadd.f32 %v3235_v31, %v2032_v56  ;;  %v1302_v46 = vld [vmem:[#allocation2 + $0x1d8] sm:$0xff]  ;;  %v4630_v56 = vpop.f32.mrf.mxu3 }
 0x2a6   : > { %v3239_v48 = vpop.eup %3238  ;;  %v4623_v54 = vadd.f32 1.0, %v3237_v63  ;;  %v1644_v35 = vpop.f32.mrf.mxu1  ;;  %v2053_v63 = vand.u32 2147483647, %v4596_v42 }
 0x2a7   : > { %3240 = vpow2.f32 %v3080_v27  ;;  %v1645_v59 = vadd.f32 %v1644_v35, %v1434_v38  ;;  %v717_v52 = vpop.permute.xlu0 %716  ;;  %v1281_v53 = vld [vmem:[#allocation2 + $0x130] sm:$0xff]  ;;  %v2037_v60 = vsel %vm2036_vm9, %v3235_v31, %v2033_v51  ;;  %v2045_v9 = vmul.f32 %v3239_v48, %v4596_v42 }
 0x2a8   : > { %3242 = vrcp.f32 %v4623_v54  ;;  %785 = vst.msk [vmem:[#allocation2 + $0x140] sm:$0xff] %vm767_vm4, %v717_v52  ;;  %v834_v58 = vpop.permute.xlu1 %833  ;;  %1682 = vmatmul.f32.gmra.mxu1 %v1281_v53  ;;  %v4628_v34 = vsel %vm2039_vm10, %v2041_v47, %v2037_v60  ;;  %v2055_v27 = vand.u32 2147483648, %v4596_v42  ;;  %vm2050_vm11 = vweird.f32 %v3239_v48  ;;  %v1760_v35 = vpop.f32.mrf.mxu2 }
 0x2a9   : > { %v1758_v33 = vadd.f32 %v1757_v43, %v1645_v59  ;;  %900 = vst.msk [vmem:[#allocation2 + $0x140] sm:$0xff] %vm881_vm7, %v834_v58  ;;  %2643 = vrot.lane.b32.xlu2 %v4628_v34, %s3450_s13  ;;  %2515 = vrot.lane.b32.xlu0 %v4628_v34, %s3451_s29  ;;  %v1288_v31 = vld [vmem:[#allocation2 + $0x168] sm:$0xff]  ;;  %v2046_v38 = vsub.f32 1.0, %v2045_v9  ;;  %vm2051_vm13 = vmor %vm2049_vm12, %vm2050_vm11  ;;  %vm2054_vm14 = vcmp.eq.f32.partialorder %v2053_v63, 8.507059e+37 }
 0x2aa   : > { %3065 = vmatmul.msk.f32.gmra.mxu2 %vm1512_vm8, %v1288_v31  ;;  %v2056_v58 = vor.u32 1.1754944e-38, %v2055_v27 }
 0x2ab   : > { %v1845_v51 = vadd.f32 %v4478_v62, %v1758_v33  ;;  %3072 = vmatmul.msk.f32.gmra.mxu3 %vm1512_vm8, %v1302_v46  ;;  %v2047_v43 = vmul.f32 %v3239_v48, %v2046_v38  ;;  %v1290_v46 = vld [vmem:[#allocation2 + $0x178] sm:$0xff] }
 0x2ad   : > { %v3241_v47 = vpop.eup %3240  ;;  %v3081_v59 = vmul.f32 -1.442695, %v1845_v51  ;;  %v2048_v52 = vadd.f32 %v3239_v48, %v2047_v43  ;;  %v4660_v63 = vpop.f32.mrf.mxu3 }
 0x2ae   : > { %v3243_v9 = vpop.eup %3242  ;;  %v4643_v53 = vadd.f32 1.0, %v3241_v47  ;;  %v1647_v60 = vpop.f32.mrf.mxu1 }
 0x2af   : > { %3244 = vpow2.f32 %v3081_v59  ;;  %v1648_v31 = vadd.f32 %v1647_v60, %v1437_v61  ;;  %v1109_v33 = vpop.permute.xlu0 %1108  ;;  %v2052_v24 = vsel %vm2051_vm13, %v3239_v48, %v2048_v52  ;;  %v2060_v38 = vmul.f32 %v3243_v9, %v4623_v54  ;;  %v1440_v59 = vpop.f32.mrf.mxu0 }
 0x2b0   : > { %3246 = vrcp.f32 %v4643_v53  ;;  %1175 = vst.msk [vmem:[#allocation2 + $0x1e8] sm:$0x7f] %vm1144_vm5, %v1109_v33  ;;  %v719_v51 = vpop.permute.xlu1 %718  ;;  %v4648_v42 = vsel %vm2054_vm14, %v2056_v58, %v2052_v24  ;;  %v1283_v43 = vld [vmem:[#allocation2 + $0x140] sm:$0xff]  ;;  %v2068_v24 = vand.u32 2147483647, %v4623_v54  ;;  %v2070_v61 = vand.u32 2147483648, %v4623_v54  ;;  %v1763_v33 = vpop.f32.mrf.mxu2 }
 0x2b1   : > { %v1761_v47 = vadd.f32 %v1760_v35, %v1648_v31  ;;  %1208 = vst.msk [vmem:[#allocation2 + $0x1e8] sm:$0x1] %vm1177_vm6, %v5603_v22  ;;  %2517 = vrot.lane.b32.xlu1 %v4648_v42, %s3451_s29  ;;  %2645 = vrot.lane.b32.xlu0 %v4648_v42, %s3450_s13  ;;  %v2061_v48 = vsub.f32 1.0, %v2060_v38  ;;  %vm2065_vm15 = vweird.f32 %v3243_v9 }
 0x2b2   : > { %786 = vst.msk [vmem:[#allocation2 + $0x150] sm:$0xff] %vm767_vm4, %v719_v51  ;;  %1685 = vmatmul.f32.gmra.mxu1 %v1283_v43  ;;  %3066 = vmatmul.msk.f32.gmra.mxu2 %vm1512_vm8, %v1290_v46  ;;  %vm2064_vm4 = vweird.f32 %v4623_v54  ;;  %vm2069_vm2 = vcmp.eq.f32.partialorder %v2068_v24, 8.507059e+37  ;;  %v2071_v51 = vor.u32 1.1754944e-38, %v2070_v61  ;;  %v2083_v61 = vand.u32 2147483647, %v4643_v53 }
 0x2b3   : > { %v1846_v27 = vadd.f32 %v4478_v62, %v1761_v47  ;;  %901 = vst.msk [vmem:[#allocation2 + $0x150] sm:$0xff] %vm881_vm7, %v4572_v45  ;;  %v2062_v35 = vmul.f32 %v3243_v9, %v2061_v48  ;;  %vm2066_vm1 = vmor %vm2064_vm4, %vm2065_vm15 }
 0x2b4   : > { %vm2084_vm10 = vcmp.eq.f32.partialorder %v2083_v61, 8.507059e+37 }
 0x2b5   : > { %v3245_v52 = vpop.eup %3244  ;;  %v3082_v60 = vmul.f32 -1.442695, %v1846_v27  ;;  %v2063_v58 = vadd.f32 %v3243_v9, %v2062_v35 }
 0x2b6   : > { %v3247_v31 = vpop.eup %3246  ;;  %v4666_v46 = vadd.f32 1.0, %v3245_v52  ;;  %v1650_v38 = vpop.f32.mrf.mxu1 }
 0x2b7   : > { %3248 = vpow2.f32 %v3082_v60  ;;  %v1651_v43 = vadd.f32 %v1650_v38, %v1440_v59  ;;  %v1097_v47 = vpop.permute.xlu0 %1096  ;;  %v2067_v45 = vsel %vm2066_vm1, %v3243_v9, %v2063_v58  ;;  %v2075_v48 = vmul.f32 %v3247_v31, %v4643_v53  ;;  %v4686_v38 = vpop.f32.mrf.mxu3 }
 0x2b8   : > { %3250 = vrcp.f32 %v4666_v46  ;;  %1169 = vst.msk [vmem:[#allocation2 + $0x188] sm:$0x7f] %vm1144_vm5, %v1097_v47  ;;  %v1111_v27 = vpop.permute.xlu1 %1110  ;;  %v4671_v54 = vsel %vm2069_vm2, %v2071_v51, %v2067_v45  ;;  %v1304_v35 = vld [vmem:[#allocation2 + $0x1e8] sm:$0xff]  ;;  %v2085_v59 = vand.u32 2147483648, %v4643_v53  ;;  %vm2080_vm3 = vweird.f32 %v3247_v31  ;;  %v1443_v45 = vpop.f32.mrf.mxu0 }
 0x2b9   : > { %v1764_v52 = vadd.f32 %v1763_v33, %v1651_v43  ;;  %1202 = vst.msk [vmem:[#allocation2 + $0x188] sm:$0x1] %vm1177_vm6, %v5603_v22  ;;  %2647 = vrot.lane.b32.xlu1 %v4671_v54, %s3450_s13  ;;  %2519 = vrot.lane.b32.xlu2 %v4671_v54, %s3451_s29  ;;  %v2076_v9 = vsub.f32 1.0, %v2075_v48  ;;  %v1766_v17 = vpop.f32.mrf.mxu2 }
 0x2ba   : > { %1176 = vst.msk [vmem:[#allocation2 + $0x1f8] sm:$0x7f] %vm1144_vm5, %v1111_v27  ;;  %3073 = vmatmul.msk.f32.gmra.mxu3 %vm1512_vm8, %v1304_v35  ;;  %v1285_v24 = vld [vmem:[#allocation2 + $0x150] sm:$0xff]  ;;  %vm2079_vm5 = vweird.f32 %v4643_v53  ;;  %v2086_v35 = vor.u32 1.1754944e-38, %v2085_v59  ;;  %v2100_v59 = vand.u32 2147483648, %v4666_v46 }
 0x2bb   : > { %v1847_v60 = vadd.f32 %v4478_v62, %v1764_v52  ;;  %1209 = vst.msk [vmem:[#allocation2 + $0x1f8] sm:$0x1] %vm1177_vm6, %v5603_v22  ;;  %1688 = vmatmul.f32.gmra.mxu1 %v1285_v24  ;;  %v2077_v58 = vmul.f32 %v3247_v31, %v2076_v9  ;;  %vm2081_vm9 = vmor %vm2079_vm5, %vm2080_vm3 }
 0x2bd   : > { %v3249_v33 = vpop.eup %3248  ;;  %v3083_v51 = vmul.f32 -1.442695, %v1847_v60  ;;  %v2078_v43 = vadd.f32 %v3247_v31, %v2077_v58 }
 0x2be   : > { %v3251_v47 = vpop.eup %3250  ;;  %v1974_v48 = vadd.f32 1.0, %v3249_v33  ;;  %v1653_v27 = vpop.f32.mrf.mxu1 }
 0x2bf   : > { %3252 = vpow2.f32 %v3083_v51  ;;  %v1654_v52 = vadd.f32 %v1653_v27, %v1443_v45  ;;  %v838_v22 = vpop.permute.xlu0 %837  ;;  %v2082_v24 = vsel %vm2081_vm9, %v3247_v31, %v2078_v43  ;;  %v2090_v9 = vmul.f32 %v3251_v47, %v4666_v46 }
 0x2c0   : > { %3254 = vrcp.f32 %v1974_v48  ;;  %902 = vst.msk [vmem:[#allocation2 + $0x160] sm:$0xff] %vm881_vm7, %v838_v22  ;;  %v4691_v60 = vsel %vm2084_vm10, %v2086_v35, %v2082_v24  ;;  %v1292_v53 = vld [vmem:[#allocation2 + $0x188] sm:$0xff]  ;;  %vm2095_vm6 = vweird.f32 %v3251_v47  ;;  %vm2094_vm7 = vweird.f32 %v4666_v46  ;;  %v4703_v24 = vpop.f32.mrf.mxu3 }
 0x2c1   : > { %v1767_v58 = vadd.f32 %v1766_v17, %v1654_v52  ;;  %2649 = vrot.lane.b32.xlu2 %v4691_v60, %s3450_s13  ;;  %2521 = vrot.lane.b32.xlu0 %v4691_v60, %s3451_s29  ;;  %v2091_v61 = vsub.f32 1.0, %v2090_v9  ;;  %v2098_v17 = vand.u32 2147483647, %v4666_v46  ;;  %vm2096_vm11 = vmor %vm2094_vm7, %vm2095_vm6  ;;  %v2101_v22 = vor.u32 1.1754944e-38, %v2100_v59 }
 0x2c2   : > { %3067 = vmatmul.msk.f32.gmra.mxu2 %vm1512_vm8, %v1292_v53  ;;  %v1306_v31 = vld [vmem:[#allocation2 + $0x1f8] sm:$0xff]  ;;  %vm2109_vm13 = vweird.f32 %v1974_v48  ;;  %v1702_v2 = vadd.f32 %v4703_v24, %v4452_v55 }
 0x2c3   : > { %v1848_v33 = vadd.f32 %v4478_v62, %v1767_v58  ;;  %3074 = vmatmul.msk.f32.gmra.mxu3 %vm1512_vm8, %v1306_v31  ;;  %v2092_v51 = vmul.f32 %v3251_v47, %v2091_v61  ;;  %vm2099_vm12 = vcmp.eq.f32.partialorder %v2098_v17, 8.507059e+37  ;;  %v2115_v31 = vand.u32 2147483648, %v1974_v48 }
 0x2c5   : > { %v3253_v43 = vpop.eup %3252  ;;  %v3084_v45 = vmul.f32 -1.442695, %v1848_v33  ;;  %v2093_v27 = vadd.f32 %v3251_v47, %v2092_v51  ;;  %v2113_v33 = vand.u32 2147483647, %v1974_v48  ;;  %v1446_v51 = vpop.f32.mrf.mxu0 }
 0x2c6   : > { %v3255_v35 = vpop.eup %3254  ;;  %v1975_v52 = vadd.f32 1.0, %v3253_v43 }
 0x2c7   : > { %3256 = vpow2.f32 %v3084_v45  ;;  %v1287_v9 = vld [vmem:[#allocation2 + $0x160] sm:$0xff]  ;;  %v2097_v53 = vsel %vm2096_vm11, %v3251_v47, %v2093_v27  ;;  %v2105_v58 = vmul.f32 %v3255_v35, %v1974_v48  ;;  %vm2110_vm8 = vweird.f32 %v3255_v35 }
 0x2c8   : > { %3258 = vrcp.f32 %v1975_v52  ;;  %1691 = vmatmul.f32.gmra.mxu1 %v1287_v9  ;;  %v4705_v61 = vsel %vm2099_vm12, %v2101_v22, %v2097_v53  ;;  %vm2111_vm14 = vmor %vm2109_vm13, %vm2110_vm8  ;;  %v2116_v27 = vor.u32 1.1754944e-38, %v2115_v31  ;;  %vm2114_vm15 = vcmp.eq.f32.partialorder %v2113_v33, 8.507059e+37  ;;  %v4713_v16 = vpop.f32.mrf.mxu3 }
 0x2c9   : > { %2651 = vrot.lane.b32.xlu0 %v4705_v61, %s3450_s13  ;;  %2523 = vrot.lane.b32.xlu1 %v4705_v61, %s3451_s29  ;;  %v2106_v46 = vsub.f32 1.0, %v2105_v58  ;;  %v2130_v48 = vand.u32 2147483648, %v1975_v52  ;;  %vm2124_vm1 = vweird.f32 %v1975_v52 }
 0x2cb   : > { %v2107_v59 = vmul.f32 %v3255_v35, %v2106_v46 }
 0x2cd   : > { %v3257_v43 = vpop.eup %3256  ;;  %v2108_v47 = vadd.f32 %v3255_v35, %v2107_v59  ;;  %v2128_v59 = vand.u32 2147483647, %v1975_v52  ;;  %v1449_v33 = vpop.f32.mrf.mxu0 }
 0x2ce   : > { %v3259_v17 = vpop.eup %3258  ;;  %v1976_v45 = vadd.f32 1.0, %v3257_v43  ;;  %v2131_v43 = vor.u32 1.1754944e-38, %v2130_v48 }
 0x2cf   : > { %v2112_v22 = vsel %vm2111_vm14, %v3255_v35, %v2108_v47  ;;  %v2120_v9 = vmul.f32 %v3259_v17, %v1975_v52  ;;  %vm2125_vm4 = vweird.f32 %v3259_v17  ;;  %vm2129_vm3 = vcmp.eq.f32.partialorder %v2128_v59, 8.507059e+37 }
 0x2d0   : > { %3260 = vrcp.f32 %v1976_v45  ;;  %v4711_v53 = vsel %vm2114_vm15, %v2116_v27, %v2112_v22  ;;  %vm2126_vm2 = vmor %vm2124_vm1, %vm2125_vm4  ;;  %v2145_v52 = vand.u32 2147483648, %v1976_v45  ;;  %v2143_v11 = vand.u32 2147483647, %v1976_v45 }
 0x2d1   : > { %2653 = vrot.lane.b32.xlu1 %v4711_v53, %s3450_s13  ;;  %2525 = vrot.lane.b32.xlu2 %v4711_v53, %s3451_s29  ;;  %v2121_v58 = vsub.f32 1.0, %v2120_v9  ;;  %vm2139_vm9 = vweird.f32 %v1976_v45 }
 0x2d2   : > { %vm2144_vm6 = vcmp.eq.f32.partialorder %v2143_v11, 8.507059e+37 }
 0x2d3   : > { %v2122_v46 = vmul.f32 %v3259_v17, %v2121_v58  ;;  %v4721_v14 = vpop.f32.mrf.mxu3  ;;  %v1769_v58 = vpop.f32.mrf.mxu2 }
 0x2d5   : > { %v2123_v31 = vadd.f32 %v3259_v17, %v2122_v46 }
 0x2d6   : > { %v3261_v35 = vpop.eup %3260 }
 0x2d7   : > { %v2127_v47 = vsel %vm2126_vm2, %v3259_v17, %v2123_v31  ;;  %v2135_v27 = vmul.f32 %v3261_v35, %v1976_v45  ;;  %vm2140_vm5 = vweird.f32 %v3261_v35  ;;  %v2146_v17 = vor.u32 1.1754944e-38, %v2145_v52  ;;  %v1452_v31 = vpop.f32.mrf.mxu0 }
 0x2d8   : > { %v4719_v22 = vsel %vm2129_vm3, %v2131_v43, %v2127_v47  ;;  %vm2141_vm10 = vmor %vm2139_vm9, %vm2140_vm5  ;;  %v1656_v47 = vpop.f32.mrf.mxu1 }
 0x2d9   : > { %2655 = vrot.lane.b32.xlu2 %v4719_v22, %s3450_s13  ;;  %2527 = vrot.lane.b32.xlu0 %v4719_v22, %s3451_s29  ;;  %v2136_v9 = vsub.f32 1.0, %v2135_v27  ;;  %v1657_v11 = vadd.f32 %v1656_v47, %v1446_v51 }
 0x2db   : > { %v2137_v46 = vmul.f32 %v3261_v35, %v2136_v9  ;;  %v1772_v27 = vpop.f32.mrf.mxu2 }
 0x2dd   : > { %v2138_v48 = vadd.f32 %v3261_v35, %v2137_v46  ;;  %v4731_v23 = vpop.f32.mrf.mxu3 }
 0x2df   : > { %v2142_v59 = vsel %vm2141_vm10, %v3261_v35, %v2138_v48  ;;  %v1455_v15 = vpop.f32.mrf.mxu0 }
 0x2e0   : > { %v4727_v43 = vsel %vm2144_vm6, %v2146_v17, %v2142_v59  ;;  %v1659_v9 = vpop.f32.mrf.mxu1  ;;  %v1770_v17 = vadd.f32 %v1769_v58, %v1657_v11 }
 0x2e1   : > { %2657 = vrot.lane.b32.xlu0 %v4727_v43, %s3450_s13  ;;  %v1660_v10 = vadd.f32 %v1659_v9, %v1449_v33 }
 0x2e2   : > { %v1849_v13 = vadd.f32 %v4478_v62, %v1770_v17 }
 0x2e3   : > { %v1775_v46 = vpop.f32.mrf.mxu2  ;;  %v1773_v3 = vadd.f32 %v1772_v27, %v1660_v10 }
 0x2e4   : > { %v3085_v8 = vmul.f32 -1.442695, %v1849_v13 }
 0x2e5   : > { %v4733_v12 = vpop.f32.mrf.mxu3  ;;  %v1850_v58 = vadd.f32 %v4478_v62, %v1773_v3 }
 0x2e6   : > { %3262 = vpow2.f32 %v3085_v8  ;;  %v1705_v8 = vadd.f32 %v4713_v16, %v4470_v49 }
 0x2e7   : > { %v4735_v45 = vpop.f32.mrf.mxu0  ;;  %v3086_v9 = vmul.f32 -1.442695, %v1850_v58 }
 0x2e8   : > { %v1662_v35 = vpop.f32.mrf.mxu1 }
 0x2e9   : > { %v1663_v21 = vadd.f32 %v1662_v35, %v1452_v31 }
 0x2eb   : > { %v1778_v48 = vpop.f32.mrf.mxu2  ;;  %v1776_v47 = vadd.f32 %v1775_v46, %v1663_v21 }
 0x2ec   : > { %v3263_v55 = vpop.eup %3262 }
 0x2ed   : > { %v1851_v13 = vadd.f32 %v4478_v62, %v1776_v47  ;;  %v4760_v17 = vadd.f32 1.0, %v3263_v55 }
 0x2ef   : > { %v4741_v7 = vpop.f32.mrf.mxu0  ;;  %vm2154_vm13 = vweird.f32 %v4760_v17 }
 0x2f0   : > { %v1665_v5 = vpop.f32.mrf.mxu1 }
 0x2f1   : > { %v1666_v3 = vadd.f32 %v1665_v5, %v1455_v15 }
 0x2f3   : > { %v4744_v6 = vpop.f32.mrf.mxu2  ;;  %v1779_v58 = vadd.f32 %v1778_v48, %v1666_v3 }
 0x2f5   : > { %v4737_v52 = vpop.f32.mrf.mxu3 }
 0x2f7   : > { %v4751_v0 = vpop.f32.mrf.mxu0 }
 0x2f8   : > { %v4749_v11 = vpop.f32.mrf.mxu1 }
 0x2fb   : > { %v4755_v10 = vpop.f32.mrf.mxu2 }
 0x2fd   : > { %v4739_v59 = vpop.f32.mrf.mxu3 }
 0x2ff   : > { %v4766_v16 = vpop.f32.mrf.mxu0 }
 0x300   : > { %v4762_v47 = vpop.f32.mrf.mxu1 }
 0x303   : > { %v4768_v49 = vpop.f32.mrf.mxu2 }
 0x305   : > { %v1814_v51 = vpop.f32.mrf.mxu3 }
 0x306   : > { %v1815_v19 = vadd.f32 %v1814_v51, %v1702_v2  ;;  %v2514_v51 = vpop.permute.xlu2 %2513 }
 0x308   : > { %v1864_v33 = vadd.f32 %v4478_v62, %v1815_v19  ;;  %v3087_v19 = vmul.f32 -1.442695, %v1851_v13 }
 0x30a   : > { %v3100_v31 = vmul.f32 -1.442695, %v1864_v33 }
 0x30b   : > { %v2512_v27 = vpop.permute.xlu1 %2511  ;;  %v2640_v2 = vpop.permute.xlu0 %2639 }
 0x30c   : > { %3264 = vpow2.f32 %v3100_v31  ;;  %v2607_v21 = vadd.f32 %v2512_v27, %v4570_v44  ;;  %v2608_v44 = vadd.f32 %v2514_v51, %v4607_v50  ;;  %v1708_v51 = vadd.f32 %v4721_v14, %v4502_v40 }
 0x30d   : > { %v1817_v24 = vpop.f32.mrf.mxu3  ;;  %3266 = vpow2.f32 %v3086_v9 }
 0x30e   : > { %v2735_v46 = vadd.f32 %v2640_v2, %v2607_v21  ;;  %v1818_v35 = vadd.f32 %v1817_v24, %v1705_v8  ;;  %3268 = vpow2.f32 %v3087_v19  ;;  %v4782_v24 = vpop.f32.mrf.mxu1 }
 0x30f   : > { %3270 = vrcp.f32 %v4760_v17 }
 0x310   : > { %v2767_v33 = vmul.f32 %v2735_v46, %v3769_v26  ;;  %v1865_v5 = vadd.f32 %v4478_v62, %v1818_v35  ;;  %v1852_v26 = vadd.f32 %v4478_v62, %v1779_v58  ;;  %v4793_v58 = vpop.f32.mrf.mxu2 }
 0x312   : > { %v3265_v15 = vpop.eup %3264  ;;  %2799 = vst.msk [vmem:[%s3846_s7] sm:$0xff] %vm440_vm0, %v2767_v33  ;;  %v3101_v9 = vmul.f32 -1.442695, %v1865_v5  ;;  %v3088_v21 = vmul.f32 -1.442695, %v1852_v26 }
 0x313   : > { %v1992_v48 = vadd.f32 1.0, %v3265_v15  ;;  %v2642_v13 = vpop.permute.xlu1 %2641  ;;  %v3267_v31 = vpop.eup %3266 }
 0x314   : > { %3272 = vpow2.f32 %v3101_v9  ;;  %v2736_v27 = vadd.f32 %v2642_v13, %v2608_v44  ;;  %v4776_v8 = vadd.f32 1.0, %v3267_v31  ;;  %v3269_v3 = vpop.eup %3268  ;;  %v2644_v15 = vpop.permute.xlu2 %2643  ;;  %v1669_v13 = vadd.f32 %v4749_v11, %v4735_v45 }
 0x315   : > { %3274 = vrcp.f32 %v1992_v48  ;;  %v4780_v50 = vpop.eup %3270  ;;  %v4785_v62 = vadd.f32 1.0, %v3269_v3  ;;  %v2383_v40 = vand.u32 2147483647, %v1992_v48  ;;  %vm2379_vm11 = vweird.f32 %v1992_v48 }
 0x316   : > { %v2768_v55 = vmul.f32 %v2736_v27, %v3787_v30  ;;  %3276 = vrcp.f32 %v4776_v8  ;;  %v4789_v30 = vpop.f32.mrf.mxu0  ;;  %v2150_v9 = vmul.f32 %v4780_v50, %v4760_v17  ;;  %v2385_v27 = vand.u32 2147483648, %v1992_v48 }
 0x317   : > { %3278 = vpow2.f32 %v3088_v21  ;;  %vm2384_vm8 = vcmp.eq.f32.partialorder %v2383_v40, 8.507059e+37  ;;  %vm2155_vm14 = vweird.f32 %v4780_v50  ;;  %vm2169_vm9 = vweird.f32 %v4776_v8 }
 0x318   : > { %2800 = vst.msk [vmem:[%s3846_s7 + $0x8] sm:$0xff] %vm440_vm0, %v2768_v55  ;;  %v4806_v55 = vld [vmem:[%s5548_s5] ss:$0 sm:$0xff]  ;;  %v2151_v11 = vsub.f32 1.0, %v2150_v9  ;;  %v4835_v40 = vpop.f32.mrf.mxu2  ;;  %vm4880_vm3 = vmor %vm2154_vm13, %vm2155_vm14 }
 0x31a   : > { %v3273_v2 = vpop.eup %3272 }
 0x31b   : > { %v3275_v19 = vpop.eup %3274  ;;  %v4787_v46 = vadd.f32 1.0, %v3273_v2  ;;  %v2516_v35 = vpop.permute.xlu0 %2515 }
 0x31c   : > { %v2609_v33 = vadd.f32 %v2516_v35, %v4628_v34  ;;  %v2375_v5 = vmul.f32 %v3275_v19, %v1992_v48  ;;  %vm2380_vm7 = vweird.f32 %v3275_v19  ;;  %v4809_v45 = vpop.eup %3276 }
 0x31d   : > { %3280 = vrcp.f32 %v4787_v46  ;;  %v1820_v44 = vpop.f32.mrf.mxu3  ;;  %vm2381_vm12 = vmor %vm2379_vm11, %vm2380_vm7  ;;  %vm2394_vm4 = vweird.f32 %v4787_v46  ;;  %vm2170_vm6 = vweird.f32 %v4809_v45  ;;  %vm2184_vm7 = vweird.f32 %v4785_v62 }
 0x31e   : > { %v2737_v31 = vadd.f32 %v2644_v15, %v2609_v33  ;;  %v1821_v26 = vadd.f32 %v1820_v44, %v1708_v51  ;;  %v2376_v14 = vsub.f32 1.0, %v2375_v5  ;;  %3282 = vrcp.f32 %v4785_v62  ;;  %v3279_v51 = vpop.eup %3278 }
 0x31f   : > { %v1782_v33 = vadd.f32 %v4744_v6, %v1669_v13  ;;  %v1711_v44 = vadd.f32 %v4731_v23, %v4528_v57 }
 0x320   : > { %v2769_v34 = vmul.f32 %v2737_v31, %v3782_v29  ;;  %v1866_v3 = vadd.f32 %v4806_v55, %v1821_v26  ;;  %v2377_v21 = vmul.f32 %v3275_v19, %v2376_v14  ;;  %v1672_v31 = vadd.f32 %v4762_v47, %v4741_v7  ;;  %v4821_v14 = vpop.f32.mrf.mxu1 }
 0x321   : > { %v2386_v26 = vor.u32 1.1754944e-38, %v2385_v27  ;;  %v2152_v7 = vmul.f32 %v4780_v50, %v2151_v11  ;;  %v1853_v47 = vadd.f32 %v4806_v55, %v1782_v33  ;;  %v4842_v11 = vpop.f32.mrf.mxu0 }
 0x322   : > { %2801 = vst.msk [vmem:[%s3846_s7 + $0x10] sm:$0xff] %vm440_vm0, %v2769_v34  ;;  %v3102_v29 = vmul.f32 -1.442695, %v1866_v3  ;;  %v2378_v5 = vadd.f32 %v3275_v19, %v2377_v21  ;;  %v4827_v3 = vadd.f32 1.0, %v3279_v51  ;;  %v2173_v21 = vand.u32 2147483647, %v4776_v8 }
 0x323   : > { %v3281_v15 = vpop.eup %3280  ;;  %v2518_v9 = vpop.permute.xlu1 %2517  ;;  %v1785_v51 = vadd.f32 %v4755_v10, %v1672_v31  ;;  %v2153_v10 = vadd.f32 %v4780_v50, %v2152_v7 }
 0x324   : > { %3284 = vpow2.f32 %v3102_v29  ;;  %v2610_v6 = vadd.f32 %v2518_v9, %v4648_v42  ;;  %v2382_v13 = vsel %vm2381_vm12, %v3275_v19, %v2378_v5  ;;  %v2390_v48 = vmul.f32 %v3281_v15, %v4787_v46  ;;  %v4825_v34 = vpop.eup %3282  ;;  %v2646_v23 = vpop.permute.xlu0 %2645  ;;  %vm4939_vm12 = vmor %vm2169_vm9, %vm2170_vm6 }
 0x325   : > { %v4829_v57 = vsel %vm2384_vm8, %v2386_v26, %v2382_v13  ;;  %v2520_v29 = vpop.permute.xlu2 %2519  ;;  %v2400_v5 = vand.u32 2147483648, %v4787_v46  ;;  %v2165_v9 = vmul.f32 %v4809_v45, %v4776_v8  ;;  %vm2395_vm15 = vweird.f32 %v3281_v15 }
 0x326   : > { %v2738_v42 = vadd.f32 %v2646_v23, %v2610_v6  ;;  %v1823_v19 = vpop.f32.mrf.mxu3  ;;  %2689 = vrot.lane.b32.xlu1 %v4829_v57, %s3450_s13  ;;  %2561 = vrot.lane.b32.xlu2 %v4829_v57, %s3451_s29  ;;  %v2391_v27 = vsub.f32 1.0, %v2390_v48  ;;  %v2398_v13 = vand.u32 2147483647, %v4787_v46  ;;  %3286 = vrcp.f32 %v4827_v3  ;;  %vm2396_vm1 = vmor %vm2394_vm4, %vm2395_vm15 }
 0x327   : > { %v1824_v33 = vadd.f32 %v1823_v19, %v1711_v44  ;;  %v2180_v44 = vmul.f32 %v4825_v34, %v4785_v62  ;;  %v3089_v23 = vmul.f32 -1.442695, %v1853_v47  ;;  %v2611_v19 = vadd.f32 %v2520_v29, %v4671_v54 }
 0x328   : > { %v2770_v26 = vmul.f32 %v2738_v42, %v3777_v28  ;;  %v2392_v6 = vmul.f32 %v3281_v15, %v2391_v27  ;;  %v2166_v7 = vsub.f32 1.0, %v2165_v9  ;;  %v1854_v2 = vadd.f32 %v4806_v55, %v1785_v51  ;;  %v4869_v29 = vpop.f32.mrf.mxu1  ;;  %v4892_v51 = vpop.f32.mrf.mxu2 }
 0x329   : > { %v1867_v48 = vadd.f32 %v4806_v55, %v1824_v33  ;;  %v2401_v33 = vor.u32 1.1754944e-38, %v2400_v5  ;;  %vm2399_vm2 = vcmp.eq.f32.partialorder %v2398_v13, 8.507059e+37  ;;  %v1714_v54 = vadd.f32 %v4733_v12, %v4554_v39 }
 0x32a   : > { %v3285_v31 = vpop.eup %3284  ;;  %2802 = vst.msk [vmem:[%s3846_s7 + $0x18] sm:$0xff] %vm440_vm0, %v2770_v26  ;;  %v2393_v28 = vadd.f32 %v3281_v15, %v2392_v6  ;;  %v2175_v46 = vand.u32 2147483648, %v4776_v8  ;;  %v2181_v12 = vsub.f32 1.0, %v2180_v44  ;;  %v5606_v26 = vand.u32 2147483647, %v4760_v17 }
 0x32b   : > { %v4859_v42 = vadd.f32 1.0, %v3285_v31  ;;  %v3103_v27 = vmul.f32 -1.442695, %v1867_v48  ;;  %v2648_v35 = vpop.permute.xlu1 %2647  ;;  %v5607_v6 = vand.u32 2147483648, %v4760_v17  ;;  %v4901_v48 = vpop.f32.mrf.mxu0  ;;  %vm4906_vm10 = vcmp.eq.f32.partialorder %v2173_v21, 8.507059e+37 }
 0x32c   : > { %v2739_v20 = vadd.f32 %v2648_v35, %v2611_v19  ;;  %v2397_v4 = vsel %vm2396_vm1, %v3281_v15, %v2393_v28  ;;  %v4884_v39 = vpop.eup %3286  ;;  %v2167_v35 = vmul.f32 %v4809_v45, %v2166_v7  ;;  %v3090_v15 = vmul.f32 -1.442695, %v1854_v2 }
 0x32d   : > { %3288 = vrcp.f32 %v4859_v42  ;;  %v4866_v47 = vsel %vm2399_vm2, %v2401_v33, %v2397_v4  ;;  %vm2159_vm5 = vcmp.eq.f32.partialorder %v5606_v26, 8.507059e+37  ;;  %v2161_v13 = vor.u32 1.1754944e-38, %v5607_v6 }
 0x32e   : > { %3290 = vpow2.f32 %v3089_v23  ;;  %v2771_v5 = vmul.f32 %v2739_v20, %v3807_v37  ;;  %v1826_v9 = vpop.f32.mrf.mxu3  ;;  %2563 = vrot.lane.b32.xlu0 %v4866_v47, %s3451_s29  ;;  %2529 = vrot.lane.b32.xlu1 %v4727_v43, %s3451_s29  ;;  %v2157_v37 = vsel %vm4880_vm3, %v4780_v50, %v2153_v10  ;;  %v1675_v50 = vadd.f32 %v4782_v24, %v4751_v0 }
 0x32f   : > { %3292 = vpow2.f32 %v3103_v27  ;;  %v1827_v20 = vadd.f32 %v1826_v9, %v1714_v54  ;;  %2691 = vrot.lane.b32.xlu2 %v4866_v47, %s3450_s13  ;;  %v2176_v44 = vor.u32 1.1754944e-38, %v2175_v46  ;;  %v4910_v31 = vsel %vm2159_vm5, %v2161_v13, %v2157_v37  ;;  %v2650_v9 = vpop.permute.xlu2 %2649 }
 0x330   : > { %2803 = vst.msk [vmem:[%s3846_s7 + $0x20] sm:$0xff] %vm440_vm0, %v2771_v5  ;;  %v2182_v17 = vmul.f32 %v4825_v34, %v2181_v12  ;;  %v2195_v23 = vmul.f32 %v4884_v39, %v4827_v3  ;;  %v1678_v0 = vadd.f32 %v4821_v14, %v4766_v16  ;;  %v2168_v28 = vadd.f32 %v4809_v45, %v2167_v35  ;;  %v4929_v14 = vpop.f32.mrf.mxu1  ;;  %v4954_v26 = vpop.f32.mrf.mxu2 }
 0x331   : > { %v1868_v10 = vadd.f32 %v4806_v55, %v1827_v20  ;;  %3294 = vpow2.f32 %v3090_v15  ;;  %v2190_v54 = vand.u32 2147483648, %v4785_v62  ;;  %v1788_v5 = vadd.f32 %v4768_v49, %v1675_v50 }
 0x332   : > { %vm2185_vm11 = vweird.f32 %v4825_v34  ;;  %v2188_v16 = vand.u32 2147483647, %v4785_v62  ;;  %v4944_v49 = vadd.f32 %v4825_v34, %v2182_v17  ;;  %v2196_v20 = vsub.f32 1.0, %v2195_v23 }
 0x333   : > { %v4916_v19 = vpop.eup %3288  ;;  %v3104_v24 = vmul.f32 -1.442695, %v1868_v10  ;;  %v2522_v21 = vpop.permute.xlu0 %2521  ;;  %v1791_v35 = vadd.f32 %v4793_v58, %v1678_v0  ;;  %v2172_v8 = vsel %vm4939_vm12, %v4809_v45, %v2168_v28  ;;  %v2415_v13 = vand.u32 2147483648, %v4859_v42  ;;  %vm4969_vm13 = vmor %vm2184_vm7, %vm2185_vm11 }
 0x334   : > { %v3291_v27 = vpop.eup %3290  ;;  %v2612_v33 = vadd.f32 %v2522_v21, %v4691_v60  ;;  %v2405_v7 = vmul.f32 %v4916_v19, %v4859_v42  ;;  %v4959_v50 = vor.u32 1.1754944e-38, %v2190_v54  ;;  %v1855_v58 = vadd.f32 %v4806_v55, %v1788_v5 }
 0x335   : > { %v3293_v46 = vpop.eup %3292  ;;  %3296 = vpow2.f32 %v3104_v24  ;;  %v4946_v37 = vadd.f32 1.0, %v3291_v27  ;;  %vm2410_vm8 = vweird.f32 %v4916_v19  ;;  %v2413_v17 = vand.u32 2147483647, %v4859_v42  ;;  %v4986_v27 = vpop.f32.mrf.mxu0 }
 0x336   : > { %v4931_v4 = vadd.f32 1.0, %v3293_v46  ;;  %v2740_v12 = vadd.f32 %v2650_v9, %v2612_v33  ;;  %2659 = vrot.lane.b32.xlu1 %v4910_v31, %s3450_s13  ;;  %v2406_v15 = vsub.f32 1.0, %v2405_v7  ;;  %v1717_v23 = vadd.f32 %v4737_v52, %v4599_v25 }
 0x337   : > { %2531 = vrot.lane.b32.xlu2 %v4910_v31, %s3451_s29  ;;  %v4979_v0 = vsel %vm4906_vm10, %v2176_v44, %v2172_v8  ;;  %v2187_v24 = vsel %vm4969_vm13, %v4825_v34, %v4944_v49  ;;  %v2197_v21 = vmul.f32 %v4884_v39, %v2196_v20  ;;  %v1856_v25 = vadd.f32 %v4806_v55, %v1791_v35  ;;  %v2526_v35 = vpop.permute.xlu2 %2525 }
 0x338   : > { %3298 = vrcp.f32 %v4931_v4  ;;  %v2772_v6 = vmul.f32 %v2740_v12, %v3802_v36  ;;  %v2407_v10 = vmul.f32 %v4916_v19, %v2406_v15  ;;  %v3295_v36 = vpop.eup %3294  ;;  %vm2409_vm14 = vweird.f32 %v4859_v42 }
 0x339   : > { %3300 = vrcp.f32 %v4946_v37  ;;  %v1681_v2 = vadd.f32 %v4869_v29, %v4789_v30  ;;  %vm2411_vm15 = vmor %vm2409_vm14, %vm2410_vm8  ;;  %v2416_v54 = vor.u32 1.1754944e-38, %v2415_v13  ;;  %vm2199_vm4 = vweird.f32 %v4827_v3 }
 0x33a   : > { %2804 = vst.msk [vmem:[%s3846_s7 + $0x28] sm:$0xff] %vm440_vm0, %v2772_v6  ;;  %v2408_v33 = vadd.f32 %v4916_v19, %v2407_v10  ;;  %v5000_v46 = vadd.f32 1.0, %v3295_v36  ;;  %v3091_v5 = vmul.f32 -1.442695, %v1855_v58  ;;  %vm2414_vm1 = vcmp.eq.f32.partialorder %v2413_v17, 8.507059e+37  ;;  %v1686_v58 = vpop.f32.mrf.mxu1 }
 0x33b   : > { %v3297_v28 = vpop.eup %3296  ;;  %v2524_v52 = vpop.permute.xlu1 %2523  ;;  %v3092_v20 = vmul.f32 -1.442695, %v1856_v25  ;;  %v2205_v8 = vand.u32 2147483648, %v4827_v3  ;;  %v1720_v6 = vadd.f32 %v4739_v59, %v4630_v56  ;;  %v1794_v13 = vadd.f32 %v4835_v40, %v1681_v2 }
 0x33c   : > { %v4994_v44 = vadd.f32 1.0, %v3297_v28  ;;  %v2613_v7 = vadd.f32 %v2524_v52, %v4705_v61  ;;  %v2652_v9 = vpop.permute.xlu0 %2651  ;;  %v2412_v42 = vsel %vm2411_vm15, %v4916_v19, %v2408_v33  ;;  %v2203_v19 = vand.u32 2147483647, %v4827_v3  ;;  %v5025_v56 = vpop.f32.mrf.mxu2 }
 0x33d   : > { %v1829_v12 = vpop.f32.mrf.mxu3  ;;  %v5004_v61 = vsel %vm2414_vm1, %v2416_v54, %v2412_v42  ;;  %v2198_v28 = vadd.f32 %v4884_v39, %v2197_v21  ;;  %vm2200_vm2 = vweird.f32 %v4884_v39  ;;  %v2614_v59 = vadd.f32 %v2526_v35, %v4711_v53  ;;  %v5037_v54 = vpop.f32.mrf.mxu0 }
 0x33e   : > { %v3299_v60 = vpop.eup %3298  ;;  %3302 = vrcp.f32 %v4994_v44  ;;  %v2741_v30 = vadd.f32 %v2652_v9, %v2613_v7  ;;  %v1830_v29 = vadd.f32 %v1829_v12, %v1717_v23  ;;  %2693 = vrot.lane.b32.xlu0 %v5004_v61, %s3450_s13  ;;  %2565 = vrot.lane.b32.xlu1 %v5004_v61, %s3451_s29  ;;  %v2430_v40 = vand.u32 2147483648, %v4931_v4  ;;  %vm5045_vm9 = vmor %vm2199_vm4, %vm2200_vm2 }
 0x33f   : > { %2661 = vrot.lane.b32.xlu2 %v4979_v0, %s3450_s13  ;;  %v2420_v15 = vmul.f32 %v3299_v60, %v4931_v4  ;;  %v5020_v36 = vpop.eup %3300  ;;  %3304 = vpow2.f32 %v3091_v5  ;;  %vm2425_vm3 = vweird.f32 %v3299_v60  ;;  %v2428_v33 = vand.u32 2147483647, %v4931_v4 }
 0x340   : > { %v2773_v10 = vmul.f32 %v2741_v30, %v3792_v32  ;;  %v1869_v17 = vadd.f32 %v4806_v55, %v1830_v29  ;;  %3306 = vrcp.f32 %v5000_v46  ;;  %v1857_v2 = vadd.f32 %v4806_v55, %v1794_v13 }
 0x341   : > { %v2421_v23 = vsub.f32 1.0, %v2420_v15  ;;  %3308 = vpow2.f32 %v3092_v20  ;;  %v2210_v53 = vmul.f32 %v5020_v36, %v4946_v37  ;;  %v1687_v5 = vadd.f32 %v1686_v58, %v4901_v48 }
 0x342   : > { %2805 = vst.msk [vmem:[%s3846_s7 + $0x30] sm:$0xff] %vm440_vm0, %v2773_v10  ;;  %v3105_v32 = vmul.f32 -1.442695, %v1869_v17  ;;  %vm2424_vm5 = vweird.f32 %v4931_v4  ;;  %v1684_v30 = vadd.f32 %v4929_v14, %v4842_v11  ;;  %v2431_v4 = vor.u32 1.1754944e-38, %v2430_v40 }
 0x343   : > { %v2654_v25 = vpop.permute.xlu1 %2653  ;;  %v2422_v52 = vmul.f32 %v3299_v60, %v2421_v23  ;;  %vm2426_vm10 = vmor %vm2424_vm5, %vm2425_vm3  ;;  %v2202_v3 = vsel %vm5045_vm9, %v4884_v39, %v2198_v28  ;;  %vm2429_vm6 = vcmp.eq.f32.partialorder %v2428_v33, 8.507059e+37  ;;  %v3093_v11 = vmul.f32 -1.442695, %v1857_v2 }
 0x344   : > { %v5032_v21 = vpop.eup %3302  ;;  %3310 = vpow2.f32 %v3105_v32  ;;  %v2742_v7 = vadd.f32 %v2654_v25, %v2614_v59  ;;  %v2206_v14 = vor.u32 1.1754944e-38, %v2205_v8  ;;  %v2211_v10 = vsub.f32 1.0, %v2210_v53  ;;  %v5090_v45 = vpop.f32.mrf.mxu2 }
 0x345   : > { %v2423_v9 = vadd.f32 %v3299_v60, %v2422_v52  ;;  %v2435_v42 = vmul.f32 %v5032_v21, %v4994_v44  ;;  %v3305_v20 = vpop.eup %3304  ;;  %v1800_v39 = vadd.f32 %v4954_v26, %v1687_v5  ;;  %vm2189_vm7 = vcmp.eq.f32.partialorder %v2188_v16, 8.507059e+37 }
 0x346   : > { %v2774_v48 = vmul.f32 %v2742_v7, %v3819_v41  ;;  %v1832_v29 = vpop.f32.mrf.mxu3  ;;  %2533 = vrot.lane.b32.xlu0 %v4979_v0, %s3451_s29  ;;  %v5060_v58 = vpop.eup %3306  ;;  %vm2204_vm11 = vcmp.eq.f32.partialorder %v2203_v19, 8.507059e+37  ;;  %v5080_v26 = vsel %vm2189_vm7, %v4959_v50, %v2187_v24  ;;  %v1797_v28 = vadd.f32 %v4892_v51, %v1684_v30 }
 0x347   : > { %v1833_v35 = vadd.f32 %v1832_v29, %v1720_v6  ;;  %v2427_v15 = vsel %vm2426_vm10, %v3299_v60, %v2423_v9  ;;  %v2436_v13 = vsub.f32 1.0, %v2435_v42  ;;  %v3309_v17 = vpop.eup %3308  ;;  %v1689_v6 = vpop.f32.mrf.mxu1  ;;  %v5082_v8 = vsel %vm2204_vm11, %v2206_v14, %v2202_v3 }
 0x348   : > { %2806 = vst.msk [vmem:[%s3846_s7 + $0x38] sm:$0xff] %vm440_vm0, %v2774_v48  ;;  %v5064_v41 = vsel %vm2429_vm6, %v2431_v4, %v2427_v15  ;;  %v5088_v19 = vadd.f32 1.0, %v3309_v17  ;;  %3312 = vpow2.f32 %v3093_v11  ;;  %v2212_v49 = vmul.f32 %v5020_v36, %v2211_v10  ;;  %v2656_v24 = vpop.permute.xlu2 %2655 }
 0x349   : > { %v1870_v23 = vadd.f32 %v4806_v55, %v1833_v35  ;;  %2567 = vrot.lane.b32.xlu2 %v5064_v41, %s3451_s29  ;;  %2695 = vrot.lane.b32.xlu1 %v5064_v41, %s3450_s13  ;;  %v2437_v16 = vmul.f32 %v5032_v21, %v2436_v13  ;;  %v1859_v50 = vadd.f32 %v4806_v55, %v1800_v39  ;;  %v2220_v40 = vand.u32 2147483648, %v4946_v37 }
 0x34a   : > { %v3311_v60 = vpop.eup %3310  ;;  %v1690_v51 = vadd.f32 %v1689_v6, %v4986_v27  ;;  %v5098_v25 = vadd.f32 1.0, %v3305_v20  ;;  %vm2215_vm12 = vweird.f32 %v5020_v36  ;;  %v2225_v33 = vmul.f32 %v5060_v58, %v5000_v46 }
 0x34b   : > { %v5085_v59 = vadd.f32 1.0, %v3311_v60  ;;  %v3106_v32 = vmul.f32 -1.442695, %v1870_v23  ;;  %v2528_v62 = vpop.permute.xlu0 %2527  ;;  %v1858_v2 = vadd.f32 %v4806_v55, %v1797_v28  ;;  %v2438_v27 = vadd.f32 %v5032_v21, %v2437_v16 }
 0x34c   : > { %v2615_v34 = vadd.f32 %v2528_v62, %v4719_v22  ;;  %v1485_v22 = vpop.f32.mrf.mxu0  ;;  %vm2440_vm8 = vweird.f32 %v5032_v21  ;;  %v2445_v53 = vand.u32 2147483648, %v4994_v44  ;;  %v2213_v5 = vadd.f32 %v5020_v36, %v2212_v49  ;;  %v1808_v17 = vpop.f32.mrf.mxu2 }
 0x34d   : > { %3314 = vrcp.f32 %v5085_v59  ;;  %v3095_v9 = vmul.f32 -1.442695, %v1859_v50  ;;  %v1803_v12 = vadd.f32 %v5025_v56, %v1690_v51  ;;  %vm2439_vm13 = vweird.f32 %v4994_v44 }
 0x34e   : > { %v2743_v52 = vadd.f32 %v2656_v24, %v2615_v34  ;;  %3316 = vpow2.f32 %v3106_v32  ;;  %2663 = vrot.lane.b32.xlu0 %v5080_v26, %s3450_s13  ;;  %v2443_v42 = vand.u32 2147483647, %v4994_v44  ;;  %v3313_v30 = vpop.eup %3312  ;;  %vm5122_vm14 = vmor %vm2439_vm13, %vm2440_vm8  ;;  %vm2214_vm15 = vweird.f32 %v4946_v37 }
 0x34f   : > { %3318 = vrcp.f32 %v5088_v19  ;;  %v2218_v56 = vand.u32 2147483647, %v4946_v37  ;;  %v3094_v4 = vmul.f32 -1.442695, %v1858_v2  ;;  %v2442_v44 = vsel %vm5122_vm14, %v5032_v21, %v2438_v27  ;;  %vm5134_vm4 = vmor %vm2214_vm15, %vm2215_vm12  ;;  %v1692_v20 = vpop.f32.mrf.mxu1 }
 0x350   : > { %v2775_v7 = vmul.f32 %v2743_v52, %v3579_v1  ;;  %v1696_v1 = vadd.f32 %v4660_v63, %v1485_v22  ;;  %3320 = vrcp.f32 %v5098_v25  ;;  %v2226_v3 = vsub.f32 1.0, %v2225_v33 }
 0x351   : > { %2537 = vrot.lane.b32.xlu2 %v5082_v8, %s3451_s29  ;;  %2535 = vrot.lane.b32.xlu1 %v5080_v26, %s3451_s29  ;;  %v2446_v35 = vor.u32 1.1754944e-38, %v2445_v53  ;;  %v2217_v37 = vsel %vm5134_vm4, %v5020_v36, %v2213_v5  ;;  %v2221_v15 = vor.u32 1.1754944e-38, %v2220_v40  ;;  %v5142_v14 = vadd.f32 1.0, %v3313_v30 }
 0x352   : > { %2807 = vst.msk [vmem:[%s3846_s7 + $0x40] sm:$0xff] %vm440_vm0, %v2775_v7  ;;  %3322 = vpow2.f32 %v3095_v9  ;;  %v1860_v21 = vadd.f32 %v4806_v55, %v1803_v12  ;;  %vm2444_vm1 = vcmp.eq.f32.partialorder %v2443_v42, 8.507059e+37  ;;  %vm2219_vm2 = vcmp.eq.f32.partialorder %v2218_v56, 8.507059e+37 }
 0x353   : > { %v3315_v29 = vpop.eup %3314  ;;  %v5149_v23 = vsel %vm2444_vm1, %v2446_v35, %v2442_v44  ;;  %3324 = vpow2.f32 %v3094_v4  ;;  %v1693_v36 = vadd.f32 %v1692_v20, %v5037_v54  ;;  %v5154_v6 = vsel %vm2219_vm2, %v2221_v15, %v2217_v37 }
 0x354   : > { %v2450_v13 = vmul.f32 %v3315_v29, %v5085_v59  ;;  %v3317_v11 = vpop.eup %3316  ;;  %v2227_v28 = vmul.f32 %v5060_v58, %v2226_v3  ;;  %vm2455_vm3 = vweird.f32 %v3315_v29  ;;  %v2460_v62 = vand.u32 2147483648, %v5085_v59  ;;  %v1488_v2 = vpop.f32.mrf.mxu0 }
 0x355   : > { %v5145_v10 = vpop.eup %3318  ;;  %v5147_v39 = vadd.f32 1.0, %v3317_v11  ;;  %v1809_v34 = vadd.f32 %v1808_v17, %v1696_v1  ;;  %v3096_v49 = vmul.f32 -1.442695, %v1860_v21  ;;  %v2458_v54 = vand.u32 2147483647, %v5085_v59  ;;  %v1811_v42 = vpop.f32.mrf.mxu2 }
 0x356   : > { %v2451_v60 = vsub.f32 1.0, %v2450_v13  ;;  %2569 = vrot.lane.b32.xlu0 %v5149_v23, %s3451_s29  ;;  %v5159_v16 = vpop.eup %3320  ;;  %vm2454_vm5 = vweird.f32 %v5085_v59  ;;  %v2255_v24 = vmul.f32 %v5145_v10, %v5088_v19  ;;  %v1806_v40 = vadd.f32 %v5090_v45, %v1693_v36 }
 0x357   : > { %3326 = vrcp.f32 %v5147_v39  ;;  %vm5171_vm9 = vmor %vm2454_vm5, %vm2455_vm3  ;;  %v2233_v33 = vand.u32 2147483647, %v5000_v46  ;;  %v2235_v22 = vand.u32 2147483648, %v5000_v46  ;;  %v2461_v7 = vor.u32 1.1754944e-38, %v2460_v62 }
 0x358   : > { %v2452_v32 = vmul.f32 %v3315_v29, %v2451_v60  ;;  %3328 = vrcp.f32 %v5142_v14  ;;  %v3323_v51 = vpop.eup %3322  ;;  %vm2230_vm10 = vweird.f32 %v5060_v58  ;;  %v2240_v59 = vmul.f32 %v5159_v16, %v5098_v25 }
 0x359   : > { %2667 = vrot.lane.b32.xlu2 %v5154_v6, %s3450_s13  ;;  %2665 = vrot.lane.b32.xlu1 %v5082_v8, %s3450_s13  ;;  %v3325_v53 = vpop.eup %3324  ;;  %v1862_v45 = vadd.f32 %v4806_v55, %v1809_v34  ;;  %3330 = vpow2.f32 %v3096_v49  ;;  %vm2459_vm6 = vcmp.eq.f32.partialorder %v2458_v54, 8.507059e+37  ;;  %v2228_v5 = vadd.f32 %v5060_v58, %v2227_v28 }
 0x35a   : > { %v2453_v50 = vadd.f32 %v3315_v29, %v2452_v32  ;;  %v5184_v12 = vadd.f32 1.0, %v3323_v51  ;;  %v2256_v1 = vsub.f32 1.0, %v2255_v24  ;;  %v1699_v56 = vadd.f32 %v4686_v38, %v1488_v2 }
 0x35b   : > { %vm2229_vm7 = vweird.f32 %v5000_v46  ;;  %v5196_v44 = vadd.f32 1.0, %v3325_v53  ;;  %vm5204_vm12 = vcmp.eq.f32.partialorder %v2233_v33, 8.507059e+37  ;;  %v2236_v38 = vor.u32 1.1754944e-38, %v2235_v22 }
 0x35c   : > { %v2457_v27 = vsel %vm5171_vm9, %v3315_v29, %v2453_v50  ;;  %v1861_v29 = vadd.f32 %v4806_v55, %v1806_v40  ;;  %vm5200_vm11 = vmor %vm2229_vm7, %vm2230_vm10  ;;  %v2241_v20 = vsub.f32 1.0, %v2240_v59  ;;  %v3098_v35 = vmul.f32 -1.442695, %v1862_v45 }
 0x35d   : > { %v3327_v9 = vpop.eup %3326  ;;  %v5186_v30 = vsel %vm2459_vm6, %v2461_v7, %v2457_v27  ;;  %v1812_v37 = vadd.f32 %v1811_v42, %v1699_v56  ;;  %v2232_v46 = vsel %vm5200_vm11, %v5060_v58, %v2228_v5  ;;  %3332 = vrcp.f32 %v5184_v12 }
 0x35e   : > { %v5188_v48 = vpop.eup %3328  ;;  %2539 = vrot.lane.b32.xlu0 %v5154_v6, %s3451_s29  ;;  %v2465_v4 = vmul.f32 %v3327_v9, %v5147_v39  ;;  %v2475_v13 = vand.u32 2147483648, %v5147_v39  ;;  %v2257_v11 = vmul.f32 %v5145_v10, %v2256_v1  ;;  %v3097_v60 = vmul.f32 -1.442695, %v1861_v29 }
 0x35f   : > { %v2270_v21 = vmul.f32 %v5188_v48, %v5142_v14  ;;  %v3331_v17 = vpop.eup %3330  ;;  %vm2470_vm8 = vweird.f32 %v3327_v9  ;;  %v2473_v28 = vand.u32 2147483647, %v5147_v39  ;;  %3334 = vrcp.f32 %v5196_v44 }
 0x360   : > { %v2466_v15 = vsub.f32 1.0, %v2465_v4  ;;  %v5222_v58 = vsel %vm5204_vm12, %v2236_v38, %v2232_v46  ;;  %v2242_v32 = vmul.f32 %v5159_v16, %v2241_v20  ;;  %3336 = vpow2.f32 %v3098_v35 }
 0x361   : > { %2571 = vrot.lane.b32.xlu1 %v5186_v30, %s3451_s29  ;;  %v1863_v62 = vadd.f32 %v4806_v55, %v1812_v37  ;;  %vm2469_vm13 = vweird.f32 %v5147_v39  ;;  %v5227_v49 = vadd.f32 1.0, %v3331_v17  ;;  %v2476_v54 = vor.u32 1.1754944e-38, %v2475_v13 }
 0x362   : > { %v2467_v36 = vmul.f32 %v3327_v9, %v2466_v15  ;;  %vm2471_vm14 = vmor %vm2469_vm13, %vm2470_vm8  ;;  %v2258_v50 = vadd.f32 %v5145_v10, %v2257_v11  ;;  %vm2260_vm15 = vweird.f32 %v5145_v10  ;;  %3338 = vpow2.f32 %v3097_v60 }
 0x363   : > { %vm2474_vm4 = vcmp.eq.f32.partialorder %v2473_v28, 8.507059e+37  ;;  %v2271_v51 = vsub.f32 1.0, %v2270_v21  ;;  %v5233_v40 = vpop.eup %3332  ;;  %vm2259_vm1 = vweird.f32 %v5088_v19  ;;  %v2265_v39 = vand.u32 2147483648, %v5088_v19 }
 0x364   : > { %v2468_v34 = vadd.f32 %v3327_v9, %v2467_v36  ;;  %v3099_v52 = vmul.f32 -1.442695, %v1863_v62  ;;  %v2263_v33 = vand.u32 2147483647, %v5088_v19  ;;  %v2243_v22 = vadd.f32 %v5159_v16, %v2242_v32  ;;  %vm5251_vm3 = vmor %vm2259_vm1, %vm2260_vm15 }
 0x365   : > { %vm2245_vm2 = vweird.f32 %v5159_v16  ;;  %v5246_v2 = vpop.eup %3334  ;;  %3340 = vrcp.f32 %v5227_v49  ;;  %vm2244_vm5 = vweird.f32 %v5098_v25  ;;  %v2250_v7 = vand.u32 2147483648, %v5098_v25 }
 0x366   : > { %2669 = vrot.lane.b32.xlu0 %v5222_v58, %s3450_s13  ;;  %v2472_v24 = vsel %vm2471_vm14, %v3327_v9, %v2468_v34  ;;  %v3337_v59 = vpop.eup %3336  ;;  %v2262_v19 = vsel %vm5251_vm3, %v5145_v10, %v2258_v50  ;;  %v2248_v53 = vand.u32 2147483647, %v5098_v25  ;;  %v2272_v45 = vmul.f32 %v5188_v48, %v2271_v51  ;;  %vm5264_vm9 = vmor %vm2244_vm5, %vm2245_vm2 }
 0x367   : > { %v5235_v55 = vsel %vm2474_vm4, %v2476_v54, %v2472_v24  ;;  %v2300_v5 = vmul.f32 %v5233_v40, %v5184_v12  ;;  %v2266_v9 = vor.u32 1.1754944e-38, %v2265_v39  ;;  %3342 = vpow2.f32 %v3099_v52 }
 0x368   : > { %2573 = vrot.lane.b32.xlu2 %v5235_v55, %s3451_s29  ;;  %v3339_v1 = vpop.eup %3338  ;;  %vm2264_vm10 = vcmp.eq.f32.partialorder %v2263_v33, 8.507059e+37  ;;  %v2247_v56 = vsel %vm5264_vm9, %v5159_v16, %v2243_v22  ;;  %v2285_v25 = vmul.f32 %v5246_v2, %v5196_v44  ;;  %v5273_v10 = vadd.f32 1.0, %v3337_v59 }
 0x369   : > { %2541 = vrot.lane.b32.xlu1 %v5222_v58, %s3451_s29  ;;  %v5275_v29 = vsel %vm2264_vm10, %v2266_v9, %v2262_v19  ;;  %v2251_v4 = vor.u32 1.1754944e-38, %v2250_v7  ;;  %vm2249_vm6 = vcmp.eq.f32.partialorder %v2248_v53, 8.507059e+37  ;;  %v2273_v63 = vadd.f32 %v5188_v48, %v2272_v45 }
 0x36a   : > { %vm2275_vm7 = vweird.f32 %v5188_v48  ;;  %v2301_v3 = vsub.f32 1.0, %v2300_v5  ;;  %v5283_v16 = vadd.f32 1.0, %v3339_v1  ;;  %v2280_v35 = vand.u32 2147483648, %v5142_v14 }
 0x36b   : > { %v5281_v38 = vpop.eup %3340  ;;  %v5285_v20 = vsel %vm2249_vm6, %v2251_v4, %v2247_v56  ;;  %vm2274_vm11 = vweird.f32 %v5142_v14  ;;  %v2278_v37 = vand.u32 2147483647, %v5142_v14  ;;  %v2286_v46 = vsub.f32 1.0, %v2285_v25 }
 0x36c   : > { %3344 = vrcp.f32 %v5273_v10  ;;  %vm2276_vm12 = vmor %vm2274_vm11, %vm2275_vm7  ;;  %v2302_v11 = vmul.f32 %v5233_v40, %v2301_v3  ;;  %v2315_v21 = vmul.f32 %v5281_v38, %v5227_v49  ;;  %v2281_v17 = vor.u32 1.1754944e-38, %v2280_v35 }
 0x36d   : > { %v3343_v15 = vpop.eup %3342  ;;  %v2277_v13 = vsel %vm2276_vm12, %v5188_v48, %v2273_v63  ;;  %3346 = vrcp.f32 %v5283_v16  ;;  %vm2279_vm8 = vcmp.eq.f32.partialorder %v2278_v37, 8.507059e+37  ;;  %v2287_v60 = vmul.f32 %v5246_v2, %v2286_v46 }
 0x36e   : > { %2545 = vrot.lane.b32.xlu0 %v5275_v29, %s3451_s29  ;;  %v5301_v36 = vadd.f32 1.0, %v3343_v15  ;;  %v5303_v14 = vsel %vm2279_vm8, %v2281_v17, %v2277_v13  ;;  %v2303_v48 = vadd.f32 %v5233_v40, %v2302_v11  ;;  %vm2305_vm13 = vweird.f32 %v5233_v40 }
 0x36f   : > { %v2316_v28 = vsub.f32 1.0, %v2315_v21  ;;  %v2310_v62 = vand.u32 2147483648, %v5184_v12  ;;  %vm2304_vm14 = vweird.f32 %v5184_v12  ;;  %v2308_v34 = vand.u32 2147483647, %v5184_v12 }
 0x370   : > { %2543 = vrot.lane.b32.xlu2 %v5285_v20, %s3451_s29  ;;  %v2288_v54 = vadd.f32 %v5246_v2, %v2287_v60  ;;  %vm2290_vm15 = vweird.f32 %v5246_v2  ;;  %3348 = vrcp.f32 %v5301_v36  ;;  %vm2306_vm4 = vmor %vm2304_vm14, %vm2305_vm13  ;;  %vm2289_vm1 = vweird.f32 %v5196_v44 }
 0x371   : > { %2671 = vrot.lane.b32.xlu1 %v5285_v20, %s3450_s13  ;;  %v2295_v24 = vand.u32 2147483648, %v5196_v44  ;;  %v2307_v51 = vsel %vm2306_vm4, %v5233_v40, %v2303_v48  ;;  %v2293_v39 = vand.u32 2147483647, %v5196_v44  ;;  %v2317_v52 = vmul.f32 %v5281_v38, %v2316_v28  ;;  %vm2291_vm2 = vmor %vm2289_vm1, %vm2290_vm15 }
 0x372   : > { %v5309_v32 = vpop.eup %3344  ;;  %v2311_v33 = vor.u32 1.1754944e-38, %v2310_v62  ;;  %vm2309_vm3 = vcmp.eq.f32.partialorder %v2308_v34, 8.507059e+37  ;;  %v2292_v22 = vsel %vm2291_vm2, %v5246_v2, %v2288_v54  ;;  %vm2320_vm9 = vweird.f32 %v5281_v38 }
 0x373   : > { %v5320_v50 = vpop.eup %3346  ;;  %v2345_v12 = vmul.f32 %v5309_v32, %v5273_v10  ;;  %v2296_v59 = vor.u32 1.1754944e-38, %v2295_v24  ;;  %vm2294_vm5 = vcmp.eq.f32.partialorder %v2293_v39, 8.507059e+37  ;;  %v2318_v44 = vadd.f32 %v5281_v38, %v2317_v52  ;;  %v2658_v39 = vpop.permute.xlu0 %2657 }
 0x374   : > { %v2330_v27 = vmul.f32 %v5320_v50, %v5283_v16  ;;  %v5333_v7 = vsel %vm2309_vm3, %v2311_v33, %v2307_v51  ;;  %v2325_v2 = vand.u32 2147483648, %v5227_v49  ;;  %vm2319_vm10 = vweird.f32 %v5227_v49 }
 0x375   : > { %v2346_v40 = vsub.f32 1.0, %v2345_v12  ;;  %v5339_v53 = vsel %vm2294_vm5, %v2296_v59, %v2292_v22  ;;  %v2323_v5 = vand.u32 2147483647, %v5227_v49  ;;  %vm2321_vm6 = vmor %vm2319_vm10, %vm2320_vm9  ;;  %vm2350_vm11 = vweird.f32 %v5309_v32 }
 0x376   : > { %2675 = vrot.lane.b32.xlu0 %v5303_v14, %s3450_s13  ;;  %v3349_v19 = vpop.eup %3348  ;;  %v2331_v9 = vsub.f32 1.0, %v2330_v27  ;;  %v2322_v42 = vsel %vm2321_vm6, %v5281_v38, %v2318_v44  ;;  %v2326_v25 = vor.u32 1.1754944e-38, %v2325_v2  ;;  %v2355_v38 = vand.u32 2147483648, %v5273_v10 }
 0x377   : > { %v2347_v1 = vmul.f32 %v5309_v32, %v2346_v40  ;;  %v2360_v56 = vmul.f32 %v3349_v19, %v5301_v36  ;;  %vm2324_vm7 = vcmp.eq.f32.partialorder %v2323_v5, 8.507059e+37  ;;  %vm2349_vm12 = vweird.f32 %v5273_v10  ;;  %v5630_v40 = vld [vmem:[#allocation11_spill] sm:$0xff] }
 0x378   : > { %2673 = vrot.lane.b32.xlu2 %v5275_v29, %s3450_s13  ;;  %v2332_v4 = vmul.f32 %v5320_v50, %v2331_v9  ;;  %v5352_v63 = vsel %vm2324_vm7, %v2326_v25, %v2322_v42  ;;  %v2353_v37 = vand.u32 2147483647, %v5273_v10  ;;  %vm2335_vm8 = vweird.f32 %v5320_v50  ;;  %vm2351_vm13 = vmor %vm2349_vm12, %vm2350_vm11 }
 0x379   : > { %2547 = vrot.lane.b32.xlu1 %v5303_v14, %s3451_s29  ;;  %v2348_v3 = vadd.f32 %v5309_v32, %v2347_v1  ;;  %v2361_v49 = vsub.f32 1.0, %v2360_v56  ;;  %v2340_v15 = vand.u32 2147483648, %v5283_v16  ;;  %vm2334_vm14 = vweird.f32 %v5283_v16  ;;  %v5632_v56 = vld [vmem:[#allocation8_spill] sm:$0xff] }
 0x37a   : > { %v2333_v46 = vadd.f32 %v5320_v50, %v2332_v4  ;;  %v2338_v11 = vand.u32 2147483647, %v5283_v16  ;;  %v2356_v17 = vor.u32 1.1754944e-38, %v2355_v38  ;;  %vm2336_vm15 = vmor %vm2334_vm14, %vm2335_vm8  ;;  %vm2354_vm4 = vcmp.eq.f32.partialorder %v2353_v37, 8.507059e+37 }
 0x37b   : > { %v2352_v13 = vsel %vm2351_vm13, %v5309_v32, %v2348_v3  ;;  %v2362_v21 = vmul.f32 %v3349_v19, %v2361_v49  ;;  %v2341_v48 = vor.u32 1.1754944e-38, %v2340_v15  ;;  %vm2365_vm2 = vweird.f32 %v3349_v19 }
 0x37c   : > { %v2337_v60 = vsel %vm2336_vm15, %v5320_v50, %v2333_v46  ;;  %v5372_v10 = vsel %vm2354_vm4, %v2356_v17, %v2352_v13  ;;  %vm2339_vm1 = vcmp.eq.f32.partialorder %v2338_v11, 8.507059e+37  ;;  %v2370_v62 = vand.u32 2147483648, %v5301_v36  ;;  %v5634_v17 = vld [vmem:[#allocation9_spill] sm:$0xff] }
 0x37d   : > { %v2363_v28 = vadd.f32 %v3349_v19, %v2362_v21  ;;  %v5376_v32 = vsel %vm2339_vm1, %v2341_v48, %v2337_v60  ;;  %vm2364_vm3 = vweird.f32 %v5301_v36  ;;  %v2368_v16 = vand.u32 2147483647, %v5301_v36  ;;  %v5635_v48 = vld [vmem:[#allocation26_spill] sm:$0xff] }
 0x37e   : > { %2551 = vrot.lane.b32.xlu0 %v5333_v7, %s3451_s29  ;;  %vm2366_vm5 = vmor %vm2364_vm3, %vm2365_vm2  ;;  %v2371_v50 = vor.u32 1.1754944e-38, %v2370_v62 }
 0x37f   : > { %v2367_v54 = vsel %vm2366_vm5, %v3349_v19, %v2363_v28  ;;  %vm2369_vm9 = vcmp.eq.f32.partialorder %v2368_v16, 8.507059e+37 }
 0x380   : > { %v2562_v45 = vpop.permute.xlu2 %2561  ;;  %2549 = vrot.lane.b32.xlu2 %v5339_v53, %s3451_s29  ;;  %v5385_v24 = vsel %vm2369_vm9, %v2371_v50, %v2367_v54 }
 0x381   : > { %2677 = vrot.lane.b32.xlu1 %v5339_v53, %s3450_s13  ;;  %v2632_v51 = vadd.f32 %v2562_v45, %v4829_v57  ;;  %v5631_v45 = vld [vmem:[#allocation25_spill] sm:$0xff] }
 0x386   : > { %2681 = vrot.lane.b32.xlu0 %v5352_v63, %s3450_s13 }
 0x388   : > { %2679 = vrot.lane.b32.xlu2 %v5333_v7, %s3450_s13 }
 0x389   : > { %2553 = vrot.lane.b32.xlu1 %v5352_v63, %s3451_s29  ;;  %v2692_v35 = vpop.permute.xlu2 %2691 }
 0x38e   : > { %2557 = vrot.lane.b32.xlu0 %v5372_v10, %s3451_s29 }
 0x390   : > { %2555 = vrot.lane.b32.xlu2 %v5376_v32, %s3451_s29 }
 0x391   : > { %2683 = vrot.lane.b32.xlu1 %v5376_v32, %s3450_s13  ;;  %v2532_v34 = vpop.permute.xlu2 %2531 }
 0x392   : > { %v2617_v5 = vadd.f32 %v2532_v34, %v4910_v31  ;;  %v5633_v31 = vld [vmem:[#allocation24_spill] sm:$0xff]  ;;  %v5636_v34 = vld [vmem:[#allocation10_spill] sm:$0xff] }
 0x396   : > { %2687 = vrot.lane.b32.xlu0 %v5385_v24, %s3450_s13 }
 0x398   : > { %v2690_v52 = vpop.permute.xlu1 %2689  ;;  %2685 = vrot.lane.b32.xlu2 %v5372_v10, %s3450_s13 }
 0x399   : > { %2559 = vrot.lane.b32.xlu1 %v5385_v24, %s3451_s29  ;;  %v2760_v36 = vadd.f32 %v2690_v52, %v2632_v51  ;;  %v2662_v33 = vpop.permute.xlu2 %2661  ;;  %s3109_s29 = sshll.u32 %s3433_s25, 6 }
 0x39b   : > { %v2792_v12 = vmul.f32 %v2760_v36, %v3722_v18 }
 0x39d   : > { %2824 = vst.msk [vmem:[%s3846_s7 + $0xc8] sm:$0xff] %vm440_vm0, %v2792_v12  ;;  %v5637_v12 = vld [vmem:[#allocation15_spill] sm:$0xff] }
 0x39e   : > { %2699 = vrot.lane.b32.xlu0 %v5186_v30, %s3450_s13 }
 0x3a0   : > { %v2530_v57 = vpop.permute.xlu1 %2529  ;;  %v2564_v22 = vpop.permute.xlu0 %2563  ;;  %2697 = vrot.lane.b32.xlu2 %v5149_v23, %s3450_s13 }
 0x3a1   : > { %2701 = vrot.lane.b32.xlu1 %v5235_v55, %s3450_s13  ;;  %v2616_v27 = vadd.f32 %v2530_v57, %v4727_v43  ;;  %v2633_v18 = vadd.f32 %v2564_v22, %v4866_v47  ;;  %s3108_s13 = sshll.u32 %s3429_s24, 5 }
 0x3a2   : > { %s2843_s18 = sadd.s32 %s3109_s29, %s3108_s13  ;;  %s3371_s29 = scalar_lea.hbm %s5549_s6, 1024 }
 0x3a3   : > { %v2744_v59 = vadd.f32 %v2658_v39, %v2616_v27  ;;  %v2761_v44 = vadd.f32 %v2692_v35, %v2633_v18  ;;  %v2568_v9 = vpop.permute.xlu2 %2567  ;;  %s3110_s9 = sshll.u32 %s2843_s18, 3 }
 0x3a4   : > { %v2635_v37 = vadd.f32 %v2568_v9, %v5064_v41  ;;  %s2845_s16 = scalar_lea.hbm %s5549_s6, %s3110_s9 }
 0x3a5   : > { %v2776_v19 = vmul.f32 %v2744_v59, %v5630_v40  ;;  %v2793_v2 = vmul.f32 %v2761_v44, %v5631_v45  ;;  %v5638_v59 = vld [vmem:[#allocation13_spill] sm:$0xff]  ;;  %s2848_s19 = sshll.u32 %s2845_s16, 4  ;;  %s2849_s19 = int_to_ptr.hbm [resolvable:$true] %s2848_s19 }
 0x3a6   : > { %s3365_s30 = sshra.s32 %s2849_s19, 4  ;;  %s3366_s30 = int_to_ptr.hbm [resolvable:$true] %s3365_s30 }
 0x3a7   : > { %2808 = vst.msk [vmem:[%s3846_s7 + $0x48] sm:$0xff] %vm440_vm0, %v2776_v19  ;;  %s3367_s12 = scalar_lea.hbm %s3366_s30, 256  ;;  %p3372_p10 = scmp.lt.s32.totalorder %s3366_s30, %s5549_s6 }
 0x3a8   : > { %2825 = vst.msk [vmem:[%s3846_s7 + $0xd0] sm:$0xff] %vm440_vm0, %v2793_v2  ;;  %v2660_v42 = vpop.permute.xlu1 %2659  ;;  %p3368_p6 = scmp.ne.s32.totalorder %s3366_s30, %s3367_s12  ;;  %p3373_p11 = scmp.lt.s32.totalorder %s3371_s29, %s3367_s12 }
 0x3a9   : > { %v2745_v1 = vadd.f32 %v2660_v42, %v2617_v5  ;;  %v5639_v5 = vld [vmem:[#allocation12_spill] sm:$0xff] }
 0x3aa   : > { %p3369_p7 = pnand %p3368_p6, %p3540_p3  ;;  %p3374_p12 = por %p3373_p11, %p3372_p10 }
 0x3ab   : > { %v2777_v43 = vmul.f32 %v2745_v1, %v5632_v56  ;;  %v2538_v47 = vpop.permute.xlu2 %2537 }
 0x3ac   : > { %v2620_v51 = vadd.f32 %v2538_v47, %v5082_v8  ;;  %p3370_p9 = pneg %p3369_p7 }
 0x3ad   : > { %2809 = vst.msk [vmem:[%s3846_s7 + $0x50] sm:$0xff] %vm440_vm0, %v2777_v43 }
 0x3ae   : > { %p3375_p13 = pnand %p3374_p12, %p3370_p9 }
 0x3b0   : > { %v2694_v25 = vpop.permute.xlu0 %2693  ;;  %v2566_v4 = vpop.permute.xlu1 %2565 }
 0x3b1   : > { %v2634_v3 = vadd.f32 %v2566_v4, %v5004_v61  ;;  %v5640_v4 = vld [vmem:[#allocation16_spill] sm:$0xff] }
 0x3b3   : > { %v2762_v49 = vadd.f32 %v2694_v25, %v2634_v3  ;;  %v2668_v15 = vpop.permute.xlu2 %2667 }
 0x3b5   : > { %v2794_v38 = vmul.f32 %v2762_v49, %v5633_v31  ;;  %v5641_v49 = vld [vmem:[#allocation19_spill] sm:$0xff] }
 0x3b7   : > { %2826 = vst.msk [vmem:[%s3846_s7 + $0xd8] sm:$0xff] %vm440_vm0, %v2794_v38 }
 0x3b8   : > { %v2534_v35 = vpop.permute.xlu0 %2533 }
 0x3b9   : > { %v2618_v46 = vadd.f32 %v2534_v35, %v4979_v0 }
 0x3bb   : > { %v2696_v13 = vpop.permute.xlu1 %2695  ;;  %v2746_v11 = vadd.f32 %v2662_v33, %v2618_v46 }
 0x3bc   : > { %v2763_v21 = vadd.f32 %v2696_v13, %v2635_v37  ;;  %v5642_v37 = vld [vmem:[#allocation14_spill] sm:$0xff] }
 0x3bd   : > { %v2778_v60 = vmul.f32 %v2746_v11, %v5634_v17 }
 0x3be   : > { %v2795_v28 = vmul.f32 %v2763_v21, %v5635_v48 }
 0x3bf   : > { %2810 = vst.msk [vmem:[%s3846_s7 + $0x58] sm:$0xff] %vm440_vm0, %v2778_v60 }
 0x3c0   : > { %2827 = vst.msk [vmem:[%s3846_s7 + $0xe0] sm:$0xff] %vm440_vm0, %v2795_v28  ;;  %v2664_v61 = vpop.permute.xlu0 %2663  ;;  %v5643_v28 = vld [vmem:[#allocation18_spill] sm:$0xff] }
 0x3c2   : > { %v5427_v16 = vpop.permute.xlu2 %2573 }
 0x3c3   : > { %v2536_v62 = vpop.permute.xlu1 %2535 }
 0x3c4   : > { %v2619_v0 = vadd.f32 %v2536_v62, %v5080_v26  ;;  %v5644_v62 = vld [vmem:[#allocation21_spill] sm:$0xff] }
 0x3c6   : > { %v2747_v41 = vadd.f32 %v2664_v61, %v2619_v0 }
 0x3c8   : > { %v2779_v54 = vmul.f32 %v2747_v41, %v5636_v34  ;;  %v2570_v50 = vpop.permute.xlu0 %2569 }
 0x3ca   : > { %2811 = vst.msk [vmem:[%s3846_s7 + $0x60] sm:$0xff] %vm440_vm0, %v2779_v54  ;;  %v2544_v52 = vpop.permute.xlu2 %2543 }
 0x3cb   : > { %v2666_v39 = vpop.permute.xlu1 %2665 }
 0x3cc   : > { %v2748_v36 = vadd.f32 %v2666_v39, %v2620_v51  ;;  %v5645_v39 = vld [vmem:[#allocation28_spill] sm:$0xff] }
 0x3ce   : > { %v2780_v33 = vmul.f32 %v2748_v36, %v5637_v12  ;;  %v5646_v36 = vld [vmem:[#allocation17_spill] sm:$0xff] }
 0x3d0   : > { %2812 = vst.msk [vmem:[%s3846_s7 + $0x68] sm:$0xff] %vm440_vm0, %v2780_v33  ;;  %v2540_v57 = vpop.permute.xlu0 %2539 }
 0x3d1   : > { %v2621_v26 = vadd.f32 %v2540_v57, %v5154_v6  ;;  %v2623_v6 = vadd.f32 %v2544_v52, %v5285_v20 }
 0x3d2   : > { %v2674_v22 = vpop.permute.xlu2 %2673 }
 0x3d3   : > { %v5438_v27 = vpop.permute.xlu1 %2571  ;;  %v2749_v18 = vadd.f32 %v2668_v15, %v2621_v26 }
 0x3d5   : > { %v2781_v44 = vmul.f32 %v2749_v18, %v5638_v59  ;;  %v5648_v59 = vld [vmem:[#allocation22_spill] sm:$0xff] }
 0x3d7   : > { %2813 = vst.msk [vmem:[%s3846_s7 + $0x70] sm:$0xff] %vm440_vm0, %v2781_v44 }
 0x3d8   : > { %v2670_v8 = vpop.permute.xlu0 %2669 }
 0x3da   : > { %v2550_v40 = vpop.permute.xlu2 %2549 }
 0x3db   : > { %v2542_v19 = vpop.permute.xlu1 %2541  ;;  %v2626_v13 = vadd.f32 %v2550_v40, %v5339_v53  ;;  %v2636_v53 = vadd.f32 %v2570_v50, %v5149_v23 }
 0x3dc   : > { %v2622_v45 = vadd.f32 %v2542_v19, %v5222_v58  ;;  %v2637_v19 = vadd.f32 %v5438_v27, %v5186_v30  ;;  %v5650_v30 = vld [vmem:[#allocation27_spill] sm:$0xff] }
 0x3de   : > { %v2750_v2 = vadd.f32 %v2670_v8, %v2622_v45  ;;  %v5649_v45 = vld [vmem:[#allocation23_spill] sm:$0xff] }
 0x3e0   : > { %v2782_v9 = vmul.f32 %v2750_v2, %v5639_v5  ;;  %v2546_v42 = vpop.permute.xlu0 %2545 }
 0x3e1   : > { %v2624_v1 = vadd.f32 %v2546_v42, %v5275_v29 }
 0x3e2   : > { %2814 = vst.msk [vmem:[%s3846_s7 + $0x78] sm:$0xff] %vm440_vm0, %v2782_v9  ;;  %v2680_v56 = vpop.permute.xlu2 %2679  ;;  %v2638_v9 = vadd.f32 %v5427_v16, %v5235_v55 }
 0x3e3   : > { %v2672_v43 = vpop.permute.xlu1 %2671  ;;  %v2752_v47 = vadd.f32 %v2674_v22, %v2624_v1  ;;  %v5647_v22 = vld [vmem:[#allocation20_spill] sm:$0xff]  ;;  %v5651_v1 = vld [vmem:[#allocation29_spill] sm:$0xff] }
 0x3e4   : > { %v2751_v25 = vadd.f32 %v2672_v43, %v2623_v6 }
 0x3e5   : > { %v2784_v3 = vmul.f32 %v2752_v47, %v5640_v4 }
 0x3e6   : > { %v2783_v31 = vmul.f32 %v2751_v25, %v5641_v49 }
 0x3e7   : > { %2816 = vst.msk [vmem:[%s3846_s7 + $0x88] sm:$0xff] %vm440_vm0, %v2784_v3 }
 0x3e8   : > { %2815 = vst.msk [vmem:[%s3846_s7 + $0x80] sm:$0xff] %vm440_vm0, %v2783_v31  ;;  %v2676_v58 = vpop.permute.xlu0 %2675 }
 0x3ea   : > { %v2556_v38 = vpop.permute.xlu2 %2555 }
 0x3eb   : > { %v2548_v20 = vpop.permute.xlu1 %2547  ;;  %v2629_v57 = vadd.f32 %v2556_v38, %v5376_v32 }
 0x3ec   : > { %v2625_v29 = vadd.f32 %v2548_v20, %v5303_v14 }
 0x3ee   : > { %v2753_v35 = vadd.f32 %v2676_v58, %v2625_v29 }
 0x3f0   : > { %v2785_v46 = vmul.f32 %v2753_v35, %v5642_v37  ;;  %v2552_v15 = vpop.permute.xlu0 %2551 }
 0x3f1   : > { %v2627_v11 = vadd.f32 %v2552_v15, %v5333_v7 }
 0x3f2   : > { %2817 = vst.msk [vmem:[%s3846_s7 + $0x90] sm:$0xff] %vm440_vm0, %v2785_v46  ;;  %v2686_v17 = vpop.permute.xlu2 %2685 }
 0x3f3   : > { %v2678_v21 = vpop.permute.xlu1 %2677  ;;  %v2755_v60 = vadd.f32 %v2680_v56, %v2627_v11 }
 0x3f4   : > { %v2754_v48 = vadd.f32 %v2678_v21, %v2626_v13 }
 0x3f5   : > { %v2787_v61 = vmul.f32 %v2755_v60, %v5643_v28 }
 0x3f6   : > { %v2786_v14 = vmul.f32 %v2754_v48, %v5644_v62 }
 0x3f7   : > { %2819 = vst.msk [vmem:[%s3846_s7 + $0xa0] sm:$0xff] %vm440_vm0, %v2787_v61 }
 0x3f8   : > { %2818 = vst.msk [vmem:[%s3846_s7 + $0x98] sm:$0xff] %vm440_vm0, %v2786_v14  ;;  %v2682_v0 = vpop.permute.xlu0 %2681 }
 0x3fa   : > { %v2698_v34 = vpop.permute.xlu2 %2697 }
 0x3fb   : > { %v2554_v41 = vpop.permute.xlu1 %2553  ;;  %v2764_v54 = vadd.f32 %v2698_v34, %v2636_v53 }
 0x3fc   : > { %v2628_v7 = vadd.f32 %v2554_v41, %v5352_v63 }
 0x3fd   : > { %v2796_v52 = vmul.f32 %v2764_v54, %v5645_v39 }
 0x3fe   : > { %v2756_v51 = vadd.f32 %v2682_v0, %v2628_v7 }
 0x3ff   : > { %2828 = vst.msk [vmem:[%s3846_s7 + $0xe8] sm:$0xff] %vm440_vm0, %v2796_v52 }
 0x400   : > { %v2788_v12 = vmul.f32 %v2756_v51, %v5646_v36  ;;  %v2558_v33 = vpop.permute.xlu0 %2557 }
 0x401   : > { %v2630_v23 = vadd.f32 %v2558_v33, %v5372_v10 }
 0x402   : > { %2820 = vst.msk [vmem:[%s3846_s7 + $0xa8] sm:$0xff] %vm440_vm0, %v2788_v12 }
 0x403   : > { %v2684_v50 = vpop.permute.xlu1 %2683  ;;  %v2758_v63 = vadd.f32 %v2686_v17, %v2630_v23 }
 0x404   : > { %v2757_v26 = vadd.f32 %v2684_v50, %v2629_v57 }
 0x405   : > { %v2790_v18 = vmul.f32 %v2758_v63, %v5647_v22 }
 0x406   : > { %v2789_v44 = vmul.f32 %v2757_v26, %v5648_v59 }
 0x407   : > { %2822 = vst.msk [vmem:[%s3846_s7 + $0xb8] sm:$0xff] %vm440_vm0, %v2790_v18 }
 0x408   : > { %2821 = vst.msk [vmem:[%s3846_s7 + $0xb0] sm:$0xff] %vm440_vm0, %v2789_v44  ;;  %v2688_v32 = vpop.permute.xlu0 %2687 }
 0x40b   : > { %v2560_v8 = vpop.permute.xlu1 %2559 }
 0x40c   : > { %v2631_v10 = vadd.f32 %v2560_v8, %v5385_v24 }
 0x40e   : > { %v2759_v40 = vadd.f32 %v2688_v32, %v2631_v10 }
 0x410   : > { %v2791_v2 = vmul.f32 %v2759_v40, %v5649_v45  ;;  %v2700_v5 = vpop.permute.xlu0 %2699 }
 0x411   : > { %v2765_v24 = vadd.f32 %v2700_v5, %v2637_v19 }
 0x412   : > { %2823 = vst.msk [vmem:[%s3846_s7 + $0xc0] sm:$0xff] %vm440_vm0, %v2791_v2 }
 0x413   : > { %v2702_v42 = vpop.permute.xlu1 %2701  ;;  %v2797_v27 = vmul.f32 %v2765_v24, %v5650_v30 }
 0x414   : > { %v2766_v6 = vadd.f32 %v2702_v42, %v2638_v9 }
 0x415   : > { %2829 = vst.msk [vmem:[%s3846_s7 + $0xf0] sm:$0xff] %vm440_vm0, %v2797_v27 }
 0x416   : > { %v2798_v56 = vmul.f32 %v2766_v6, %v5651_v1 }
 0x418   : > { %2830 = vst.msk [vmem:[%s3846_s7 + $0xf8] sm:$0xff] %vm440_vm0, %v2798_v56 }
 0x419   : > { %3378 = shalt.err (!%p3375_p13)
}
 0x41a   : > { %s3452_s20 = smov 128   ;;  %s3453_s7 = smov 8  }
 0x41b   : > { %3143 = dma.vmem_to_hbm [thread:$0]  (%p3540_p3), %s2847_s17, 4096, %s2849_s19, %s2832_s8, %s3452_s20, %s3452_s20, %s3453_s7  }
 0x41c PF: > { %p3149_p0 = scmp.ge.s32.totalorder %s3445_s28, 2  ;;  %s2863_s24 = sand.u32 1, %s3417_s21  }
 0x41d   : > { %s2864_s25 = scalar_lea.sflag [#allocation4], %s2863_s24 }
 0x41e   : > { %p3146_p1 = pnand %p3149_p0, %p3549_p8 }
 0x420   : > { %p3147_p2 = pneg %p3146_p1 }
 0x422   : > { %3412 = dma.done.wait (%p3147_p2), %s2864_s25, 4096  }
 0x423   : > { %3414 = vsyncadd (%p3147_p2), %s2864_s25, 4294963200  ;;  %s19_s28 = sadd.s32 1, %s3445_s28   ;;  %s5652_s10 = sld [smem:[#allocation6_spill]] }
 0x424   : > { %p16_p4 = scmp.ge.s32.totalorder %s19_s28, 6   ;;  %s5653_s16 = sld [smem:[#allocation7_spill]] }
 0x425   : > { %s5654_s21 = smov %s3421_s22  ;;  %s5655_s22 = smov %s3425_s23 }
 0x426   : > { %s5656_s23 = smov %s3558_s15  ;;  %s5657_s24 = smov %s3437_s26 }
 0x427   : > { %s5658_s25 = smov %s3441_s27  ;;  %18 = sbr.rel (!%p16_p4) target bundleno = 5 (0x5), region = 97 }
 0x429   : > { %s5659_s26 = smov %s5652_s10 }
 0x42a   : > { %s5660_s27 = smov %s5653_s16 }
 0x42c   :  { %2870 = vsyncpa [#allocation4], 1 }
 0x42d   :  { %2872 = vsyncpa [#allocation4 + $0x1], 1 }

</bundles_post_ra>
